<compile_context>
chip_gen: v7x
topology: tpu7x:2x2x1
jax: 0.10.0
libtpu: 0.0.40
codegen_flags: <defaults>
</compile_context>

<pallas_src>
import jax
import jax.numpy as jnp
from jax.experimental import pallas as pl
from jax.experimental.pallas import tpu as pltpu

OUT_LANES = 128  # lane-dense output width; column 0 holds the real logit


def _round_up(n, m):
    return ((n + m - 1) // m) * m


def _leaky_relu(x, slope=0.2):
    return jnp.where(x > 0, x, slope * x)


def disc_kernel(x_ref,
                w1_ref, b1_ref,
                w2_ref, b2_ref,
                w3_ref, b3_ref,
                w4_ref, b4_ref,
                o_ref):
    # Layers 1-3: bf16 MXU matmuls with f32 accumulation; bias + LeakyReLU on
    # the VPU in f32, re-cast to bf16 only to feed the next MXU matmul.
    h = jnp.dot(x_ref[...], w1_ref[...], preferred_element_type=jnp.float32)
    h = _leaky_relu(h + b1_ref[...])

    h = jnp.dot(h.astype(jnp.bfloat16), w2_ref[...],
                preferred_element_type=jnp.float32)
    h = _leaky_relu(h + b2_ref[...])

    h = jnp.dot(h.astype(jnp.bfloat16), w3_ref[...],
                preferred_element_type=jnp.float32)
    h = _leaky_relu(h + b3_ref[...])

    # Layer 4 (256 -> 1): VPU broadcast-multiply + XLU lane reduction instead
    # of an N=1 MXU matmul.
    logit = jnp.sum(h * w4_ref[...].astype(jnp.float32),
                    axis=-1, keepdims=True)
    logit = logit + b4_ref[...]

    # Lane-dense store (tb, 128); the wrapper slices column 0.
    o_ref[...] = jnp.broadcast_to(logit, o_ref.shape).astype(o_ref.dtype)


def prepare_kernel_params(params):
    """f32 torch-convention params -> kernel-ready bf16 params.

    * w1 rows (K dim) zero-padded 784 -> 896 (multiple of 128).
    * w4 stored as a lane-dense (1, 256) row for the in-kernel VPU reduction.
    * biases kept in f32 (added to the f32 accumulator; they are tiny).
    """
    w1 = params["w1"]
    i_pad = _round_up(w1.shape[0], 128)
    return {
        "w1": jnp.pad(w1, ((0, i_pad - w1.shape[0]), (0, 0))).astype(jnp.bfloat16),
        "b1": params["b1"].astype(jnp.float32),
        "w2": params["w2"].astype(jnp.bfloat16),
        "b2": params["b2"].astype(jnp.float32),
        "w3": params["w3"].astype(jnp.bfloat16),
        "b3": params["b3"].astype(jnp.float32),
        "w4": params["w4"].reshape(1, -1).astype(jnp.bfloat16),  # (256,1)->(1,256)
        "b4": params["b4"].reshape(1, 1).astype(jnp.float32),
    }


def discriminator_forward(x, kparams, *, batch_tile=256):
    """x: (B, i_dim) float32. kparams: output of prepare_kernel_params."""
    B, i_dim = x.shape
    i_pad = kparams["w1"].shape[0]

    # Batch tile: as large as requested, but a multiple of 8 and (when the
    # batch allows it) small enough for >= 2 grid steps so v7x can use both
    # TensorCores via the "parallel" grid axis.
    tb = min(batch_tile, _round_up(B, 8))
    if B >= 16:
        tb = min(tb, _round_up(pl.cdiv(B, 2), 8))
    Bp = _round_up(B, tb)

    # Zero-pad batch to a tile multiple and features to 896; cast to bf16 once
    # in the wrapper (no redundant per-step cast inside the kernel).
    x_p = x
    if Bp != B or i_pad != i_dim:
        x_p = jnp.pad(x, ((0, Bp - B), (0, i_pad - i_dim)))
    x_p = x_p.astype(jnp.bfloat16)

    grid = (Bp // tb,)

    def x_map(i):
        return (i, 0)

    def full_map(i):
        return (0, 0)

    w1, b1 = kparams["w1"], kparams["b1"]
    w2, b2 = kparams["w2"], kparams["b2"]
    w3, b3 = kparams["w3"], kparams["b3"]
    w4, b4 = kparams["w4"], kparams["b4"]

    # All bf16 weights (~3 MiB) stay VMEM-resident; constant index_maps mean
    # they are DMA'd only once. Only the batch dimension is tiled.
    in_specs = [
        pl.BlockSpec((tb, i_pad), x_map),
        pl.BlockSpec(w1.shape, full_map), pl.BlockSpec(b1.shape, full_map),
        pl.BlockSpec(w2.shape, full_map), pl.BlockSpec(b2.shape, full_map),
        pl.BlockSpec(w3.shape, full_map), pl.BlockSpec(b3.shape, full_map),
        pl.BlockSpec(w4.shape, full_map), pl.BlockSpec(b4.shape, full_map),
    ]
    out_spec = pl.BlockSpec((tb, OUT_LANES), x_map)

    out = pl.pallas_call(
        disc_kernel,
        out_shape=jax.ShapeDtypeStruct((Bp, OUT_LANES), jnp.float32),
        grid_spec=pltpu.PrefetchScalarGridSpec(
            num_scalar_prefetch=0,
            grid=grid,
            in_specs=in_specs,
            out_specs=out_spec,
        ),
        compiler_params=pltpu.CompilerParams(
            dimension_semantics=("parallel",),
            vmem_limit_bytes=32 << 20,
        ),
    )(x_p, w1, b1, w2, b2, w3, b3, w4, b4)

    # Drop batch padding, keep the single real logit lane.
    return out[:B, :1]


def init_params(key, i_dim=784, h_dim=256):
    """Synthetic init matching nn.Linear's U(-1/sqrt(fan_in), +) scheme (f32)."""
    dims = [i_dim, h_dim * 4, h_dim * 2, h_dim, 1]
    params = {}
    for idx in range(4):
        fan_in, fan_out = dims[idx], dims[idx + 1]
        key, kw, kb = jax.random.split(key, 3)
        bound = 1.0 / jnp.sqrt(jnp.float32(fan_in))
        params[f"w{idx + 1}"] = jax.random.uniform(
            kw, (fan_in, fan_out), jnp.float32, -bound, bound)
        params[f"b{idx + 1}"] = jax.random.uniform(
            kb, (1, fan_out), jnp.float32, -bound, bound)
    return params


def reference_forward(x, kparams):
    """Pure-JAX reference with the same bf16-in / f32-accumulate precision path."""
    i_pad = kparams["w1"].shape[0]
    h = jnp.pad(x, ((0, 0), (0, i_pad - x.shape[1]))).astype(jnp.bfloat16)
    h = jnp.dot(h, kparams["w1"], preferred_element_type=jnp.float32) + kparams["b1"]
    h = jnp.where(h > 0, h, 0.2 * h)
    h = jnp.dot(h.astype(jnp.bfloat16), kparams["w2"],
                preferred_element_type=jnp.float32) + kparams["b2"]
    h = jnp.where(h > 0, h, 0.2 * h)
    h = jnp.dot(h.astype(jnp.bfloat16), kparams["w3"],
                preferred_element_type=jnp.float32) + kparams["b3"]
    h = jnp.where(h > 0, h, 0.2 * h)
    return jnp.sum(h * kparams["w4"].astype(jnp.float32),
                   axis=-1, keepdims=True) + kparams["b4"]


if __name__ == "__main__":
    key = jax.random.PRNGKey(0)
    key, kx = jax.random.split(key)

    # Small, module-consistent shapes: flattened 28x28 images, modest batch.
    B, I_DIM, H_DIM = 64, 784, 256
    x = jax.random.normal(kx, (B, I_DIM), jnp.float32)

    params = init_params(key, i_dim=I_DIM, h_dim=H_DIM)
    kparams = prepare_kernel_params(params)

    out = discriminator_forward(x, kparams)   # tb=32 -> grid of 2 steps
    out = jax.block_until_ready(out)

    ref = reference_forward(x, kparams)
    assert out.shape == (B, 1)
    assert jnp.allclose(out, ref, atol=2e-3, rtol=2e-3), "mismatch vs reference"

    print("KERNEL_OK")
</pallas_src>

<mosaic_0001>
module attributes {stable_mosaic.version = 11 : i64} {
  func.func @disc_kernel(%arg0: i32, %arg1: memref<32x896xbf16, #tpu.memory_space<vmem>>, %arg2: memref<896x1024xbf16, #tpu.memory_space<vmem>>, %arg3: memref<1x1024xf32, #tpu.memory_space<vmem>>, %arg4: memref<1024x512xbf16, #tpu.memory_space<vmem>>, %arg5: memref<1x512xf32, #tpu.memory_space<vmem>>, %arg6: memref<512x256xbf16, #tpu.memory_space<vmem>>, %arg7: memref<1x256xf32, #tpu.memory_space<vmem>>, %arg8: memref<1x256xbf16, #tpu.memory_space<vmem>>, %arg9: memref<1x1xf32, #tpu.memory_space<vmem>>, %arg10: memref<32x128xf32, #tpu.memory_space<vmem>>) attributes {dimension_semantics = [#tpu.dimension_semantics<parallel>], iteration_bounds = array<i64: 2>, scalar_prefetch = 0 : i64, scratch_operands = 0 : i64, tpu.core_type = #tpu.core_type<tc>, window_params = [{transform_indices = @transform_0, window_bounds = array<i64: 32, 896>}, {pipeline_mode = #tpu.pipeline_mode<synchronous>, transform_indices = @transform_1, window_bounds = array<i64: 896, 1024>}, {pipeline_mode = #tpu.pipeline_mode<synchronous>, transform_indices = @transform_2, window_bounds = array<i64: 1, 1024>}, {pipeline_mode = #tpu.pipeline_mode<synchronous>, transform_indices = @transform_3, window_bounds = array<i64: 1024, 512>}, {pipeline_mode = #tpu.pipeline_mode<synchronous>, transform_indices = @transform_4, window_bounds = array<i64: 1, 512>}, {pipeline_mode = #tpu.pipeline_mode<synchronous>, transform_indices = @transform_5, window_bounds = array<i64: 512, 256>}, {pipeline_mode = #tpu.pipeline_mode<synchronous>, transform_indices = @transform_6, window_bounds = array<i64: 1, 256>}, {pipeline_mode = #tpu.pipeline_mode<synchronous>, transform_indices = @transform_7, window_bounds = array<i64: 1, 256>}, {pipeline_mode = #tpu.pipeline_mode<synchronous>, transform_indices = @transform_8, window_bounds = array<i64: 1, 1>}, {transform_indices = @transform_9, window_bounds = array<i64: 32, 128>}]} {
    %c0 = arith.constant 0 : index
    %c0_0 = arith.constant 0 : index
    %0 = vector.load %arg1[%c0, %c0_0] : memref<32x896xbf16, #tpu.memory_space<vmem>>, vector<32x896xbf16>
    %c0_1 = arith.constant 0 : index
    %c0_2 = arith.constant 0 : index
    %1 = vector.load %arg2[%c0_1, %c0_2] : memref<896x1024xbf16, #tpu.memory_space<vmem>>, vector<896x1024xbf16>
    %cst = arith.constant dense<0.000000e+00> : vector<32x1024xf32>
    %2 = tpu.matmul %0, %1, %cst {dimension_numbers = #tpu.dot_dimension_numbers<[1], [0], [0], [1], [0, 0, 1, 1], [], []>} : vector<32x896xbf16>, vector<896x1024xbf16>, vector<32x1024xf32> -> vector<32x1024xf32>
    %c0_3 = arith.constant 0 : index
    %c0_4 = arith.constant 0 : index
    %3 = vector.load %arg3[%c0_3, %c0_4] : memref<1x1024xf32, #tpu.memory_space<vmem>>, vector<1x1024xf32>
    %4 = vector.broadcast %3 : vector<1x1024xf32> to vector<32x1024xf32>
    %5 = arith.addf %2, %4 : vector<32x1024xf32>
    %cst_5 = arith.constant 0.000000e+00 : f32
    %6 = vector.broadcast %cst_5 : f32 to vector<32x1024xf32>
    %7 = arith.cmpf ogt, %5, %6 : vector<32x1024xf32>
    %cst_6 = arith.constant 2.000000e-01 : f32
    %8 = vector.broadcast %cst_6 : f32 to vector<32x1024xf32>
    %9 = arith.mulf %8, %5 : vector<32x1024xf32>
    %10 = arith.select %7, %5, %9 : vector<32x1024xi1>, vector<32x1024xf32>
    %11 = arith.truncf %10 : vector<32x1024xf32> to vector<32x1024xbf16>
    %c0_7 = arith.constant 0 : index
    %c0_8 = arith.constant 0 : index
    %12 = vector.load %arg4[%c0_7, %c0_8] : memref<1024x512xbf16, #tpu.memory_space<vmem>>, vector<1024x512xbf16>
    %cst_9 = arith.constant dense<0.000000e+00> : vector<32x512xf32>
    %13 = tpu.matmul %11, %12, %cst_9 {dimension_numbers = #tpu.dot_dimension_numbers<[1], [0], [0], [1], [0, 0, 1, 1], [], []>} : vector<32x1024xbf16>, vector<1024x512xbf16>, vector<32x512xf32> -> vector<32x512xf32>
    %c0_10 = arith.constant 0 : index
    %c0_11 = arith.constant 0 : index
    %14 = vector.load %arg5[%c0_10, %c0_11] : memref<1x512xf32, #tpu.memory_space<vmem>>, vector<1x512xf32>
    %15 = vector.broadcast %14 : vector<1x512xf32> to vector<32x512xf32>
    %16 = arith.addf %13, %15 : vector<32x512xf32>
    %cst_12 = arith.constant 0.000000e+00 : f32
    %17 = vector.broadcast %cst_12 : f32 to vector<32x512xf32>
    %18 = arith.cmpf ogt, %16, %17 : vector<32x512xf32>
    %cst_13 = arith.constant 2.000000e-01 : f32
    %19 = vector.broadcast %cst_13 : f32 to vector<32x512xf32>
    %20 = arith.mulf %19, %16 : vector<32x512xf32>
    %21 = arith.select %18, %16, %20 : vector<32x512xi1>, vector<32x512xf32>
    %22 = arith.truncf %21 : vector<32x512xf32> to vector<32x512xbf16>
    %c0_14 = arith.constant 0 : index
    %c0_15 = arith.constant 0 : index
    %23 = vector.load %arg6[%c0_14, %c0_15] : memref<512x256xbf16, #tpu.memory_space<vmem>>, vector<512x256xbf16>
    %cst_16 = arith.constant dense<0.000000e+00> : vector<32x256xf32>
    %24 = tpu.matmul %22, %23, %cst_16 {dimension_numbers = #tpu.dot_dimension_numbers<[1], [0], [0], [1], [0, 0, 1, 1], [], []>} : vector<32x512xbf16>, vector<512x256xbf16>, vector<32x256xf32> -> vector<32x256xf32>
    %c0_17 = arith.constant 0 : index
    %c0_18 = arith.constant 0 : index
    %25 = vector.load %arg7[%c0_17, %c0_18] : memref<1x256xf32, #tpu.memory_space<vmem>>, vector<1x256xf32>
    %26 = vector.broadcast %25 : vector<1x256xf32> to vector<32x256xf32>
    %27 = arith.addf %24, %26 : vector<32x256xf32>
    %cst_19 = arith.constant 0.000000e+00 : f32
    %28 = vector.broadcast %cst_19 : f32 to vector<32x256xf32>
    %29 = arith.cmpf ogt, %27, %28 : vector<32x256xf32>
    %cst_20 = arith.constant 2.000000e-01 : f32
    %30 = vector.broadcast %cst_20 : f32 to vector<32x256xf32>
    %31 = arith.mulf %30, %27 : vector<32x256xf32>
    %32 = arith.select %29, %27, %31 : vector<32x256xi1>, vector<32x256xf32>
    %c0_21 = arith.constant 0 : index
    %c0_22 = arith.constant 0 : index
    %33 = vector.load %arg8[%c0_21, %c0_22] : memref<1x256xbf16, #tpu.memory_space<vmem>>, vector<1x256xbf16>
    %34 = arith.extf %33 : vector<1x256xbf16> to vector<1x256xf32>
    %35 = vector.broadcast %34 : vector<1x256xf32> to vector<32x256xf32>
    %36 = arith.mulf %32, %35 : vector<32x256xf32>
    %cst_23 = arith.constant dense<0.000000e+00> : vector<32xf32>
    %37 = vector.multi_reduction <add>, %36, %cst_23 [1] : vector<32x256xf32> to vector<32xf32>
    %38 = vector.shape_cast %37 : vector<32xf32> to vector<32x1xf32>
    %c0_24 = arith.constant 0 : index
    %c0_25 = arith.constant 0 : index
    %39 = vector.load %arg9[%c0_24, %c0_25] : memref<1x1xf32, #tpu.memory_space<vmem>>, vector<1x1xf32>
    %40 = vector.broadcast %39 : vector<1x1xf32> to vector<32x1xf32>
    %41 = arith.addf %38, %40 : vector<32x1xf32>
    %42 = vector.shape_cast %41 : vector<32x1xf32> to vector<32x1xf32>
    %43 = vector.broadcast %42 : vector<32x1xf32> to vector<32x128xf32>
    %c0_26 = arith.constant 0 : index
    %c0_27 = arith.constant 0 : index
    %44 = vector.load %arg10[%c0_26, %c0_27] : memref<32x128xf32, #tpu.memory_space<vmem>>, vector<32x128xf32>
    tpu.vector_store %arg10[%c0_26, %c0_27], %43 {strides = array<i32>} : memref<32x128xf32, #tpu.memory_space<vmem>>, vector<32x128xf32>,
    return
  }
  func.func @transform_0(%arg0: i32) -> (i32, i32) {
    %c0_i32 = arith.constant 0 : i32
    %c0_i32_0 = arith.constant 0 : i32
    return %arg0, %c0_i32 : i32, i32
  }
  func.func @transform_1(%arg0: i32) -> (i32, i32) {
    %c0_i32 = arith.constant 0 : i32
    %c0_i32_0 = arith.constant 0 : i32
    %c0_i32_1 = arith.constant 0 : i32
    return %c0_i32, %c0_i32_0 : i32, i32
  }
  func.func @transform_2(%arg0: i32) -> (i32, i32) {
    %c0_i32 = arith.constant 0 : i32
    %c0_i32_0 = arith.constant 0 : i32
    %c0_i32_1 = arith.constant 0 : i32
    return %c0_i32, %c0_i32_0 : i32, i32
  }
  func.func @transform_3(%arg0: i32) -> (i32, i32) {
    %c0_i32 = arith.constant 0 : i32
    %c0_i32_0 = arith.constant 0 : i32
    %c0_i32_1 = arith.constant 0 : i32
    return %c0_i32, %c0_i32_0 : i32, i32
  }
  func.func @transform_4(%arg0: i32) -> (i32, i32) {
    %c0_i32 = arith.constant 0 : i32
    %c0_i32_0 = arith.constant 0 : i32
    %c0_i32_1 = arith.constant 0 : i32
    return %c0_i32, %c0_i32_0 : i32, i32
  }
  func.func @transform_5(%arg0: i32) -> (i32, i32) {
    %c0_i32 = arith.constant 0 : i32
    %c0_i32_0 = arith.constant 0 : i32
    %c0_i32_1 = arith.constant 0 : i32
    return %c0_i32, %c0_i32_0 : i32, i32
  }
  func.func @transform_6(%arg0: i32) -> (i32, i32) {
    %c0_i32 = arith.constant 0 : i32
    %c0_i32_0 = arith.constant 0 : i32
    %c0_i32_1 = arith.constant 0 : i32
    return %c0_i32, %c0_i32_0 : i32, i32
  }
  func.func @transform_7(%arg0: i32) -> (i32, i32) {
    %c0_i32 = arith.constant 0 : i32
    %c0_i32_0 = arith.constant 0 : i32
    %c0_i32_1 = arith.constant 0 : i32
    return %c0_i32, %c0_i32_0 : i32, i32
  }
  func.func @transform_8(%arg0: i32) -> (i32, i32) {
    %c0_i32 = arith.constant 0 : i32
    %c0_i32_0 = arith.constant 0 : i32
    %c0_i32_1 = arith.constant 0 : i32
    return %c0_i32, %c0_i32_0 : i32, i32
  }
  func.func @transform_9(%arg0: i32) -> (i32, i32) {
    %c0_i32 = arith.constant 0 : i32
    %c0_i32_0 = arith.constant 0 : i32
    return %arg0, %c0_i32 : i32, i32
  }
}

</mosaic_0001>

<bundles_post_ra>
// kernel: tpu_custom_call.1
= control target key start
LH: loop header
LB: loop body
LE: loop exit
PB: predicated region body
PF: predicated region fallthrough
CT: control target
= control target key end

     0   :  { %s9697_s0 = inlined_call_operand.hbm [shape: bf16[64,896], index: 0, kind: input, shape index: {}]   ;;  %s9698_s1 = inlined_call_operand.hbm [shape: bf16[896,1024], index: 1, kind: input, shape index: {}]   ;;  %s9699_s2 = inlined_call_operand.hbm [shape: f32[1,1024], index: 2, kind: input, shape index: {}]   ;;  %s9700_s3 = inlined_call_operand.hbm [shape: bf16[1024,512], index: 3, kind: input, shape index: {}]   ;;  %s9701_s4 = inlined_call_operand.hbm [shape: f32[1,512], index: 4, kind: input, shape index: {}]   ;;  %s9702_s5 = inlined_call_operand.hbm [shape: bf16[512,256], index: 5, kind: input, shape index: {}]   ;;  %s9703_s6 = inlined_call_operand.hbm [shape: f32[1,256], index: 6, kind: input, shape index: {}]   ;;  %s9704_s7 = inlined_call_operand.hbm [shape: bf16[1,256], index: 7, kind: input, shape index: {}]   ;;  %s9705_s8 = inlined_call_operand.<no memory space> [shape: f32[1,1], index: 8, kind: input, shape index: {}]   ;;  %s9706_s9 = inlined_call_operand.hbm [shape: f32[64,128], index: 9, kind: output, shape index: {}]  }
   0x1   :  { %9710 = sst [smem:[#allocation24_spill]] %s9698_s1  ;;  %v14_v0 = vstv %s9705_s8 }
   0x2   :  { %9711 = sst [smem:[#allocation25_spill]] %s9700_s3  ;;  %15 = vst [vmem:[#allocation2] sm:$0x1] %v14_v0 }
   0x3   :  { %16 = vsyncpa [#allocation4], 0 }
   0x4   :  { %18 = vsyncpa [#allocation4 + $0x1], 0 }
   0x5   :  { %19 = vsyncpa [#allocation7], 0 }
   0x6   :  { %20 = vsyncpa [#allocation10], 0 }
   0x7   :  { %21 = vsyncpa [#allocation13], 0 }
   0x8   :  { %22 = vsyncpa [#allocation16], 0 }
   0x9   :  { %23 = vsyncpa [#allocation5], 0 }
   0xa   :  { %25 = vsyncpa [#allocation5 + $0x1], 0  ;;  %s9084_s11 = smov 0   ;;  %s9086_s12 = smov 0  }
   0xb   :  { %s9088_s13 = smov 0   ;;  %s9090_s14 = smov 0  }
   0xc LB: > { %s9011_s8 = smov [#allocation6]   ;;  %s9105_s16 = sadd.s32 4294967295, %s9009_s14   ;;  %s9009_s14 = sphi %s9090_s14, %s9737_s14   ;;  %s9005_s13 = sphi %s9088_s13, %s9736_s13   ;;  %s9001_s12 = sphi %s9086_s12, %s9735_s12   ;;  %s8997_s11 = sphi %s9084_s11, %s9734_s11  }
   0xd   : > { %s268_s15 = sshll.u32 %s9011_s8, 4  ;;  %p7024_p0 = scmp.ge.s32.totalorder %s9009_s14, 1  ;;  %s9110_s15 = int_to_ptr.vmem [resolvable:$true] %s268_s15 }
   0xe   : > { %p9707_p1 = scmp.eq.s32.totalorder %s9105_s16, 0  ;;  %p256_p2 = scmp.lt.s32.totalorder %s9009_s14, 3 }
   0xf   : > { %s9012_s18 = smov [#allocation9]   ;;  %s9013_s21 = smov [#allocation12]  }
  0x10   : > { %p9112_p3 = pnand %p7024_p0, %p256_p2  ;;  %s292_s19 = sshll.u32 %s9012_s18, 4  ;;  %s9125_s19 = int_to_ptr.vmem [resolvable:$true] %s292_s19 }
  0x11   : > { %s9127_s22 = sshll.u32 %s9013_s21, 4  ;;  %s9714_s1 = sld [smem:[#allocation24_spill]]  ;;  %s317_s22 = int_to_ptr.vmem [resolvable:$true] %s9127_s22 }
  0x12   : > { %s9712_s17 = scalar_select %p9112_p3, 1, 0 }
  0x13   : > { %p8077_p5 = pneg %p9112_p3 }
  0x15   : > { %p9121_p6 = pnand %p8077_p5, %p9707_p1 }
  0x17   : > { %s8701_s25 = scalar_lea.hbm %s9714_s1, 57344  ;;  %p9137_p8 = pneg %p9121_p6 }
  0x18   : > { %p8702_p7 = scmp.ne.s32.totalorder %s9714_s1, %s8701_s25  ;;  %p8708_p11 = scmp.lt.u32.totalorder %s8701_s25, %s9714_s1 }
  0x1a   : > { %p8704_p9 = pnand %p9137_p8, %p8702_p7 }
  0x1c   : > { %p8705_p10 = pneg %p8704_p9 }
  0x1e   : > { %p8710_p12 = pnand %p8708_p11, %p8705_p10 }
  0x20   : > { %8713 = shalt.err (!%p8710_p12)
}
  0x21   : > { %s8714_s10 = scalar_lea.vmem %s9110_s15, 57344  ;;  %p8722_p5 = scmp.lt.s32.totalorder %s9110_s15, %s9110_s15 }
  0x22   : > { %p8715_p13 = scmp.ne.s32.totalorder %s9110_s15, %s8714_s10  ;;  %p8723_p4 = scmp.lt.s32.totalorder %s8714_s10, %s8714_s10 }
  0x24   : > { %p8717_p0 = pnand %p8715_p13, %p9137_p8  ;;  %p8724_p7 = por %p8723_p4, %p8722_p5 }
  0x26   : > { %p8718_p2 = pneg %p8717_p0 }
  0x28   : > { %p8725_p9 = pnand %p8724_p7, %p8718_p2 }
  0x2a   : > { %8728 = shalt.err (!%p8725_p9)
}
  0x2b   : > { %s9014_s8 = smov 512   ;;  %s9015_s18 = smov 32  }
  0x2c   : > { %8080 = dma.hbm_to_vmem [thread:$0]  (!%p9121_p6), %s9714_s1, 57344, %s9110_s15, [#allocation7], %s9014_s8, %s9014_s8, %s9015_s18  }
  0x2d   : > { %s9716_s3 = sld [smem:[#allocation25_spill]] }
  0x33   : > { %s8729_s26 = scalar_lea.hbm %s9716_s3, 32768 }
  0x34   : > { %p8730_p4 = scmp.ne.s32.totalorder %s9716_s3, %s8729_s26  ;;  %p8736_p12 = scmp.lt.u32.totalorder %s8729_s26, %s9716_s3 }
  0x36   : > { %p8732_p10 = pnand %p8730_p4, %p9137_p8 }
  0x38   : > { %p8733_p11 = pneg %p8732_p10 }
  0x3a   : > { %p8738_p13 = pnand %p8736_p12, %p8733_p11 }
  0x3c   : > { %8741 = shalt.err (!%p8738_p13)
}
  0x3d   : > { %s8742_s15 = scalar_lea.vmem %s9125_s19, 32768  ;;  %p8750_p7 = scmp.lt.s32.totalorder %s9125_s19, %s9125_s19 }
  0x3e   : > { %p8743_p0 = scmp.ne.s32.totalorder %s9125_s19, %s8742_s15  ;;  %p8751_p9 = scmp.lt.s32.totalorder %s8742_s15, %s8742_s15 }
  0x40   : > { %p8745_p2 = pnand %p8743_p0, %p9137_p8  ;;  %p8752_p4 = por %p8751_p9, %p8750_p7 }
  0x42   : > { %p8746_p5 = pneg %p8745_p2 }
  0x44   : > { %p8753_p10 = pnand %p8752_p4, %p8746_p5 }
  0x46   : > { %8756 = shalt.err (!%p8753_p10)
}
  0x47   : > { %s9016_s8 = smov 256   ;;  %s9017_s18 = smov 16  }
  0x48   : > { %8086 = dma.hbm_to_vmem [thread:$0]  (!%p9121_p6), %s9716_s3, 32768, %s9125_s19, [#allocation10], %s9016_s8, %s9016_s8, %s9017_s18  }
  0x49   : > { %s8757_s26 = scalar_lea.hbm %s9702_s5, 8192 }
  0x4a   : > { %p8758_p11 = scmp.ne.s32.totalorder %s9702_s5, %s8757_s26  ;;  %p8764_p0 = scmp.lt.u32.totalorder %s8757_s26, %s9702_s5 }
  0x4c   : > { %p8760_p12 = pnand %p8758_p11, %p9137_p8 }
  0x4e   : > { %p8761_p13 = pneg %p8760_p12 }
  0x50   : > { %p8766_p2 = pnand %p8764_p0, %p8761_p13 }
  0x52   : > { %8769 = shalt.err (!%p8766_p2)
}
  0x53   : > { %s8770_s15 = scalar_lea.vmem %s317_s22, 8192  ;;  %p8778_p4 = scmp.lt.s32.totalorder %s317_s22, %s317_s22 }
  0x54   : > { %p8771_p5 = scmp.ne.s32.totalorder %s317_s22, %s8770_s15  ;;  %p8779_p10 = scmp.lt.s32.totalorder %s8770_s15, %s8770_s15 }
  0x56   : > { %p8773_p7 = pnand %p8771_p5, %p9137_p8  ;;  %p8780_p1 = por %p8779_p10, %p8778_p4 }
  0x58   : > { %p8774_p9 = pneg %p8773_p7 }
  0x5a   : > { %p8781_p3 = pnand %p8780_p1, %p8774_p9 }
  0x5c   : > { %8784 = shalt.err (!%p8781_p3)
}
  0x5d   : > { %s9018_s19 = smov 128   ;;  %s9019_s8 = smov 8  }
  0x5e   : > { %8092 = dma.hbm_to_vmem [thread:$0]  (!%p9121_p6), %s9702_s5, 8192, %s317_s22, [#allocation13], %s9018_s19, %s9018_s19, %s9019_s8  }
  0x5f   : > { %s9020_s23 = smov [#allocation8]   ;;  %s9021_s25 = smov [#allocation11]  }
  0x60   : > { %s282_s24 = sshll.u32 %s9020_s23, 4  ;;  %s306_s26 = sshll.u32 %s9021_s25, 4  ;;  %s283_s24 = int_to_ptr.vmem [resolvable:$true] %s282_s24  ;;  %s307_s26 = int_to_ptr.vmem [resolvable:$true] %s306_s26 }
  0x61   : > { %s8785_s30 = scalar_lea.hbm %s9699_s2, 128 }
  0x62   : > { %p8786_p1 = scmp.ne.s32.totalorder %s9699_s2, %s8785_s30  ;;  %p8792_p12 = scmp.lt.u32.totalorder %s8785_s30, %s9699_s2 }
  0x64   : > { %p8788_p3 = pnand %p8786_p1, %p9137_p8 }
  0x66   : > { %p8789_p11 = pneg %p8788_p3 }
  0x68   : > { %p8794_p13 = pnand %p8792_p12, %p8789_p11 }
  0x6a   : > { %8797 = shalt.err (!%p8794_p13)
}
  0x6b   : > { %s8798_s22 = scalar_lea.vmem %s283_s24, 128  ;;  %p8806_p7 = scmp.lt.s32.totalorder %s283_s24, %s283_s24 }
  0x6c   : > { %p8799_p0 = scmp.ne.s32.totalorder %s283_s24, %s8798_s22  ;;  %p8807_p9 = scmp.lt.s32.totalorder %s8798_s22, %s8798_s22 }
  0x6e   : > { %p8801_p2 = pnand %p8799_p0, %p9137_p8  ;;  %p8808_p4 = por %p8807_p9, %p8806_p7 }
  0x70   : > { %p8802_p5 = pneg %p8801_p2 }
  0x72   : > { %p8809_p10 = pnand %p8808_p4, %p8802_p5 }
  0x74   : > { %8812 = shalt.err (!%p8809_p10)
}
  0x75   : > { %8083 = dma.hbm_to_vmem [thread:$0]  (!%p9121_p6), %s9699_s2, 128, %s283_s24, [#allocation7]  }
  0x76   : > { %s8813_s18 = scalar_lea.hbm %s9701_s4, 64 }
  0x77   : > { %p8814_p1 = scmp.ne.s32.totalorder %s9701_s4, %s8813_s18  ;;  %p8820_p12 = scmp.lt.u32.totalorder %s8813_s18, %s9701_s4 }
  0x79   : > { %p8816_p3 = pnand %p8814_p1, %p9137_p8 }
  0x7b   : > { %p8817_p11 = pneg %p8816_p3 }
  0x7d   : > { %p8822_p13 = pnand %p8820_p12, %p8817_p11 }
  0x7f   : > { %8825 = shalt.err (!%p8822_p13)
}
  0x80   : > { %s8826_s29 = scalar_lea.vmem %s307_s26, 64  ;;  %p8834_p7 = scmp.lt.s32.totalorder %s307_s26, %s307_s26 }
  0x81   : > { %p8827_p0 = scmp.ne.s32.totalorder %s307_s26, %s8826_s29  ;;  %p8835_p9 = scmp.lt.s32.totalorder %s8826_s29, %s8826_s29 }
  0x83   : > { %p8829_p2 = pnand %p8827_p0, %p9137_p8  ;;  %p8836_p4 = por %p8835_p9, %p8834_p7 }
  0x85   : > { %p8830_p5 = pneg %p8829_p2 }
  0x87   : > { %p8837_p10 = pnand %p8836_p4, %p8830_p5 }
  0x89   : > { %8840 = shalt.err (!%p8837_p10)
}
  0x8a   : > { %8089 = dma.hbm_to_vmem [thread:$0]  (!%p9121_p6), %s9701_s4, 64, %s307_s26, [#allocation10]  }
  0x8b   : > { %s9022_s10 = smov [#allocation14]   ;;  %s9023_s22 = smov [#allocation15]  }
  0x8c   : > { %s330_s15 = sshll.u32 %s9022_s10, 4  ;;  %s341_s19 = sshll.u32 %s9023_s22, 4  ;;  %s331_s15 = int_to_ptr.vmem [resolvable:$true] %s330_s15  ;;  %s342_s19 = int_to_ptr.vmem [resolvable:$true] %s341_s19 }
  0x8d   : > { %s8841_s3 = scalar_lea.hbm %s9703_s6, 32 }
  0x8e   : > { %p8842_p1 = scmp.ne.s32.totalorder %s9703_s6, %s8841_s3  ;;  %p8848_p12 = scmp.lt.u32.totalorder %s8841_s3, %s9703_s6 }
  0x90   : > { %p8844_p3 = pnand %p8842_p1, %p9137_p8 }
  0x92   : > { %p8845_p11 = pneg %p8844_p3 }
  0x94   : > { %p8850_p13 = pnand %p8848_p12, %p8845_p11 }
  0x96   : > { %8853 = shalt.err (!%p8850_p13)
}
  0x97   : > { %s8854_s26 = scalar_lea.vmem %s331_s15, 32  ;;  %p8862_p7 = scmp.lt.s32.totalorder %s331_s15, %s331_s15 }
  0x98   : > { %p8855_p0 = scmp.ne.s32.totalorder %s331_s15, %s8854_s26  ;;  %p8863_p9 = scmp.lt.s32.totalorder %s8854_s26, %s8854_s26 }
  0x9a   : > { %p8857_p2 = pnand %p8855_p0, %p9137_p8  ;;  %p8864_p4 = por %p8863_p9, %p8862_p7 }
  0x9c   : > { %p8858_p5 = pneg %p8857_p2 }
  0x9e   : > { %p8865_p10 = pnand %p8864_p4, %p8858_p5 }
  0xa0   : > { %8868 = shalt.err (!%p8865_p10)
}
  0xa1   : > { %8095 = dma.hbm_to_vmem [thread:$0]  (!%p9121_p6), %s9703_s6, 32, %s331_s15, [#allocation13]  }
  0xa2   : > { %s8869_s10 = scalar_lea.hbm %s9704_s7, 32 }
  0xa3   : > { %p8870_p1 = scmp.ne.s32.totalorder %s9704_s7, %s8869_s10  ;;  %p8876_p12 = scmp.lt.u32.totalorder %s8869_s10, %s9704_s7 }
  0xa5   : > { %p8872_p3 = pnand %p8870_p1, %p9137_p8 }
  0xa7   : > { %p8873_p11 = pneg %p8872_p3 }
  0xa9   : > { %p8878_p13 = pnand %p8876_p12, %p8873_p11 }
  0xab   : > { %8881 = shalt.err (!%p8878_p13)
}
  0xac   : > { %s8882_s18 = scalar_lea.vmem %s342_s19, 32  ;;  %p8890_p7 = scmp.lt.s32.totalorder %s342_s19, %s342_s19 }
  0xad   : > { %p8883_p0 = scmp.ne.s32.totalorder %s342_s19, %s8882_s18  ;;  %p8891_p9 = scmp.lt.s32.totalorder %s8882_s18, %s8882_s18 }
  0xaf   : > { %p8885_p2 = pnand %p8883_p0, %p9137_p8  ;;  %p8892_p4 = por %p8891_p9, %p8890_p7 }
  0xb1   : > { %p8886_p5 = pneg %p8885_p2 }
  0xb3   : > { %p8893_p10 = pnand %p8892_p4, %p8886_p5 }
  0xb5   : > { %8896 = shalt.err (!%p8893_p10)
}
  0xb6   : > { %8098 = dma.hbm_to_vmem [thread:$0]  (!%p9121_p6), %s9704_s7, 32, %s342_s19, [#allocation16]  }
  0xb7   : > { %s7023_s28 = sadd.s32 4294967294, %s9009_s14   ;;  %s9274_s20 = sadd.s32 1, %s9009_s14  }
  0xb8   : > { %s38_s23 = sadd.s32 1, %s9005_s13  ;;  %s35_s25 = ssub.s32 %s9009_s14, %s9274_s20 }
  0xb9   : > { %p45_p8 = scmp.ne.s32.totalorder %s9005_s13, %s9001_s12  ;;  %p36_p1 = scmp.eq.s32.totalorder %s35_s25, 0 }
  0xba   : > { %p46_p3 = scmp.eq.s32.totalorder %s9009_s14, 0  ;;  %p51_p11 = scmp.ne.s32.totalorder %s9001_s12, %s8997_s11 }
  0xbb   : > { %p243_p12 = scmp.eq.s32.totalorder %s9105_s16, 1  ;;  %p9717_p0 = scmp.eq.s32.totalorder %s9105_s16, 0 }
  0xbc   : > { %s9286_s26 = scalar_select %p36_p1, %s9005_s13, %s38_s23  }
  0xbd   : > { %p47_p13 = por %p46_p3, %p45_p8  ;;  %p9290_p2 = por %p9717_p0, %p51_p11 }
  0xbe   : > { %p9294_p6 = por %p243_p12, %p45_p8  ;;  %p249_p5 = scmp.eq.s32.totalorder %s7023_s28, 1 }
  0xbf   : > { %p8114_p7 = scmp.lt.s32.totalorder %s9009_s14, 2  ;;  %s355_s29 = sand.u32 1, %s9005_s13  }
  0xc0   : > { %s9719_s19 = scalar_select %p9294_p6, 1, 0 }
  0xc1   : > { %p9300_p9 = por %p249_p5, %p51_p11  ;;  %s8042_s30 = smul.u32 112, %s355_s29 }
  0xc2   : > { %p9304_p4 = pnand %p8114_p7, %p47_p13  ;;  %s8043_s22 = smul.u32 1792, %s9009_s14 }
  0xc3   : > { %s9720_s24 = scalar_select %p9300_p9, 1, 0 }
  0xc4   : > { %s9312_s3 = scalar_lea.hbm %s9697_s0, %s8043_s22  ;;  %s359_s18 = scalar_lea.vmem [#allocation3], %s8042_s30 }
  0xc5   : > { %s367_s15 = sshll.u32 %s359_s18, 4  ;;  %s9316_s21 = scalar_lea.sflag [#allocation4], %s355_s29  ;;  %s9314_s15 = int_to_ptr.vmem [resolvable:$true] %s367_s15 }
  0xc6   : > { %s8897_s28 = scalar_lea.hbm %s9312_s3, 1792  ;;  %p8899_p8 = pneg %p9304_p4 }
  0xc7   : > { %p8898_p10 = scmp.ne.s32.totalorder %s9312_s3, %s8897_s28  ;;  %s8902_s22 = scalar_lea.hbm %s9697_s0, 3584 }
  0xc8   : > { %p8903_p11 = scmp.lt.u32.totalorder %s9312_s3, %s9697_s0  ;;  %p8904_p12 = scmp.lt.u32.totalorder %s8902_s22, %s8897_s28 }
  0xc9   : > { %p8900_p1 = pnand %p8899_p8, %p8898_p10  ;;  %p8906_p0 = scmp.lt.u32.totalorder %s8897_s28, %s9312_s3 }
  0xca   : > { %p8905_p13 = por %p8904_p12, %p8903_p11 }
  0xcb   : > { %p8901_p3 = pneg %p8900_p1 }
  0xcc   : > { %p8907_p5 = por %p8906_p0, %p8905_p13 }
  0xce   : > { %p8908_p7 = pnand %p8907_p5, %p8901_p3 }
  0xd0   : > { %8911 = shalt.err (!%p8908_p7)
}
  0xd1   : > { %s8912_s29 = scalar_lea.vmem %s9314_s15, 1792  ;;  %s9024_s30 = smov [#allocation3]  }
  0xd2   : > { %p8913_p10 = scmp.ne.s32.totalorder %s9314_s15, %s8912_s29  ;;  %s8917_s18 = sshll.u32 %s9024_s30, 4  ;;  %s8918_s18 = int_to_ptr.vmem [resolvable:$false] %s8917_s18 }
  0xd3   : > { %s8919_s23 = scalar_lea.vmem %s8918_s18, 3584  ;;  %p8920_p6 = scmp.lt.s32.totalorder %s9314_s15, %s8918_s18 }
  0xd4   : > { %p8915_p1 = pnand %p8913_p10, %p8899_p8  ;;  %p8921_p11 = scmp.lt.s32.totalorder %s8919_s23, %s8912_s29 }
  0xd6   : > { %p8916_p9 = pneg %p8915_p1  ;;  %p8922_p12 = por %p8921_p11, %p8920_p6 }
  0xd8   : > { %p8923_p13 = pnand %p8922_p12, %p8916_p9 }
  0xda   : > { %8926 = shalt.err (!%p8923_p13)
}
  0xdb   : > { %s9025_s28 = smov 448   ;;  %s9026_s25 = smov 28  }
  0xdc   : > { %8102 = dma.hbm_to_vmem [thread:$0]  (!%p9304_p4), %s9312_s3, 1792, %s9314_s15, %s9316_s21, %s9025_s28, %s9025_s28, %s9026_s25  }
  0xdd   : > { %p9722_p8 = scmp.ne.s32.totalorder %s9712_s17, 0 }
  0xde   : > { %s9347_s22 = sand.u32 (!%p9722_p8), 1, %s9001_s12  }
  0xdf   : > { %379 = sbr.rel (%p9722_p8) target bundleno = 1792 (0x700), region = 56  ;;  %s382_s1 = scalar_lea.sflag (!%p9722_p8), [#allocation4], %s9347_s22 }
  0xe0   : > { %s8044_s8 = smul.u32 (!%p9722_p8), 112, %s9347_s22 }
  0xe2   : > { %s9351_s29 = scalar_lea.vmem (!%p9722_p8), [#allocation3], %s8044_s8 }
  0xe6   : > { %8972 = dma.done.wait (%p9290_p2), %s382_s1, 1792  }
  0xe7   : > { %8974 = vsyncadd (%p9290_p2), %s382_s1, 4294965504  ;;  %p9723_p6 = scmp.eq.s32.totalorder %s9105_s16, 0 }
  0xe9   : > { %8976 = dma.done.wait (%p9723_p6), [#allocation7], 57472   ;;  %p9724_p9 = pmov %p9723_p6 }
  0xea   : > { %p9725_p4 = pmov %p9723_p6 }
  0xeb   : > { %8978 = vsyncadd (%p9724_p9), [#allocation7], 4294909824 }
  0xec   : > { %8980 = dma.done.wait (%p9725_p4), [#allocation10], 32832   ;;  %p9726_p3 = pmov %p9725_p4 }
  0xee   : > { %8982 = vsyncadd (%p9726_p3), [#allocation10], 4294934464  ;;  %p9727_p0 = pmov %p9726_p3 }
  0xf0   : > { %8984 = dma.done.wait (%p9727_p0), [#allocation13], 8224   ;;  %p9728_p5 = pmov %p9727_p0 }
  0xf1   : > { %p9729_p2 = pmov %p9727_p0 }
  0xf2   : > { %8986 = vsyncadd (%p9728_p5), [#allocation13], 4294959072 }
  0xf3   : > { %8988 = dma.done.wait (%p9729_p2), [#allocation16], 32   ;;  %p9730_p7 = pmov %p9727_p0 }
  0xf4   : > { %v467_v1 = vld [vmem:[#allocation6] sm:$0xff]  ;;  %v8178_v60 = vld [vmem:[%s9351_s29 + $0xc] ss:$28 sps:$4 sm:$0xff]   ;;  %s7044_s17 = sshll.u32 %s9347_s22, 5  ;;  %s7833_s3 = sshll.u32 %s9105_s16, 9 }
  0xf5   : > { %8990 = vsyncadd (%p9730_p7), [#allocation16], 4294967264  ;;  %v471_v2 = vld [vmem:[#allocation6 + $0x20] sm:$0xff]  ;;  %3354 = vmatprep.mubr.bf16.mxu0 %v8178_v60  ;;  %s447_s27 = scalar_lea.vmem [#allocation17], %s7044_s17  ;;  %s9653_s30 = scalar_lea.hbm %s9706_s9, %s7833_s3 }
  0xf6   : > { %v595_v3 = vld [vmem:[#allocation6 + $0x400] sm:$0xff]  ;;  %v7060_v4 = vcombine.high %v467_v1, %v471_v2  ;;  %v7059_v6 = vcombine.low %v467_v1, %v471_v2  ;;  %s6883_s10 = sshll.u32 %s447_s27, 4  ;;  %s6870_s18 = scalar_lea.sflag [#allocation5], %s9347_s22  ;;  %s9648_s10 = int_to_ptr.vmem [resolvable:$true] %s6883_s10 }
  0xf7   : > { %v599_v5 = vld [vmem:[#allocation6 + $0x420] sm:$0xff]  ;;  %s8927_s23 = scalar_lea.vmem %s9648_s10, 512  ;;  %p9731_p1 = scmp.ne.s32.totalorder %s9719_s19, 0 }
  0xf8   : > { %v475_v7 = vld [vmem:[#allocation6 + $0x40] sm:$0xff]  ;;  %v7188_v9 = vcombine.high %v595_v3, %v599_v5  ;;  %v7187_v10 = vcombine.low %v595_v3, %v599_v5  ;;  %3269 = vmatprep.subr.bf16.mxu1 %v7060_v4  ;;  %p8928_p10 = scmp.ne.s32.totalorder %s9648_s10, %s8927_s23  ;;  %s9028_s16 = smov [#allocation17]  }
  0xf9   : > { %v479_v8 = vld [vmem:[#allocation6 + $0x60] sm:$0xff]  ;;  %3270 = vmatpush1.bf16.msra.mxu1 %v7059_v6  ;;  %s8931_s28 = sshll.u32 %s9028_s16, 4  ;;  %s8932_s28 = int_to_ptr.vmem [resolvable:$false] %s8931_s28 }
  0xfa   : > { %v7068_v11 = vcombine.high %v475_v7, %v479_v8  ;;  %v603_v12 = vld [vmem:[#allocation6 + $0x440] sm:$0xff]  ;;  %3322 = vmatprep.subr.bf16.mxu0 %v7188_v9  ;;  %v7067_v19 = vcombine.low %v475_v7, %v479_v8  ;;  %p8929_p11 = pnand %p8928_p10, %p9731_p1  ;;  %s8933_s25 = scalar_lea.vmem %s8932_s28, 1024 }
  0xfb   : > { %v607_v13 = vld [vmem:[#allocation6 + $0x460] sm:$0xff]  ;;  %3323 = vmatpush1.bf16.msra.mxu0 %v7187_v10  ;;  %p8934_p13 = scmp.lt.s32.totalorder %s9648_s10, %s8932_s28  ;;  %p8935_p8 = scmp.lt.s32.totalorder %s8933_s25, %s8927_s23 }
  0xfc   : > { %v483_v14 = vld [vmem:[#allocation6 + $0x80] sm:$0xff]  ;;  %v7196_v15 = vcombine.high %v603_v12, %v607_v13  ;;  %3271 = vmatprep.subr.bf16.mxu1 %v7068_v11  ;;  %v7195_v20 = vcombine.low %v603_v12, %v607_v13  ;;  %p8930_p12 = pneg %p8929_p11 }
  0xfd   : > { %v487_v16 = vld [vmem:[#allocation6 + $0xa0] sm:$0xff]  ;;  %3272 = vmatpush1.bf16.msra.mxu1 %v7067_v19  ;;  %p8936_p6 = por %p8935_p8, %p8934_p13 }
  0xfe   : > { %v611_v17 = vld [vmem:[#allocation6 + $0x480] sm:$0xff]  ;;  %v7076_v21 = vcombine.high %v483_v14, %v487_v16  ;;  %3324 = vmatprep.subr.bf16.mxu0 %v7196_v15  ;;  %v7075_v27 = vcombine.low %v483_v14, %v487_v16 }
  0xff   : > { %v615_v18 = vld [vmem:[#allocation6 + $0x4a0] sm:$0xff]  ;;  %3325 = vmatpush1.bf16.msra.mxu0 %v7195_v20  ;;  %p8937_p9 = pnand %p8936_p6, %p8930_p12 }
 0x100   : > { %v7204_v22 = vcombine.high %v611_v17, %v615_v18  ;;  %v491_v23 = vld [vmem:[#allocation6 + $0xc0] sm:$0xff]  ;;  %3273 = vmatprep.subr.bf16.mxu1 %v7076_v21  ;;  %v7203_v28 = vcombine.low %v611_v17, %v615_v18  ;;  %v9027_v21 = vmov 0  }
 0x101   : > { %v495_v24 = vld [vmem:[#allocation6 + $0xe0] sm:$0xff]  ;;  %3274 = vmatpush1.bf16.msra.mxu1 %v7075_v27  ;;  %8173 = vset.pattern.permute.xlu0 %v9027_v21 }
 0x102   : > { %v619_v25 = vld [vmem:[#allocation6 + $0x4c0] sm:$0xff]  ;;  %v7084_v29 = vcombine.high %v491_v23, %v495_v24  ;;  %3326 = vmatprep.subr.bf16.mxu0 %v7204_v22  ;;  %v7083_v35 = vcombine.low %v491_v23, %v495_v24  ;;  %8174 = vset.pattern.permute.xlu1 %v9027_v21 }
 0x103   : > { %v623_v26 = vld [vmem:[#allocation6 + $0x4e0] sm:$0xff]  ;;  %3327 = vmatpush1.bf16.msra.mxu0 %v7203_v28 }
 0x104   : > { %v7212_v30 = vcombine.high %v619_v25, %v623_v26  ;;  %v499_v31 = vld [vmem:[#allocation6 + $0x100] sm:$0xff]  ;;  %3275 = vmatprep.subr.bf16.mxu1 %v7084_v29  ;;  %v7211_v36 = vcombine.low %v619_v25, %v623_v26 }
 0x105   : > { %v503_v32 = vld [vmem:[#allocation6 + $0x120] sm:$0xff]  ;;  %3276 = vmatpush1.bf16.msra.mxu1 %v7083_v35 }
 0x106   : > { %v627_v33 = vld [vmem:[#allocation6 + $0x500] sm:$0xff]  ;;  %v7092_v37 = vcombine.high %v499_v31, %v503_v32  ;;  %3328 = vmatprep.subr.bf16.mxu0 %v7212_v30  ;;  %v7091_v43 = vcombine.low %v499_v31, %v503_v32 }
 0x107   : > { %v631_v34 = vld [vmem:[#allocation6 + $0x520] sm:$0xff]  ;;  %3329 = vmatpush1.bf16.msra.mxu0 %v7211_v36 }
 0x108   : > { %v7220_v38 = vcombine.high %v627_v33, %v631_v34  ;;  %v507_v39 = vld [vmem:[#allocation6 + $0x140] sm:$0xff]  ;;  %3277 = vmatprep.subr.bf16.mxu1 %v7092_v37  ;;  %v7219_v44 = vcombine.low %v627_v33, %v631_v34 }
 0x109   : > { %v511_v40 = vld [vmem:[#allocation6 + $0x160] sm:$0xff]  ;;  %3278 = vmatpush1.bf16.msra.mxu1 %v7091_v43 }
 0x10a   : > { %v635_v41 = vld [vmem:[#allocation6 + $0x540] sm:$0xff]  ;;  %v7100_v45 = vcombine.high %v507_v39, %v511_v40  ;;  %3330 = vmatprep.subr.bf16.mxu0 %v7220_v38  ;;  %v7099_v51 = vcombine.low %v507_v39, %v511_v40 }
 0x10b   : > { %v639_v42 = vld [vmem:[#allocation6 + $0x560] sm:$0xff]  ;;  %3331 = vmatpush1.bf16.msra.mxu0 %v7219_v44 }
 0x10c   : > { %v7228_v46 = vcombine.high %v635_v41, %v639_v42  ;;  %v515_v47 = vld [vmem:[#allocation6 + $0x180] sm:$0xff]  ;;  %3279 = vmatprep.subr.bf16.mxu1 %v7100_v45  ;;  %v7227_v53 = vcombine.low %v635_v41, %v639_v42 }
 0x10d   : > { %v519_v48 = vld [vmem:[#allocation6 + $0x1a0] sm:$0xff]  ;;  %3280 = vmatpush1.bf16.msra.mxu1 %v7099_v51 }
 0x10e   : > { %v643_v49 = vld [vmem:[#allocation6 + $0x580] sm:$0xff]  ;;  %v7108_v54 = vcombine.high %v515_v47, %v519_v48  ;;  %3332 = vmatprep.subr.bf16.mxu0 %v7228_v46  ;;  %v7107_v61 = vcombine.low %v515_v47, %v519_v48 }
 0x10f   : > { %v647_v50 = vld [vmem:[#allocation6 + $0x5a0] sm:$0xff]  ;;  %3333 = vmatpush1.bf16.msra.mxu0 %v7227_v53 }
 0x110   : > { %v523_v52 = vld [vmem:[#allocation6 + $0x1c0] sm:$0xff]  ;;  %v7236_v56 = vcombine.high %v643_v49, %v647_v50  ;;  %3281 = vmatprep.subr.bf16.mxu1 %v7108_v54  ;;  %v7235_v62 = vcombine.low %v643_v49, %v647_v50 }
 0x111   : > { %v527_v55 = vld [vmem:[#allocation6 + $0x1e0] sm:$0xff]  ;;  %3282 = vmatpush1.bf16.msra.mxu1 %v7107_v61 }
 0x112   : > { %v651_v57 = vld [vmem:[#allocation6 + $0x5c0] sm:$0xff]  ;;  %v7116_v63 = vcombine.high %v523_v52, %v527_v55  ;;  %3334 = vmatprep.subr.bf16.mxu0 %v7236_v56  ;;  %v7115_v5 = vcombine.low %v523_v52, %v527_v55 }
 0x113   : > { %v9374_v58 = vld [vmem:[%s9351_s29 + $0x4] ss:$28 sps:$4 sm:$0xff]   ;;  %3335 = vmatpush1.bf16.msra.mxu0 %v7235_v62 }
 0x114   : > { %v655_v59 = vld [vmem:[#allocation6 + $0x5e0] sm:$0xff]  ;;  %3301 = vmatprep.mubr.bf16.mxu1 %v9374_v58  ;;  %3283 = vmatprep.subr.bf16.mxu1 %v7116_v63 }
 0x115   : > { %v7244_v0 = vcombine.high %v651_v57, %v655_v59  ;;  %v531_v1 = vld [vmem:[#allocation6 + $0x200] sm:$0xff]  ;;  %v7243_v6 = vcombine.low %v651_v57, %v655_v59  ;;  %3284 = vmatpush1.bf16.msra.mxu1 %v7115_v5 }
 0x116   : > { %v535_v2 = vld [vmem:[#allocation6 + $0x220] sm:$0xff] }
 0x117   : > { %v659_v3 = vld [vmem:[#allocation6 + $0x600] sm:$0xff]  ;;  %v7124_v7 = vcombine.high %v531_v1, %v535_v2  ;;  %3336 = vmatprep.subr.bf16.mxu0 %v7244_v0  ;;  %v7123_v13 = vcombine.low %v531_v1, %v535_v2 }
 0x118   : > { %v663_v4 = vld [vmem:[#allocation6 + $0x620] sm:$0xff]  ;;  %3337 = vmatpush1.bf16.msra.mxu0 %v7243_v6 }
 0x119   : > { %v7252_v8 = vcombine.high %v659_v3, %v663_v4  ;;  %v539_v9 = vld [vmem:[#allocation6 + $0x240] sm:$0xff]  ;;  %3285 = vmatprep.subr.bf16.mxu1 %v7124_v7  ;;  %v7251_v14 = vcombine.low %v659_v3, %v663_v4  ;;  %v468_v3 = vld [vmem:[#allocation6 + $0x8] sm:$0xff] }
 0x11a   : > { %v543_v10 = vld [vmem:[#allocation6 + $0x260] sm:$0xff]  ;;  %3286 = vmatpush1.bf16.msra.mxu1 %v7123_v13  ;;  %v472_v4 = vld [vmem:[#allocation6 + $0x28] sm:$0xff] }
 0x11b   : > { %v667_v11 = vld [vmem:[#allocation6 + $0x640] sm:$0xff]  ;;  %v7132_v15 = vcombine.high %v539_v9, %v543_v10  ;;  %3338 = vmatprep.subr.bf16.mxu0 %v7252_v8  ;;  %v7131_v22 = vcombine.low %v539_v9, %v543_v10  ;;  %v7062_v9 = vcombine.high %v468_v3, %v472_v4 }
 0x11c   : > { %v671_v12 = vld [vmem:[#allocation6 + $0x660] sm:$0xff]  ;;  %3339 = vmatpush1.bf16.msra.mxu0 %v7251_v14 }
 0x11d   : > { %v7260_v16 = vcombine.high %v667_v11, %v671_v12  ;;  %v547_v17 = vld [vmem:[#allocation6 + $0x280] sm:$0xff]  ;;  %3287 = vmatprep.subr.bf16.mxu1 %v7132_v15  ;;  %v7259_v23 = vcombine.low %v667_v11, %v671_v12  ;;  %v476_v11 = vld [vmem:[#allocation6 + $0x48] sm:$0xff] }
 0x11e   : > { %v551_v18 = vld [vmem:[#allocation6 + $0x2a0] sm:$0xff]  ;;  %3288 = vmatpush1.bf16.msra.mxu1 %v7131_v22  ;;  %v480_v12 = vld [vmem:[#allocation6 + $0x68] sm:$0xff] }
 0x11f   : > { %v675_v19 = vld [vmem:[#allocation6 + $0x680] sm:$0xff]  ;;  %v7140_v24 = vcombine.high %v547_v17, %v551_v18  ;;  %3340 = vmatprep.subr.bf16.mxu0 %v7260_v16  ;;  %v7139_v30 = vcombine.low %v547_v17, %v551_v18  ;;  %v7061_v16 = vcombine.low %v468_v3, %v472_v4  ;;  %v484_v22 = vld [vmem:[#allocation6 + $0x88] sm:$0xff] }
 0x120   : > { %v679_v20 = vld [vmem:[#allocation6 + $0x6a0] sm:$0xff]  ;;  %3341 = vmatpush1.bf16.msra.mxu0 %v7259_v23  ;;  %v488_v23 = vld [vmem:[#allocation6 + $0xa8] sm:$0xff] }
 0x121   : > { %v7268_v25 = vcombine.high %v675_v19, %v679_v20  ;;  %v555_v26 = vld [vmem:[#allocation6 + $0x2c0] sm:$0xff]  ;;  %3289 = vmatprep.subr.bf16.mxu1 %v7140_v24  ;;  %v7267_v31 = vcombine.low %v675_v19, %v679_v20  ;;  %v7070_v19 = vcombine.high %v476_v11, %v480_v12  ;;  %v9385_v24 = vld [vmem:[%s9351_s29 + $0x3c] ss:$28 sps:$4 sm:$0xff]  }
 0x122   : > { %v559_v27 = vld [vmem:[#allocation6 + $0x2e0] sm:$0xff]  ;;  %3290 = vmatpush1.bf16.msra.mxu1 %v7139_v30  ;;  %v7078_v30 = vcombine.high %v484_v22, %v488_v23  ;;  %v524_v4 = vld [vmem:[#allocation6 + $0x1c8] sm:$0xff] }
 0x123   : > { %v683_v28 = vld [vmem:[#allocation6 + $0x6c0] sm:$0xff]  ;;  %v7148_v32 = vcombine.high %v555_v26, %v559_v27  ;;  %3342 = vmatprep.subr.bf16.mxu0 %v7268_v25  ;;  %v7147_v38 = vcombine.low %v555_v26, %v559_v27 }
 0x124   : > { %v687_v29 = vld [vmem:[#allocation6 + $0x6e0] sm:$0xff]  ;;  %3343 = vmatpush1.bf16.msra.mxu0 %v7267_v31 }
 0x125   : > { %v7276_v33 = vcombine.high %v683_v28, %v687_v29  ;;  %v563_v34 = vld [vmem:[#allocation6 + $0x300] sm:$0xff]  ;;  %3291 = vmatprep.subr.bf16.mxu1 %v7148_v32  ;;  %v7275_v39 = vcombine.low %v683_v28, %v687_v29  ;;  %v7069_v28 = vcombine.low %v476_v11, %v480_v12  ;;  %v492_v32 = vld [vmem:[#allocation6 + $0xc8] sm:$0xff] }
 0x126   : > { %v567_v35 = vld [vmem:[#allocation6 + $0x320] sm:$0xff]  ;;  %3292 = vmatpush1.bf16.msra.mxu1 %v7147_v38  ;;  %v532_v12 = vld [vmem:[#allocation6 + $0x208] sm:$0xff] }
 0x127   : > { %v691_v36 = vld [vmem:[#allocation6 + $0x700] sm:$0xff]  ;;  %v7156_v40 = vcombine.high %v563_v34, %v567_v35  ;;  %3344 = vmatprep.subr.bf16.mxu0 %v7276_v33  ;;  %v7155_v46 = vcombine.low %v563_v34, %v567_v35  ;;  %v496_v33 = vld [vmem:[#allocation6 + $0xe8] sm:$0xff] }
 0x128   : > { %v695_v37 = vld [vmem:[#allocation6 + $0x720] sm:$0xff]  ;;  %3345 = vmatpush1.bf16.msra.mxu0 %v7275_v39 }
 0x129   : > { %v7284_v41 = vcombine.high %v691_v36, %v695_v37  ;;  %v571_v42 = vld [vmem:[#allocation6 + $0x340] sm:$0xff]  ;;  %3293 = vmatprep.subr.bf16.mxu1 %v7156_v40  ;;  %v7283_v47 = vcombine.low %v691_v36, %v695_v37  ;;  %v7077_v37 = vcombine.low %v484_v22, %v488_v23  ;;  %v7086_v40 = vcombine.high %v492_v32, %v496_v33  ;;  %v540_v22 = vld [vmem:[#allocation6 + $0x248] sm:$0xff] }
 0x12a   : > { %v575_v43 = vld [vmem:[#allocation6 + $0x360] sm:$0xff]  ;;  %3294 = vmatpush1.bf16.msra.mxu1 %v7155_v46 }
 0x12b   : > { %v699_v44 = vld [vmem:[#allocation6 + $0x740] sm:$0xff]  ;;  %v7164_v48 = vcombine.high %v571_v42, %v575_v43  ;;  %3346 = vmatprep.subr.bf16.mxu0 %v7284_v41  ;;  %v7163_v54 = vcombine.low %v571_v42, %v575_v43  ;;  %v500_v42 = vld [vmem:[#allocation6 + $0x108] sm:$0xff] }
 0x12c   : > { %v703_v45 = vld [vmem:[#allocation6 + $0x760] sm:$0xff]  ;;  %3347 = vmatpush1.bf16.msra.mxu0 %v7283_v47  ;;  %v504_v43 = vld [vmem:[#allocation6 + $0x128] sm:$0xff]  ;;  %v7085_v47 = vcombine.low %v492_v32, %v496_v33 }
 0x12d   : > { %v7292_v49 = vcombine.high %v699_v44, %v703_v45  ;;  %v579_v50 = vld [vmem:[#allocation6 + $0x380] sm:$0xff]  ;;  %3295 = vmatprep.subr.bf16.mxu1 %v7164_v48  ;;  %v7291_v55 = vcombine.low %v699_v44, %v703_v45  ;;  %v552_v33 = vld [vmem:[#allocation6 + $0x2a8] sm:$0xff] }
 0x12e   : > { %v583_v51 = vld [vmem:[#allocation6 + $0x3a0] sm:$0xff]  ;;  %3296 = vmatpush1.bf16.msra.mxu1 %v7163_v54 }
 0x12f   : > { %v707_v52 = vld [vmem:[#allocation6 + $0x780] sm:$0xff]  ;;  %v7172_v56 = vcombine.high %v579_v50, %v583_v51  ;;  %3348 = vmatprep.subr.bf16.mxu0 %v7292_v49  ;;  %v7171_v63 = vcombine.low %v579_v50, %v583_v51  ;;  %v7094_v49 = vcombine.high %v500_v42, %v504_v43 }
 0x130   : > { %v711_v53 = vld [vmem:[#allocation6 + $0x7a0] sm:$0xff]  ;;  %3349 = vmatpush1.bf16.msra.mxu0 %v7291_v55  ;;  %v7093_v55 = vcombine.low %v500_v42, %v504_v43  ;;  %v560_v42 = vld [vmem:[#allocation6 + $0x2e8] sm:$0xff] }
 0x131   : > { %v7300_v57 = vcombine.high %v707_v52, %v711_v53  ;;  %v587_v59 = vld [vmem:[#allocation6 + $0x3c0] sm:$0xff]  ;;  %3297 = vmatprep.subr.bf16.mxu1 %v7172_v56  ;;  %v7299_v0 = vcombine.low %v707_v52, %v711_v53  ;;  %v508_v52 = vld [vmem:[#allocation6 + $0x148] sm:$0xff] }
 0x132   : > { %v591_v60 = vld [vmem:[#allocation6 + $0x3e0] sm:$0xff]  ;;  %3298 = vmatpush1.bf16.msra.mxu1 %v7171_v63  ;;  %v512_v53 = vld [vmem:[#allocation6 + $0x168] sm:$0xff] }
 0x133   : > { %v715_v61 = vld [vmem:[#allocation6 + $0x7c0] sm:$0xff]  ;;  %v7180_v1 = vcombine.high %v587_v59, %v591_v60  ;;  %3350 = vmatprep.subr.bf16.mxu0 %v7300_v57  ;;  %v7179_v7 = vcombine.low %v587_v59, %v591_v60  ;;  %v7102_v57 = vcombine.high %v508_v52, %v512_v53  ;;  %v520_v63 = vld [vmem:[#allocation6 + $0x1a8] sm:$0xff] }
 0x134   : > { %v719_v62 = vld [vmem:[#allocation6 + $0x7e0] sm:$0xff]  ;;  %3351 = vmatpush1.bf16.msra.mxu0 %v7299_v0  ;;  %v7101_v0 = vcombine.low %v508_v52, %v512_v53 }
 0x135   : > { %v7308_v2 = vcombine.high %v715_v61, %v719_v62  ;;  %v723_v5 = vld [vmem:[#allocation6 + $0x800] sm:$0xff]  ;;  %3299 = vmatprep.subr.bf16.mxu1 %v7180_v1  ;;  %v7307_v8 = vcombine.low %v715_v61, %v719_v62  ;;  %v516_v61 = vld [vmem:[#allocation6 + $0x188] sm:$0xff] }
 0x136   : > { %v727_v6 = vld [vmem:[#allocation6 + $0x820] sm:$0xff]  ;;  %3300 = vmatpush1.bf16.msra.mxu1 %v7179_v7  ;;  %v7109_v7 = vcombine.low %v516_v61, %v520_v63 }
 0x137   : > { %3352 = vmatprep.subr.bf16.mxu0 %v7308_v2  ;;  %v7316_v10 = vcombine.high %v723_v5, %v727_v6  ;;  %v9381_v13 = vld [vmem:[%s9351_s29] ss:$28 sps:$4 sm:$0xff]   ;;  %v8180_v17 = vld [vmem:[%s9351_s29 + $0x8] ss:$28 sps:$4 sm:$0xff]   ;;  %v7315_v18 = vcombine.low %v723_v5, %v727_v6  ;;  %3481 = vmatprep.subr.bf16.mxu1 %v7062_v9  ;;  %v9391_v36 = vld [vmem:[%s9351_s29 + $0x38] ss:$28 sps:$4 sm:$0xff]   ;;  %v7110_v2 = vcombine.high %v516_v61, %v520_v63 }
 0x138   : > { %v731_v14 = vld [vmem:[#allocation6 + $0x840] sm:$0xff]  ;;  %3353 = vmatpush1.bf16.msra.mxu0 %v7307_v8  ;;  %v528_v6 = vld [vmem:[#allocation6 + $0x1e8] sm:$0xff] }
 0x139   : > { %v735_v15 = vld [vmem:[#allocation6 + $0x860] sm:$0xff]  ;;  %3375 = vmatprep.subr.bf16.mxu0 %v7316_v10  ;;  %3302 = vmatmul.mubr.bf16.vlgmr.msra.gmra.mrb[0].mxu1 %v9381_v13  ;;  %v7118_v9 = vcombine.high %v524_v4, %v528_v6 }
 0x13a   : > { %v7324_v20 = vcombine.high %v731_v14, %v735_v15  ;;  %v739_v25 = vld [vmem:[#allocation6 + $0x880] sm:$0xff]  ;;  %3482 = vmatpush1.bf16.msra.mxu1 %v7061_v16  ;;  %v7323_v29 = vcombine.low %v731_v14, %v735_v15  ;;  %3311 = vmatprep.mubr.bf16.mxu1 %v9385_v24  ;;  %v536_v15 = vld [vmem:[#allocation6 + $0x228] sm:$0xff]  ;;  %v7117_v16 = vcombine.low %v524_v4, %v528_v6 }
 0x13b   : > { %v743_v26 = vld [vmem:[#allocation6 + $0x8a0] sm:$0xff]  ;;  %3355 = vmatmul.mubr.bf16.vlgmr.msra.gmra.mrb[0].mxu0 %v8180_v17  ;;  %3483 = vmatprep.subr.bf16.mxu1 %v7070_v19 }
 0x13c   : > { %v8184_v27 = vld [vmem:[%s9351_s29 + $0x44] ss:$28 sps:$4 sm:$0xff]   ;;  %3376 = vmatpush1.bf16.msra.mxu0 %v7315_v18  ;;  %v7332_v31 = vcombine.high %v739_v25, %v743_v26  ;;  %v7331_v39 = vcombine.low %v739_v25, %v743_v26  ;;  %v8189_v44 = vld [vmem:[%s9351_s29 + $0x14] ss:$28 sps:$4 sm:$0xff]   ;;  %v7126_v18 = vcombine.high %v532_v12, %v536_v15  ;;  %v544_v25 = vld [vmem:[#allocation6 + $0x268] sm:$0xff]  ;;  %v7125_v26 = vcombine.low %v532_v12, %v536_v15 }
 0x13d   : > { %3377 = vmatprep.subr.bf16.mxu0 %v7324_v20  ;;  %v747_v34 = vld [vmem:[#allocation6 + $0x8c0] sm:$0xff]  ;;  %3364 = vmatprep.mubr.bf16.mxu0 %v8184_v27 }
 0x13e   : > { %v751_v35 = vld [vmem:[#allocation6 + $0x8e0] sm:$0xff]  ;;  %3484 = vmatpush1.bf16.msra.mxu1 %v7069_v28  ;;  %v7134_v28 = vcombine.high %v540_v22, %v544_v25 }
 0x13f   : > { %v8186_v38 = vld [vmem:[%s9351_s29 + $0x40] ss:$28 sps:$4 sm:$0xff]   ;;  %3485 = vmatprep.subr.bf16.mxu1 %v7078_v30  ;;  %v7340_v41 = vcombine.high %v747_v34, %v751_v35  ;;  %v7339_v48 = vcombine.low %v747_v34, %v751_v35  ;;  %v7133_v34 = vcombine.low %v540_v22, %v544_v25 }
 0x140   : > { %3378 = vmatpush1.bf16.msra.mxu0 %v7323_v29  ;;  %v755_v45 = vld [vmem:[#allocation6 + $0x900] sm:$0xff] }
 0x141   : > { %3379 = vmatprep.subr.bf16.mxu0 %v7332_v31  ;;  %v759_v46 = vld [vmem:[#allocation6 + $0x920] sm:$0xff]  ;;  %3312 = vmatmul.mubr.bf16.gmra.mrb[4].mxu1 %v9391_v36  ;;  %v548_v31 = vld [vmem:[#allocation6 + $0x288] sm:$0xff] }
 0x142   : > { %3486 = vmatpush1.bf16.msra.mxu1 %v7077_v37  ;;  %v7348_v50 = vcombine.high %v755_v45, %v759_v46  ;;  %v763_v51 = vld [vmem:[#allocation6 + $0x940] sm:$0xff]  ;;  %3513 = vmatprep.mubr.bf16.mxu1 %v9374_v58  ;;  %v7347_v56 = vcombine.low %v755_v45, %v759_v46  ;;  %v7142_v37 = vcombine.high %v548_v31, %v552_v33 }
 0x143   : > { %3365 = vmatmul.mubr.bf16.gmra.mrb[4].mxu0 %v8186_v38  ;;  %3487 = vmatprep.subr.bf16.mxu1 %v7086_v40  ;;  %v767_v54 = vld [vmem:[#allocation6 + $0x960] sm:$0xff]  ;;  %v556_v40 = vld [vmem:[#allocation6 + $0x2c8] sm:$0xff]  ;;  %v7141_v43 = vcombine.low %v548_v31, %v552_v33 }
 0x144   : > { %3380 = vmatpush1.bf16.msra.mxu0 %v7331_v39  ;;  %3407 = vmatprep.mubr.bf16.mxu0 %v8189_v44  ;;  %v771_v59 = vld [vmem:[#allocation6 + $0x980] sm:$0xff]  ;;  %v7356_v62 = vcombine.high %v763_v51, %v767_v54  ;;  %v7355_v1 = vcombine.low %v763_v51, %v767_v54  ;;  %v7150_v45 = vcombine.high %v556_v40, %v560_v42 }
 0x145   : > { %3381 = vmatprep.subr.bf16.mxu0 %v7340_v41  ;;  %v775_v60 = vld [vmem:[#allocation6 + $0x9a0] sm:$0xff]  ;;  %v7149_v51 = vcombine.low %v556_v40, %v560_v42  ;;  %v8190_v40 = vld [vmem:[%s9351_s29 + $0x4c] ss:$28 sps:$4 sm:$0xff]  }
 0x146   : > { %3488 = vmatpush1.bf16.msra.mxu1 %v7085_v47  ;;  %v779_v3 = vld [vmem:[#allocation6 + $0x9c0] sm:$0xff]  ;;  %v7364_v5 = vcombine.high %v771_v59, %v775_v60  ;;  %v7363_v8 = vcombine.low %v771_v59, %v775_v60  ;;  %v576_v59 = vld [vmem:[#allocation6 + $0x368] sm:$0xff] }
 0x147   : > { %3489 = vmatprep.subr.bf16.mxu1 %v7094_v49  ;;  %v783_v58 = vld [vmem:[#allocation6 + $0x9e0] sm:$0xff] }
 0x148   : > { %3382 = vmatpush1.bf16.msra.mxu0 %v7339_v48  ;;  %v787_v10 = vld [vmem:[#allocation6 + $0xa00] sm:$0xff]  ;;  %v7372_v14 = vcombine.high %v779_v3, %v783_v58  ;;  %v7371_v17 = vcombine.low %v779_v3, %v783_v58  ;;  %v564_v48 = vld [vmem:[#allocation6 + $0x308] sm:$0xff] }
 0x149   : > { %3383 = vmatprep.subr.bf16.mxu0 %v7348_v50  ;;  %v791_v11 = vld [vmem:[#allocation6 + $0xa20] sm:$0xff]  ;;  %v568_v50 = vld [vmem:[#allocation6 + $0x328] sm:$0xff] }
 0x14a   : > { %3490 = vmatpush1.bf16.msra.mxu1 %v7093_v55  ;;  %v795_v19 = vld [vmem:[#allocation6 + $0xa40] sm:$0xff]  ;;  %v7380_v23 = vcombine.high %v787_v10, %v791_v11  ;;  %v7379_v27 = vcombine.low %v787_v10, %v791_v11  ;;  %v7158_v53 = vcombine.high %v564_v48, %v568_v50  ;;  %v7157_v60 = vcombine.low %v564_v48, %v568_v50  ;;  %v584_v3 = vld [vmem:[#allocation6 + $0x3a8] sm:$0xff] }
 0x14b   : > { %3491 = vmatprep.subr.bf16.mxu1 %v7102_v57  ;;  %v799_v20 = vld [vmem:[#allocation6 + $0xa60] sm:$0xff]  ;;  %v592_v10 = vld [vmem:[#allocation6 + $0x3e8] sm:$0xff] }
 0x14c   : > { %3384 = vmatpush1.bf16.msra.mxu0 %v7347_v56  ;;  %v803_v29 = vld [vmem:[#allocation6 + $0xa80] sm:$0xff]  ;;  %v7388_v32 = vcombine.high %v795_v19, %v799_v20  ;;  %v7387_v35 = vcombine.low %v795_v19, %v799_v20  ;;  %v572_v56 = vld [vmem:[#allocation6 + $0x348] sm:$0xff] }
 0x14d   : > { %3385 = vmatprep.subr.bf16.mxu0 %v7356_v62  ;;  %v807_v30 = vld [vmem:[#allocation6 + $0xaa0] sm:$0xff]  ;;  %v7166_v62 = vcombine.high %v572_v56, %v576_v59  ;;  %v7165_v58 = vcombine.low %v572_v56, %v576_v59  ;;  %v600_v19 = vld [vmem:[#allocation6 + $0x428] sm:$0xff] }
 0x14e   : > { %3492 = vmatpush1.bf16.msra.mxu1 %v7101_v0  ;;  %v811_v38 = vld [vmem:[#allocation6 + $0xac0] sm:$0xff]  ;;  %v7396_v41 = vcombine.high %v803_v29, %v807_v30  ;;  %v7395_v44 = vcombine.low %v803_v29, %v807_v30  ;;  %v608_v30 = vld [vmem:[#allocation6 + $0x468] sm:$0xff] }
 0x14f   : > { %3493 = vmatprep.subr.bf16.mxu1 %v7110_v2  ;;  %v815_v39 = vld [vmem:[#allocation6 + $0xae0] sm:$0xff]  ;;  %v632_v56 = vld [vmem:[#allocation6 + $0x528] sm:$0xff] }
 0x150   : > { %3386 = vmatpush1.bf16.msra.mxu0 %v7355_v1  ;;  %v819_v46 = vld [vmem:[#allocation6 + $0xb00] sm:$0xff]  ;;  %v7404_v49 = vcombine.high %v811_v38, %v815_v39  ;;  %v7403_v52 = vcombine.low %v811_v38, %v815_v39  ;;  %v580_v1 = vld [vmem:[#allocation6 + $0x388] sm:$0xff] }
 0x151   : > { %3387 = vmatprep.subr.bf16.mxu0 %v7364_v5  ;;  %v823_v47 = vld [vmem:[#allocation6 + $0xb20] sm:$0xff]  ;;  %v7174_v5 = vcombine.high %v580_v1, %v584_v3  ;;  %v7173_v11 = vcombine.low %v580_v1, %v584_v3  ;;  %v616_v38 = vld [vmem:[#allocation6 + $0x4a8] sm:$0xff] }
 0x152   : > { %3494 = vmatpush1.bf16.msra.mxu1 %v7109_v7  ;;  %v827_v54 = vld [vmem:[#allocation6 + $0xb40] sm:$0xff]  ;;  %v7412_v57 = vcombine.high %v819_v46, %v823_v47  ;;  %v7411_v61 = vcombine.low %v819_v46, %v823_v47  ;;  %v620_v46 = vld [vmem:[#allocation6 + $0x4c8] sm:$0xff] }
 0x153   : > { %3495 = vmatprep.subr.bf16.mxu1 %v7118_v9  ;;  %v831_v55 = vld [vmem:[#allocation6 + $0xb60] sm:$0xff]  ;;  %v624_v47 = vld [vmem:[#allocation6 + $0x4e8] sm:$0xff] }
 0x154   : > { %3388 = vmatpush1.bf16.msra.mxu0 %v7363_v8  ;;  %v835_v63 = vld [vmem:[#allocation6 + $0xb80] sm:$0xff]  ;;  %v7420_v2 = vcombine.high %v827_v54, %v831_v55  ;;  %v7419_v4 = vcombine.low %v827_v54, %v831_v55  ;;  %v588_v8 = vld [vmem:[#allocation6 + $0x3c8] sm:$0xff] }
 0x155   : > { %3389 = vmatprep.subr.bf16.mxu0 %v7372_v14  ;;  %v839_v0 = vld [vmem:[#allocation6 + $0xba0] sm:$0xff]  ;;  %v7182_v14 = vcombine.high %v588_v8, %v592_v10  ;;  %v7181_v20 = vcombine.low %v588_v8, %v592_v10  ;;  %v628_v54 = vld [vmem:[#allocation6 + $0x508] sm:$0xff] }
 0x156   : > { %3496 = vmatpush1.bf16.msra.mxu1 %v7117_v16  ;;  %v843_v6 = vld [vmem:[#allocation6 + $0xbc0] sm:$0xff]  ;;  %v7428_v9 = vcombine.high %v835_v63, %v839_v0  ;;  %v7427_v12 = vcombine.low %v835_v63, %v839_v0  ;;  %v7222_v59 = vcombine.high %v628_v54, %v632_v56  ;;  %v640_v0 = vld [vmem:[#allocation6 + $0x568] sm:$0xff] }
 0x157   : > { %3497 = vmatprep.subr.bf16.mxu1 %v7126_v18  ;;  %v847_v7 = vld [vmem:[#allocation6 + $0xbe0] sm:$0xff]  ;;  %v9405_v1 = vld [vmem:[%s9351_s29 + $0xc] ss:$28 sps:$4 sm:$0xff]  }
 0x158   : > { %3390 = vmatpush1.bf16.msra.mxu0 %v7371_v17  ;;  %v851_v15 = vld [vmem:[#allocation6 + $0xc00] sm:$0xff]  ;;  %v596_v17 = vld [vmem:[#allocation6 + $0x408] sm:$0xff]  ;;  %v7436_v18 = vcombine.high %v843_v6, %v847_v7  ;;  %v7435_v22 = vcombine.low %v843_v6, %v847_v7 }
 0x159   : > { %3391 = vmatprep.subr.bf16.mxu0 %v7380_v23  ;;  %v855_v16 = vld [vmem:[#allocation6 + $0xc20] sm:$0xff]  ;;  %v7190_v23 = vcombine.high %v596_v17, %v600_v19  ;;  %v7189_v31 = vcombine.low %v596_v17, %v600_v19  ;;  %v648_v7 = vld [vmem:[#allocation6 + $0x5a8] sm:$0xff] }
 0x15a   : > { %3498 = vmatpush1.bf16.msra.mxu1 %v7125_v26  ;;  %v859_v25 = vld [vmem:[#allocation6 + $0xc40] sm:$0xff]  ;;  %v7444_v29 = vcombine.high %v851_v15, %v855_v16 }
 0x15b   : > { %3499 = vmatprep.subr.bf16.mxu1 %v7134_v28  ;;  %v863_v26 = vld [vmem:[#allocation6 + $0xc60] sm:$0xff] }
 0x15c   : > { %3392 = vmatpush1.bf16.msra.mxu0 %v7379_v27  ;;  %v604_v27 = vld [vmem:[#allocation6 + $0x448] sm:$0xff]  ;;  %v7452_v39 = vcombine.high %v859_v25, %v863_v26  ;;  %v7451_v42 = vcombine.low %v859_v25, %v863_v26  ;;  %v473_v26 = vld [vmem:[#allocation6 + $0x30] sm:$0xff] }
 0x15d   : > { %3393 = vmatprep.subr.bf16.mxu0 %v7388_v32  ;;  %v8187_v28 = vld [vmem:[%s9351_s29 + $0x10] ss:$28 sps:$4 sm:$0xff]   ;;  %v7443_v32 = vcombine.low %v851_v15, %v855_v16  ;;  %v7198_v33 = vcombine.high %v604_v27, %v608_v30 }
 0x15e   : > { %3500 = vmatpush1.bf16.msra.mxu1 %v7133_v34  ;;  %v867_v34 = vld [vmem:[#allocation6 + $0xc80] sm:$0xff]  ;;  %v652_v15 = vld [vmem:[#allocation6 + $0x5c8] sm:$0xff] }
 0x15f   : > { %3501 = vmatprep.subr.bf16.mxu1 %v7142_v37  ;;  %v612_v37 = vld [vmem:[#allocation6 + $0x488] sm:$0xff] }
 0x160   : > { %3394 = vmatpush1.bf16.msra.mxu0 %v7387_v35  ;;  %v871_v35 = vld [vmem:[#allocation6 + $0xca0] sm:$0xff]  ;;  %v7205_v50 = vcombine.low %v612_v37, %v616_v38  ;;  %v656_v16 = vld [vmem:[#allocation6 + $0x5e8] sm:$0xff] }
 0x161   : > { %3395 = vmatprep.subr.bf16.mxu0 %v7396_v41  ;;  %v7197_v41 = vcombine.low %v604_v27, %v608_v30  ;;  %v7460_v48 = vcombine.high %v867_v34, %v871_v35  ;;  %v7246_v19 = vcombine.high %v652_v15, %v656_v16  ;;  %v7245_v27 = vcombine.low %v652_v15, %v656_v16  ;;  %v668_v30 = vld [vmem:[#allocation6 + $0x648] sm:$0xff] }
 0x162   : > { %3502 = vmatpush1.bf16.msra.mxu1 %v7141_v43  ;;  %v7206_v43 = vcombine.high %v612_v37, %v616_v38 }
 0x163   : > { %3503 = vmatprep.subr.bf16.mxu1 %v7150_v45  ;;  %v879_v45 = vld [vmem:[#allocation6 + $0xce0] sm:$0xff] }
 0x164   : > { %3396 = vmatpush1.bf16.msra.mxu0 %v7395_v44  ;;  %v875_v44 = vld [vmem:[#allocation6 + $0xcc0] sm:$0xff] }
 0x165   : > { %3397 = vmatprep.subr.bf16.mxu0 %v7404_v49  ;;  %v8192_v49 = vld [vmem:[%s9351_s29 + $0x48] ss:$28 sps:$4 sm:$0xff]   ;;  %v7468_v55 = vcombine.high %v875_v44, %v879_v45 }
 0x166   : > { %3504 = vmatpush1.bf16.msra.mxu1 %v7149_v51  ;;  %v7214_v51 = vcombine.high %v620_v46, %v624_v47 }
 0x167   : > { %3505 = vmatprep.subr.bf16.mxu1 %v7158_v53  ;;  %v887_v53 = vld [vmem:[#allocation6 + $0xd20] sm:$0xff] }
 0x168   : > { %3398 = vmatpush1.bf16.msra.mxu0 %v7403_v52  ;;  %v883_v52 = vld [vmem:[#allocation6 + $0xd00] sm:$0xff] }
 0x169   : > { %3399 = vmatprep.subr.bf16.mxu0 %v7412_v57  ;;  %v7213_v57 = vcombine.low %v620_v46, %v624_v47  ;;  %v7476_v63 = vcombine.high %v883_v52, %v887_v53 }
 0x16a   : > { %3506 = vmatpush1.bf16.msra.mxu1 %v7157_v60  ;;  %v891_v60 = vld [vmem:[#allocation6 + $0xd40] sm:$0xff] }
 0x16b   : > { %3507 = vmatprep.subr.bf16.mxu1 %v7166_v62  ;;  %v636_v62 = vld [vmem:[#allocation6 + $0x548] sm:$0xff] }
 0x16c   : > { %3400 = vmatpush1.bf16.msra.mxu0 %v7411_v61  ;;  %v895_v61 = vld [vmem:[#allocation6 + $0xd60] sm:$0xff]  ;;  %v7230_v3 = vcombine.high %v636_v62, %v640_v0  ;;  %v7229_v8 = vcombine.low %v636_v62, %v640_v0  ;;  %v700_v0 = vld [vmem:[#allocation6 + $0x748] sm:$0xff] }
 0x16d   : > { %3401 = vmatprep.subr.bf16.mxu0 %v7420_v2  ;;  %v7475_v2 = vcombine.low %v883_v52, %v887_v53  ;;  %v7484_v6 = vcombine.high %v891_v60, %v895_v61  ;;  %v497_v52 = vld [vmem:[#allocation6 + $0xf0] sm:$0xff] }
 0x16e   : > { %3508 = vmatpush1.bf16.msra.mxu1 %v7165_v58  ;;  %v899_v58 = vld [vmem:[#allocation6 + $0xd80] sm:$0xff] }
 0x16f   : > { %3509 = vmatprep.subr.bf16.mxu1 %v7174_v5  ;;  %v644_v5 = vld [vmem:[#allocation6 + $0x588] sm:$0xff] }
 0x170   : > { %3402 = vmatpush1.bf16.msra.mxu0 %v7419_v4  ;;  %v903_v4 = vld [vmem:[#allocation6 + $0xda0] sm:$0xff]  ;;  %v7238_v10 = vcombine.high %v644_v5, %v648_v7  ;;  %v7237_v17 = vcombine.low %v644_v5, %v648_v7 }
 0x171   : > { %3403 = vmatprep.subr.bf16.mxu0 %v7428_v9  ;;  %v7483_v9 = vcombine.low %v891_v60, %v895_v61  ;;  %v505_v60 = vld [vmem:[#allocation6 + $0x130] sm:$0xff] }
 0x172   : > { %3510 = vmatpush1.bf16.msra.mxu1 %v7173_v11  ;;  %v907_v11 = vld [vmem:[#allocation6 + $0xdc0] sm:$0xff] }
 0x173   : > { %3511 = vmatprep.subr.bf16.mxu1 %v7182_v14  ;;  %v7492_v14 = vcombine.high %v899_v58, %v903_v4 }
 0x174   : > { %3404 = vmatpush1.bf16.msra.mxu0 %v7427_v12  ;;  %v911_v12 = vld [vmem:[#allocation6 + $0xde0] sm:$0xff] }
 0x175   : > { %3405 = vmatprep.subr.bf16.mxu0 %v7436_v18  ;;  %v7491_v18 = vcombine.low %v899_v58, %v903_v4  ;;  %v7500_v25 = vcombine.high %v907_v11, %v911_v12  ;;  %v513_v58 = vld [vmem:[#allocation6 + $0x170] sm:$0xff] }
 0x176   : > { %3512 = vmatpush1.bf16.msra.mxu1 %v7181_v20  ;;  %v660_v20 = vld [vmem:[#allocation6 + $0x608] sm:$0xff]  ;;  %v8676_v4 = vld [vmem:[%s9351_s29 + $0x4] ss:$28 sps:$4 sm:$0xff]  }
 0x177   : > { %3534 = vmatprep.subr.bf16.mxu1 %v7190_v23  ;;  %v469_v23 = vld [vmem:[#allocation6 + $0x10] sm:$0xff] }
 0x178   : > { %3406 = vmatpush1.bf16.msra.mxu0 %v7435_v22  ;;  %v664_v22 = vld [vmem:[#allocation6 + $0x628] sm:$0xff]  ;;  %v7063_v38 = vcombine.low %v469_v23, %v473_v26 }
 0x179   : > { %3428 = vmatprep.subr.bf16.mxu0 %v7444_v29  ;;  %3514 = vmatmul.mubr.bf16.vlgmr.msra.gmra.mrb[8].mxu1 %v9381_v13  ;;  %v7459_v13 = vcombine.low %v867_v34, %v871_v35  ;;  %v7254_v29 = vcombine.high %v660_v20, %v664_v22  ;;  %v7064_v34 = vcombine.high %v469_v23, %v473_v26  ;;  %v481_v35 = vld [vmem:[#allocation6 + $0x70] sm:$0xff] }
 0x17a   : > { %3535 = vmatpush1.bf16.msra.mxu1 %v7189_v31  ;;  %3523 = vmatprep.mubr.bf16.mxu1 %v9385_v24  ;;  %v7467_v24 = vcombine.low %v875_v44, %v879_v45  ;;  %v672_v31 = vld [vmem:[#allocation6 + $0x668] sm:$0xff]  ;;  %v7253_v37 = vcombine.low %v660_v20, %v664_v22  ;;  %v489_v44 = vld [vmem:[#allocation6 + $0xb0] sm:$0xff] }
 0x17b   : > { %3408 = vmatmul.mubr.bf16.vlgmr.msra.gmra.mrb[0].mxu0 %v8187_v28  ;;  %3536 = vmatprep.subr.bf16.mxu1 %v7198_v33  ;;  %v7499_v28 = vcombine.low %v907_v11, %v911_v12  ;;  %v8193_v33 = vld [vmem:[%s9351_s29 + $0x18] ss:$28 sps:$4 sm:$0xff]   ;;  %v7261_v45 = vcombine.low %v668_v30, %v672_v31 }
 0x17c   : > { %3429 = vmatpush1.bf16.msra.mxu0 %v7443_v32  ;;  %3417 = vmatprep.mubr.bf16.mxu0 %v8190_v40  ;;  %v477_v32 = vld [vmem:[#allocation6 + $0x50] sm:$0xff]  ;;  %v676_v40 = vld [vmem:[#allocation6 + $0x688] sm:$0xff] }
 0x17d   : > { %3430 = vmatprep.subr.bf16.mxu0 %v7452_v39  ;;  %v7262_v39 = vcombine.high %v668_v30, %v672_v31  ;;  %v7071_v46 = vcombine.low %v477_v32, %v481_v35  ;;  %v521_v12 = vld [vmem:[#allocation6 + $0x1b0] sm:$0xff] }
 0x17e   : > { %3537 = vmatpush1.bf16.msra.mxu1 %v7197_v41  ;;  %v680_v41 = vld [vmem:[#allocation6 + $0x6a8] sm:$0xff]  ;;  %v529_v22 = vld [vmem:[#allocation6 + $0x1f0] sm:$0xff] }
 0x17f   : > { %3538 = vmatprep.subr.bf16.mxu1 %v7206_v43  ;;  %v7072_v43 = vcombine.high %v477_v32, %v481_v35  ;;  %v7270_v47 = vcombine.high %v676_v40, %v680_v41  ;;  %v7269_v53 = vcombine.low %v676_v40, %v680_v41  ;;  %v537_v31 = vld [vmem:[#allocation6 + $0x230] sm:$0xff]  ;;  %v732_v35 = vld [vmem:[#allocation6 + $0x848] sm:$0xff] }
 0x180   : > { %3431 = vmatpush1.bf16.msra.mxu0 %v7451_v42  ;;  %v485_v42 = vld [vmem:[#allocation6 + $0x90] sm:$0xff] }
 0x181   : > { %3432 = vmatprep.subr.bf16.mxu0 %v7460_v48  ;;  %3524 = vmatmul.mubr.bf16.gmra.mrb[12].mxu1 %v9391_v36  ;;  %v7221_v36 = vcombine.low %v628_v54, %v632_v56  ;;  %v684_v48 = vld [vmem:[#allocation6 + $0x6c8] sm:$0xff]  ;;  %v7079_v54 = vcombine.low %v485_v42, %v489_v44  ;;  %v545_v40 = vld [vmem:[#allocation6 + $0x270] sm:$0xff] }
 0x182   : > { %3539 = vmatpush1.bf16.msra.mxu1 %v7205_v50  ;;  %3566 = vmatprep.mubr.bf16.mxu1 %v9405_v1  ;;  %v493_v50 = vld [vmem:[#allocation6 + $0xd0] sm:$0xff]  ;;  %v692_v56 = vld [vmem:[#allocation6 + $0x708] sm:$0xff] }
 0x183   : > { %3418 = vmatmul.mubr.bf16.gmra.mrb[4].mxu0 %v8192_v49  ;;  %3540 = vmatprep.subr.bf16.mxu1 %v7214_v51  ;;  %v688_v49 = vld [vmem:[#allocation6 + $0x6e8] sm:$0xff]  ;;  %v7080_v51 = vcombine.high %v485_v42, %v489_v44  ;;  %v7087_v62 = vcombine.low %v493_v50, %v497_v52 }
 0x184   : > { %3433 = vmatpush1.bf16.msra.mxu0 %v7459_v13  ;;  %3460 = vmatprep.mubr.bf16.mxu0 %v9027_v21  ;;  %v8194_v13 = vld [vmem:[%s9351_s29 + $0x50] ss:$28 sps:$4 sm:$0xff]   ;;  %v7277_v61 = vcombine.low %v684_v48, %v688_v49 }
 0x185   : > { %3434 = vmatprep.subr.bf16.mxu0 %v7468_v55  ;;  %v7278_v55 = vcombine.high %v684_v48, %v688_v49  ;;  %v740_v44 = vld [vmem:[#allocation6 + $0x888] sm:$0xff]  ;;  %v553_v48 = vld [vmem:[#allocation6 + $0x2b0] sm:$0xff] }
 0x186   : > { %3541 = vmatpush1.bf16.msra.mxu1 %v7213_v57  ;;  %v696_v57 = vld [vmem:[#allocation6 + $0x728] sm:$0xff] }
 0x187   : > { %3542 = vmatprep.subr.bf16.mxu1 %v7222_v59  ;;  %v7088_v59 = vcombine.high %v493_v50, %v497_v52  ;;  %v7285_v5 = vcombine.low %v692_v56, %v696_v57  ;;  %v9413_v49 = vld [vmem:[%s9351_s29 + $0x8] ss:$28 sps:$4 sm:$0xff]  }
 0x188   : > { %3435 = vmatpush1.bf16.msra.mxu0 %v7467_v24  ;;  %v501_v24 = vld [vmem:[#allocation6 + $0x110] sm:$0xff] }
 0x189   : > { %3436 = vmatprep.subr.bf16.mxu0 %v7476_v63  ;;  %v7286_v63 = vcombine.high %v692_v56, %v696_v57  ;;  %v561_v57 = vld [vmem:[#allocation6 + $0x2f0] sm:$0xff] }
 0x18a   : > { %3543 = vmatpush1.bf16.msra.mxu1 %v7221_v36  ;;  %v704_v36 = vld [vmem:[#allocation6 + $0x768] sm:$0xff] }
 0x18b   : > { %3544 = vmatprep.subr.bf16.mxu1 %v7230_v3  ;;  %v7096_v3 = vcombine.high %v501_v24, %v505_v60  ;;  %v7294_v7 = vcombine.high %v700_v0, %v704_v36 }
 0x18c   : > { %3437 = vmatpush1.bf16.msra.mxu0 %v7475_v2  ;;  %v509_v2 = vld [vmem:[#allocation6 + $0x150] sm:$0xff] }
 0x18d   : > { %3438 = vmatprep.subr.bf16.mxu0 %v7484_v6  ;;  %v7095_v6 = vcombine.low %v501_v24, %v505_v60  ;;  %v7104_v11 = vcombine.high %v509_v2, %v513_v58  ;;  %v7103_v15 = vcombine.low %v509_v2, %v513_v58  ;;  %v9421_v2 = vld [vmem:[%s9351_s29 + $0x40] ss:$28 sps:$4 sm:$0xff]   ;;  %v9425_v58 = vld [vmem:[%s9351_s29 + $0x14] ss:$28 sps:$4 sm:$0xff]  }
 0x18e   : > { %3545 = vmatpush1.bf16.msra.mxu1 %v7229_v8  ;;  %v708_v8 = vld [vmem:[#allocation6 + $0x788] sm:$0xff] }
 0x18f   : > { %3546 = vmatprep.subr.bf16.mxu1 %v7238_v10  ;;  %v517_v10 = vld [vmem:[#allocation6 + $0x190] sm:$0xff] }
 0x190   : > { %3439 = vmatpush1.bf16.msra.mxu0 %v7483_v9  ;;  %v712_v9 = vld [vmem:[#allocation6 + $0x7a8] sm:$0xff]  ;;  %v7112_v20 = vcombine.high %v517_v10, %v521_v12 }
 0x191   : > { %3440 = vmatprep.subr.bf16.mxu0 %v7492_v14  ;;  %v7293_v14 = vcombine.low %v700_v0, %v704_v36  ;;  %v7302_v16 = vcombine.high %v708_v8, %v712_v9  ;;  %v7301_v23 = vcombine.low %v708_v8, %v712_v9  ;;  %v569_v36 = vld [vmem:[#allocation6 + $0x330] sm:$0xff] }
 0x192   : > { %3547 = vmatpush1.bf16.msra.mxu1 %v7237_v17  ;;  %v716_v17 = vld [vmem:[#allocation6 + $0x7c8] sm:$0xff]  ;;  %v573_v8 = vld [vmem:[#allocation6 + $0x350] sm:$0xff] }
 0x193   : > { %3548 = vmatprep.subr.bf16.mxu1 %v7246_v19  ;;  %v525_v19 = vld [vmem:[#allocation6 + $0x1d0] sm:$0xff] }
 0x194   : > { %3441 = vmatpush1.bf16.msra.mxu0 %v7491_v18  ;;  %v720_v18 = vld [vmem:[#allocation6 + $0x7e8] sm:$0xff]  ;;  %v7120_v30 = vcombine.high %v525_v19, %v529_v22 }
 0x195   : > { %3442 = vmatprep.subr.bf16.mxu0 %v7500_v25  ;;  %v7111_v25 = vcombine.low %v517_v10, %v521_v12  ;;  %v7310_v26 = vcombine.high %v716_v17, %v720_v18  ;;  %v7309_v32 = vcombine.low %v716_v17, %v720_v18  ;;  %v577_v10 = vld [vmem:[#allocation6 + $0x370] sm:$0xff] }
 0x196   : > { %3549 = vmatpush1.bf16.msra.mxu1 %v7245_v27  ;;  %v724_v27 = vld [vmem:[#allocation6 + $0x808] sm:$0xff]  ;;  %v581_v17 = vld [vmem:[#allocation6 + $0x390] sm:$0xff]  ;;  %v7168_v18 = vcombine.high %v573_v8, %v577_v10 }
 0x197   : > { %3550 = vmatprep.subr.bf16.mxu1 %v7254_v29  ;;  %v533_v29 = vld [vmem:[#allocation6 + $0x210] sm:$0xff] }
 0x198   : > { %3443 = vmatpush1.bf16.msra.mxu0 %v7499_v28  ;;  %v728_v28 = vld [vmem:[#allocation6 + $0x828] sm:$0xff]  ;;  %v7127_v42 = vcombine.low %v533_v29, %v537_v31 }
 0x199   : > { %3693 = vmatprep.subr.bf16.mxu0 %v7064_v34  ;;  %v7318_v34 = vcombine.high %v724_v27, %v728_v28  ;;  %v7317_v41 = vcombine.low %v724_v27, %v728_v28  ;;  %v589_v27 = vld [vmem:[#allocation6 + $0x3d0] sm:$0xff] }
 0x19a   : > { %3551 = vmatpush1.bf16.msra.mxu1 %v7253_v37  ;;  %v736_v37 = vld [vmem:[#allocation6 + $0x868] sm:$0xff] }
 0x19b   : > { %3461 = vmatmul.mubr.bf16.vlgmr.msra.gmra.mrb[0].mxu0 %v8193_v33  ;;  %3552 = vmatprep.subr.bf16.mxu1 %v7262_v39  ;;  %v7119_v33 = vcombine.low %v525_v19, %v529_v22  ;;  %v7128_v39 = vcombine.high %v533_v29, %v537_v31  ;;  %v7325_v50 = vcombine.low %v732_v35, %v736_v37  ;;  %v585_v19 = vld [vmem:[#allocation6 + $0x3b0] sm:$0xff] }
 0x19c   : > { %3694 = vmatpush1.bf16.msra.mxu0 %v7063_v38  ;;  %3470 = vmatprep.mubr.bf16.mxu0 %v9027_v21  ;;  %v541_v38 = vld [vmem:[#allocation6 + $0x250] sm:$0xff]  ;;  %v7167_v22 = vcombine.low %v573_v8, %v577_v10  ;;  %v7176_v28 = vcombine.high %v581_v17, %v585_v19  ;;  %v7175_v31 = vcombine.low %v581_v17, %v585_v19  ;;  %v832_v17 = vld [vmem:[#allocation6 + $0xb68] sm:$0xff] }
 0x19d   : > { %3695 = vmatprep.subr.bf16.mxu0 %v7072_v43  ;;  %v7326_v43 = vcombine.high %v732_v35, %v736_v37  ;;  %v593_v29 = vld [vmem:[#allocation6 + $0x3f0] sm:$0xff] }
 0x19e   : > { %3553 = vmatpush1.bf16.msra.mxu1 %v7261_v45  ;;  %v744_v45 = vld [vmem:[#allocation6 + $0x8a8] sm:$0xff]  ;;  %v597_v35 = vld [vmem:[#allocation6 + $0x410] sm:$0xff]  ;;  %v7184_v37 = vcombine.high %v589_v27, %v593_v29 }
 0x19f   : > { %3554 = vmatprep.subr.bf16.mxu1 %v7270_v47  ;;  %v7136_v47 = vcombine.high %v541_v38, %v545_v40  ;;  %v7334_v52 = vcombine.high %v740_v44, %v744_v45  ;;  %v7333_v24 = vcombine.low %v740_v44, %v744_v45  ;;  %v605_v44 = vld [vmem:[#allocation6 + $0x450] sm:$0xff] }
 0x1a0   : > { %3696 = vmatpush1.bf16.msra.mxu0 %v7071_v46  ;;  %v549_v46 = vld [vmem:[#allocation6 + $0x290] sm:$0xff] }
 0x1a1   : > { %3697 = vmatprep.subr.bf16.mxu0 %v7080_v51  ;;  %v7135_v51 = vcombine.low %v541_v38, %v545_v40  ;;  %v7144_v56 = vcombine.high %v549_v46, %v553_v48  ;;  %v601_v38 = vld [vmem:[#allocation6 + $0x430] sm:$0xff]  ;;  %v7183_v40 = vcombine.low %v589_v27, %v593_v29  ;;  %v836_v27 = vld [vmem:[#allocation6 + $0xb88] sm:$0xff] }
 0x1a2   : > { %3555 = vmatpush1.bf16.msra.mxu1 %v7269_v53  ;;  %v748_v53 = vld [vmem:[#allocation6 + $0x8c8] sm:$0xff]  ;;  %v7192_v45 = vcombine.high %v597_v35, %v601_v38  ;;  %v629_v8 = vld [vmem:[#allocation6 + $0x510] sm:$0xff] }
 0x1a3   : > { %3471 = vmatmul.mubr.bf16.gmra.mrb[4].mxu0 %v8194_v13  ;;  %3556 = vmatprep.subr.bf16.mxu1 %v7278_v55  ;;  %v9417_v13 = vld [vmem:[%s9351_s29 + $0x44] ss:$28 sps:$4 sm:$0xff]  }
 0x1a4   : > { %3698 = vmatpush1.bf16.msra.mxu0 %v7079_v54  ;;  %3725 = vmatprep.mubr.bf16.mxu0 %v8676_v4  ;;  %v752_v54 = vld [vmem:[#allocation6 + $0x8e8] sm:$0xff]  ;;  %v557_v55 = vld [vmem:[#allocation6 + $0x2d0] sm:$0xff] }
 0x1a5   : > { %3699 = vmatprep.subr.bf16.mxu0 %v7088_v59  ;;  %v7143_v59 = vcombine.low %v549_v46, %v553_v48  ;;  %v7342_v60 = vcombine.high %v748_v53, %v752_v54  ;;  %v7152_v0 = vcombine.high %v557_v55, %v561_v57  ;;  %v7151_v4 = vcombine.low %v557_v55, %v561_v57  ;;  %v609_v46 = vld [vmem:[#allocation6 + $0x470] sm:$0xff] }
 0x1a6   : > { %3557 = vmatpush1.bf16.msra.mxu1 %v7277_v61  ;;  %v756_v61 = vld [vmem:[#allocation6 + $0x908] sm:$0xff]  ;;  %v7191_v48 = vcombine.low %v597_v35, %v601_v38  ;;  %v617_v55 = vld [vmem:[#allocation6 + $0x4b0] sm:$0xff] }
 0x1a7   : > { %3558 = vmatprep.subr.bf16.mxu1 %v7286_v63  ;;  %v565_v63 = vld [vmem:[#allocation6 + $0x310] sm:$0xff]  ;;  %v848_v35 = vld [vmem:[#allocation6 + $0xbe8] sm:$0xff] }
 0x1a8   : > { %3700 = vmatpush1.bf16.msra.mxu0 %v7087_v62  ;;  %v760_v62 = vld [vmem:[#allocation6 + $0x928] sm:$0xff]  ;;  %v7160_v9 = vcombine.high %v565_v63, %v569_v36  ;;  %v7159_v12 = vcombine.low %v565_v63, %v569_v36  ;;  %v633_v10 = vld [vmem:[#allocation6 + $0x530] sm:$0xff] }
 0x1a9   : > { %3701 = vmatprep.subr.bf16.mxu0 %v7096_v3  ;;  %v7341_v3 = vcombine.low %v748_v53, %v752_v54  ;;  %v613_v53 = vld [vmem:[#allocation6 + $0x490] sm:$0xff]  ;;  %v7200_v54 = vcombine.high %v605_v44, %v609_v46  ;;  %v9433_v36 = vld [vmem:[%s9351_s29 + $0x3c] ss:$28 sps:$4 sm:$0xff]  }
 0x1aa   : > { %3559 = vmatpush1.bf16.msra.mxu1 %v7285_v5  ;;  %v7350_v5 = vcombine.high %v756_v61, %v760_v62  ;;  %v7208_v63 = vcombine.high %v613_v53, %v617_v55  ;;  %v637_v19 = vld [vmem:[#allocation6 + $0x550] sm:$0xff] }
 0x1ab   : > { %3560 = vmatprep.subr.bf16.mxu1 %v7294_v7  ;;  %v768_v7 = vld [vmem:[#allocation6 + $0x968] sm:$0xff]  ;;  %v645_v29 = vld [vmem:[#allocation6 + $0x590] sm:$0xff] }
 0x1ac   : > { %3702 = vmatpush1.bf16.msra.mxu0 %v7095_v6  ;;  %v764_v6 = vld [vmem:[#allocation6 + $0x948] sm:$0xff]  ;;  %v657_v38 = vld [vmem:[#allocation6 + $0x5f0] sm:$0xff] }
 0x1ad   : > { %3703 = vmatprep.subr.bf16.mxu0 %v7104_v11  ;;  %v7349_v11 = vcombine.low %v756_v61, %v760_v62  ;;  %v816_v61 = vld [vmem:[#allocation6 + $0xae8] sm:$0xff]  ;;  %v621_v62 = vld [vmem:[#allocation6 + $0x4d0] sm:$0xff] }
 0x1ae   : > { %3561 = vmatpush1.bf16.msra.mxu1 %v7293_v14  ;;  %v7358_v14 = vcombine.high %v764_v6, %v768_v7 }
 0x1af   : > { %3562 = vmatprep.subr.bf16.mxu1 %v7302_v16  ;;  %v776_v16 = vld [vmem:[#allocation6 + $0x9a8] sm:$0xff] }
 0x1b0   : > { %3704 = vmatpush1.bf16.msra.mxu0 %v7103_v15  ;;  %v772_v15 = vld [vmem:[#allocation6 + $0x988] sm:$0xff] }
 0x1b1   : > { %3705 = vmatprep.subr.bf16.mxu0 %v7112_v20  ;;  %v7357_v20 = vcombine.low %v764_v6, %v768_v7  ;;  %v820_v6 = vld [vmem:[#allocation6 + $0xb08] sm:$0xff] }
 0x1b2   : > { %3563 = vmatpush1.bf16.msra.mxu1 %v7301_v23  ;;  %v7366_v23 = vcombine.high %v772_v15, %v776_v16  ;;  %v824_v7 = vld [vmem:[#allocation6 + $0xb28] sm:$0xff] }
 0x1b3   : > { %3564 = vmatprep.subr.bf16.mxu1 %v7310_v26  ;;  %v784_v26 = vld [vmem:[#allocation6 + $0x9e8] sm:$0xff] }
 0x1b4   : > { %3706 = vmatpush1.bf16.msra.mxu0 %v7111_v25  ;;  %v780_v25 = vld [vmem:[#allocation6 + $0x9c8] sm:$0xff] }
 0x1b5   : > { %3707 = vmatprep.subr.bf16.mxu0 %v7120_v30  ;;  %v7365_v30 = vcombine.low %v772_v15, %v776_v16  ;;  %v7414_v15 = vcombine.high %v820_v6, %v824_v7  ;;  %v828_v16 = vld [vmem:[#allocation6 + $0xb48] sm:$0xff] }
 0x1b6   : > { %3565 = vmatpush1.bf16.msra.mxu1 %v7309_v32  ;;  %v7374_v32 = vcombine.high %v780_v25, %v784_v26 }
 0x1b7   : > { %3587 = vmatprep.subr.bf16.mxu1 %v7318_v34  ;;  %v792_v34 = vld [vmem:[#allocation6 + $0xa28] sm:$0xff] }
 0x1b8   : > { %3708 = vmatpush1.bf16.msra.mxu0 %v7119_v33  ;;  %v788_v33 = vld [vmem:[#allocation6 + $0xa08] sm:$0xff] }
 0x1b9   : > { %3709 = vmatprep.subr.bf16.mxu0 %v7128_v39  ;;  %3567 = vmatmul.mubr.bf16.vlgmr.msra.gmra.mrb[8].mxu1 %v9413_v49  ;;  %v7373_v39 = vcombine.low %v780_v25, %v784_v26  ;;  %v7422_v25 = vcombine.high %v828_v16, %v832_v17 }
 0x1ba   : > { %3588 = vmatpush1.bf16.msra.mxu1 %v7317_v41  ;;  %3576 = vmatprep.mubr.bf16.mxu1 %v9417_v13  ;;  %v7382_v41 = vcombine.high %v788_v33, %v792_v34 }
 0x1bb   : > { %3589 = vmatprep.subr.bf16.mxu1 %v7326_v43  ;;  %v800_v43 = vld [vmem:[#allocation6 + $0xa68] sm:$0xff] }
 0x1bc   : > { %3710 = vmatpush1.bf16.msra.mxu0 %v7127_v42  ;;  %v796_v42 = vld [vmem:[#allocation6 + $0xa48] sm:$0xff] }
 0x1bd   : > { %3711 = vmatprep.subr.bf16.mxu0 %v7136_v47  ;;  %v7381_v47 = vcombine.low %v788_v33, %v792_v34  ;;  %v7389_v57 = vcombine.low %v796_v42, %v800_v43  ;;  %v844_v34 = vld [vmem:[#allocation6 + $0xbc8] sm:$0xff] }
 0x1be   : > { %3590 = vmatpush1.bf16.msra.mxu1 %v7325_v50  ;;  %v7390_v50 = vcombine.high %v796_v42, %v800_v43  ;;  %v852_v43 = vld [vmem:[#allocation6 + $0xc08] sm:$0xff] }
 0x1bf   : > { %3591 = vmatprep.subr.bf16.mxu1 %v7334_v52  ;;  %v808_v52 = vld [vmem:[#allocation6 + $0xaa8] sm:$0xff] }
 0x1c0   : > { %3712 = vmatpush1.bf16.msra.mxu0 %v7135_v51  ;;  %v804_v51 = vld [vmem:[#allocation6 + $0xa88] sm:$0xff] }
 0x1c1   : > { %3713 = vmatprep.subr.bf16.mxu0 %v7144_v56  ;;  %3577 = vmatmul.mubr.bf16.gmra.mrb[12].mxu1 %v9421_v2  ;;  %v9429_v56 = vld [vmem:[%s9351_s29] ss:$28 sps:$4 sm:$0xff]  }
 0x1c2   : > { %3592 = vmatpush1.bf16.msra.mxu1 %v7333_v24  ;;  %3619 = vmatprep.mubr.bf16.mxu1 %v9425_v58  ;;  %v7199_v24 = vcombine.low %v605_v44, %v609_v46  ;;  %v856_v44 = vld [vmem:[#allocation6 + $0xc28] sm:$0xff]  ;;  %v665_v46 = vld [vmem:[#allocation6 + $0x630] sm:$0xff] }
 0x1c3   : > { %3593 = vmatprep.subr.bf16.mxu1 %v7342_v60  ;;  %v812_v60 = vld [vmem:[#allocation6 + $0xac8] sm:$0xff] }
 0x1c4   : > { %3714 = vmatpush1.bf16.msra.mxu0 %v7143_v59  ;;  %v7398_v59 = vcombine.high %v804_v51, %v808_v52 }
 0x1c5   : > { %3715 = vmatprep.subr.bf16.mxu0 %v7152_v0  ;;  %v625_v0 = vld [vmem:[#allocation6 + $0x4f0] sm:$0xff] }
 0x1c6   : > { %3594 = vmatpush1.bf16.msra.mxu1 %v7341_v3  ;;  %v7397_v3 = vcombine.low %v804_v51, %v808_v52  ;;  %v860_v52 = vld [vmem:[#allocation6 + $0xc48] sm:$0xff] }
 0x1c7   : > { %3595 = vmatprep.subr.bf16.mxu1 %v7350_v5  ;;  %v7406_v5 = vcombine.high %v812_v60, %v816_v61 }
 0x1c8   : > { %3716 = vmatpush1.bf16.msra.mxu0 %v7151_v4  ;;  %v7207_v4 = vcombine.low %v613_v53, %v617_v55  ;;  %v864_v53 = vld [vmem:[#allocation6 + $0xc68] sm:$0xff]  ;;  %v673_v55 = vld [vmem:[#allocation6 + $0x670] sm:$0xff] }
 0x1c9   : > { %3717 = vmatprep.subr.bf16.mxu0 %v7160_v9  ;;  %v7216_v9 = vcombine.high %v621_v62, %v625_v0 }
 0x1ca   : > { %3596 = vmatpush1.bf16.msra.mxu1 %v7349_v11  ;;  %v7405_v11 = vcombine.low %v812_v60, %v816_v61  ;;  %v868_v61 = vld [vmem:[#allocation6 + $0xc88] sm:$0xff] }
 0x1cb   : > { %3597 = vmatprep.subr.bf16.mxu1 %v7358_v14  ;;  %v7215_v14 = vcombine.low %v621_v62, %v625_v0  ;;  %v872_v62 = vld [vmem:[#allocation6 + $0xca8] sm:$0xff]  ;;  %v677_v0 = vld [vmem:[#allocation6 + $0x690] sm:$0xff] }
 0x1cc   : > { %3718 = vmatpush1.bf16.msra.mxu0 %v7159_v12  ;;  %v9437_v12 = vld [vmem:[%s9351_s29 + $0x38] ss:$28 sps:$4 sm:$0xff]  }
 0x1cd   : > { %3719 = vmatprep.subr.bf16.mxu0 %v7168_v18  ;;  %v7224_v18 = vcombine.high %v629_v8, %v633_v10 }
 0x1ce   : > { %3598 = vmatpush1.bf16.msra.mxu1 %v7357_v20  ;;  %v641_v20 = vld [vmem:[#allocation6 + $0x570] sm:$0xff] }
 0x1cf   : > { %3599 = vmatprep.subr.bf16.mxu1 %v7366_v23  ;;  %v7223_v23 = vcombine.low %v629_v8, %v633_v10  ;;  %v7232_v26 = vcombine.high %v637_v19, %v641_v20  ;;  %v880_v10 = vld [vmem:[#allocation6 + $0xce8] sm:$0xff] }
 0x1d0   : > { %3720 = vmatpush1.bf16.msra.mxu0 %v7167_v22  ;;  %v7413_v22 = vcombine.low %v820_v6, %v824_v7  ;;  %v7462_v7 = vcombine.high %v868_v61, %v872_v62 }
 0x1d1   : > { %3721 = vmatprep.subr.bf16.mxu0 %v7176_v28  ;;  %v840_v28 = vld [vmem:[#allocation6 + $0xba8] sm:$0xff] }
 0x1d2   : > { %3600 = vmatpush1.bf16.msra.mxu1 %v7365_v30  ;;  %v649_v30 = vld [vmem:[#allocation6 + $0x5b0] sm:$0xff]  ;;  %v7430_v33 = vcombine.high %v836_v27, %v840_v28 }
 0x1d3   : > { %3601 = vmatprep.subr.bf16.mxu1 %v7374_v32  ;;  %v7231_v32 = vcombine.low %v637_v19, %v641_v20  ;;  %v884_v19 = vld [vmem:[#allocation6 + $0xd08] sm:$0xff] }
 0x1d4   : > { %3722 = vmatpush1.bf16.msra.mxu0 %v7175_v31  ;;  %v7421_v31 = vcombine.low %v828_v16, %v832_v17  ;;  %v888_v20 = vld [vmem:[#allocation6 + $0xd28] sm:$0xff] }
 0x1d5   : > { %3723 = vmatprep.subr.bf16.mxu0 %v7184_v37  ;;  %v653_v37 = vld [vmem:[#allocation6 + $0x5d0] sm:$0xff] }
 0x1d6   : > { %3602 = vmatpush1.bf16.msra.mxu1 %v7373_v39  ;;  %v7429_v39 = vcombine.low %v836_v27, %v840_v28  ;;  %v7248_v42 = vcombine.high %v653_v37, %v657_v38  ;;  %v7478_v28 = vcombine.high %v884_v19, %v888_v20 }
 0x1d7   : > { %3603 = vmatprep.subr.bf16.mxu1 %v7382_v41  ;;  %v7438_v41 = vcombine.high %v844_v34, %v848_v35 }
 0x1d8   : > { %3724 = vmatpush1.bf16.msra.mxu0 %v7183_v40  ;;  %v7239_v40 = vcombine.low %v645_v29, %v649_v30 }
 0x1d9   : > { %3746 = vmatprep.subr.bf16.mxu0 %v7192_v45  ;;  %v661_v45 = vld [vmem:[#allocation6 + $0x610] sm:$0xff] }
 0x1da   : > { %3604 = vmatpush1.bf16.msra.mxu1 %v7381_v47  ;;  %v7437_v47 = vcombine.low %v844_v34, %v848_v35  ;;  %v7256_v51 = vcombine.high %v661_v45, %v665_v46 }
 0x1db   : > { %3726 = vmatmul.mubr.bf16.vlgmr.msra.gmra.mrb[8].mxu0 %v9429_v56  ;;  %3605 = vmatprep.subr.bf16.mxu1 %v7390_v50  ;;  %v7446_v50 = vcombine.high %v852_v43, %v856_v44 }
 0x1dc   : > { %3747 = vmatpush1.bf16.msra.mxu0 %v7191_v48  ;;  %3735 = vmatprep.mubr.bf16.mxu0 %v9433_v36  ;;  %v7247_v48 = vcombine.low %v653_v37, %v657_v38  ;;  %v900_v38 = vld [vmem:[#allocation6 + $0xd88] sm:$0xff] }
 0x1dd   : > { %3748 = vmatprep.subr.bf16.mxu0 %v7200_v54  ;;  %v669_v54 = vld [vmem:[#allocation6 + $0x650] sm:$0xff] }
 0x1de   : > { %3606 = vmatpush1.bf16.msra.mxu1 %v7389_v57  ;;  %v7445_v57 = vcombine.low %v852_v43, %v856_v44  ;;  %v7264_v60 = vcombine.high %v669_v54, %v673_v55  ;;  %v7263_v6 = vcombine.low %v669_v54, %v673_v55 }
 0x1df   : > { %3607 = vmatprep.subr.bf16.mxu1 %v7398_v59  ;;  %v7454_v59 = vcombine.high %v860_v52, %v864_v53 }
 0x1e0   : > { %3749 = vmatpush1.bf16.msra.mxu0 %v7199_v24  ;;  %v7255_v24 = vcombine.low %v661_v45, %v665_v46 }
 0x1e1   : > { %3750 = vmatprep.subr.bf16.mxu0 %v7208_v63  ;;  %v9442_v63 = vld [vmem:[%s9351_s29 + $0x10] ss:$28 sps:$4 sm:$0xff]  }
 0x1e2   : > { %3608 = vmatpush1.bf16.msra.mxu1 %v7397_v3  ;;  %v681_v3 = vld [vmem:[#allocation6 + $0x6b0] sm:$0xff] }
 0x1e3   : > { %3736 = vmatmul.mubr.bf16.gmra.mrb[12].mxu0 %v9437_v12  ;;  %3609 = vmatprep.subr.bf16.mxu1 %v7406_v5  ;;  %v9446_v5 = vld [vmem:[%s9351_s29 + $0x4c] ss:$28 sps:$4 sm:$0xff]   ;;  %v7272_v8 = vcombine.high %v677_v0, %v681_v3  ;;  %v7271_v16 = vcombine.low %v677_v0, %v681_v3  ;;  %v729_v0 = vld [vmem:[#allocation6 + $0x830] sm:$0xff] }
 0x1e4   : > { %3751 = vmatpush1.bf16.msra.mxu0 %v7207_v4  ;;  %3778 = vmatprep.mubr.bf16.mxu0 %v9405_v1  ;;  %v7240_v1 = vcombine.high %v645_v29, %v649_v30  ;;  %v7453_v4 = vcombine.low %v860_v52, %v864_v53  ;;  %v892_v30 = vld [vmem:[#allocation6 + $0xd48] sm:$0xff]  ;;  %v721_v52 = vld [vmem:[#allocation6 + $0x7f0] sm:$0xff] }
 0x1e5   : > { %3752 = vmatprep.subr.bf16.mxu0 %v7216_v9  ;;  %v876_v9 = vld [vmem:[#allocation6 + $0xcc8] sm:$0xff] }
 0x1e6   : > { %3610 = vmatpush1.bf16.msra.mxu1 %v7405_v11  ;;  %v685_v11 = vld [vmem:[#allocation6 + $0x6d0] sm:$0xff]  ;;  %v7470_v17 = vcombine.high %v876_v9, %v880_v10 }
 0x1e7   : > { %3611 = vmatprep.subr.bf16.mxu1 %v7414_v15  ;;  %v7461_v15 = vcombine.low %v868_v61, %v872_v62  ;;  %v474_v61 = vld [vmem:[#allocation6 + $0x38] sm:$0xff]  ;;  %v725_v62 = vld [vmem:[#allocation6 + $0x810] sm:$0xff] }
 0x1e8   : > { %3753 = vmatpush1.bf16.msra.mxu0 %v7215_v14  ;;  %v689_v14 = vld [vmem:[#allocation6 + $0x6f0] sm:$0xff] }
 0x1e9   : > { %3754 = vmatprep.subr.bf16.mxu0 %v7224_v18  ;;  %v7280_v18 = vcombine.high %v685_v11, %v689_v14  ;;  %v7279_v27 = vcombine.low %v685_v11, %v689_v14  ;;  %v733_v11 = vld [vmem:[#allocation6 + $0x850] sm:$0xff] }
 0x1ea   : > { %3612 = vmatpush1.bf16.msra.mxu1 %v7413_v22  ;;  %v693_v22 = vld [vmem:[#allocation6 + $0x710] sm:$0xff] }
 0x1eb   : > { %3613 = vmatprep.subr.bf16.mxu1 %v7422_v25  ;;  %v9450_v25 = vld [vmem:[%s9351_s29 + $0x48] ss:$28 sps:$4 sm:$0xff]  }
 0x1ec   : > { %3755 = vmatpush1.bf16.msra.mxu0 %v7223_v23  ;;  %v697_v23 = vld [vmem:[#allocation6 + $0x730] sm:$0xff] }
 0x1ed   : > { %3756 = vmatprep.subr.bf16.mxu0 %v7232_v26  ;;  %v7469_v26 = vcombine.low %v876_v9, %v880_v10  ;;  %v7288_v29 = vcombine.high %v693_v22, %v697_v23  ;;  %v7287_v34 = vcombine.low %v693_v22, %v697_v23  ;;  %v482_v9 = vld [vmem:[#allocation6 + $0x78] sm:$0xff]  ;;  %v737_v14 = vld [vmem:[#allocation6 + $0x870] sm:$0xff] }
 0x1ee   : > { %3614 = vmatpush1.bf16.msra.mxu1 %v7421_v31  ;;  %v896_v31 = vld [vmem:[#allocation6 + $0xd68] sm:$0xff]  ;;  %v7328_v22 = vcombine.high %v733_v11, %v737_v14  ;;  %v486_v23 = vld [vmem:[#allocation6 + $0x98] sm:$0xff] }
 0x1ef   : > { %3615 = vmatprep.subr.bf16.mxu1 %v7430_v33  ;;  %v705_v33 = vld [vmem:[#allocation6 + $0x770] sm:$0xff]  ;;  %v7486_v35 = vcombine.high %v892_v30, %v896_v31 }
 0x1f0   : > { %3757 = vmatpush1.bf16.msra.mxu0 %v7231_v32  ;;  %v701_v32 = vld [vmem:[#allocation6 + $0x750] sm:$0xff] }
 0x1f1   : > { %3758 = vmatprep.subr.bf16.mxu0 %v7240_v1  ;;  %v7477_v1 = vcombine.low %v884_v19, %v888_v20  ;;  %v7296_v37 = vcombine.high %v701_v32, %v705_v33  ;;  %v7295_v43 = vcombine.low %v701_v32, %v705_v33 }
 0x1f2   : > { %3616 = vmatpush1.bf16.msra.mxu1 %v7429_v39  ;;  %v904_v39 = vld [vmem:[#allocation6 + $0xda8] sm:$0xff] }
 0x1f3   : > { %3617 = vmatprep.subr.bf16.mxu1 %v7438_v41  ;;  %v713_v41 = vld [vmem:[#allocation6 + $0x7b0] sm:$0xff]  ;;  %v7494_v44 = vcombine.high %v900_v38, %v904_v39  ;;  %v7493_v54 = vcombine.low %v900_v38, %v904_v39 }
 0x1f4   : > { %3759 = vmatpush1.bf16.msra.mxu0 %v7239_v40  ;;  %v709_v40 = vld [vmem:[#allocation6 + $0x790] sm:$0xff] }
 0x1f5   : > { %3760 = vmatprep.subr.bf16.mxu0 %v7248_v42  ;;  %v7485_v42 = vcombine.low %v892_v30, %v896_v31  ;;  %v7304_v46 = vcombine.high %v709_v40, %v713_v41  ;;  %v7327_v31 = vcombine.low %v733_v11, %v737_v14  ;;  %v526_v11 = vld [vmem:[#allocation6 + $0x1d8] sm:$0xff] }
 0x1f6   : > { %3618 = vmatpush1.bf16.msra.mxu1 %v7437_v47  ;;  %v908_v47 = vld [vmem:[#allocation6 + $0xdc8] sm:$0xff]  ;;  %v530_v14 = vld [vmem:[#allocation6 + $0x1f8] sm:$0xff] }
 0x1f7   : > { %3640 = vmatprep.subr.bf16.mxu1 %v7446_v50 }
 0x1f8   : > { %3761 = vmatpush1.bf16.msra.mxu0 %v7247_v48  ;;  %v912_v48 = vld [vmem:[#allocation6 + $0xde8] sm:$0xff] }
 0x1f9   : > { %3762 = vmatprep.subr.bf16.mxu0 %v7256_v51  ;;  %3620 = vmatmul.mubr.bf16.vlgmr.msra.gmra.mrb[8].mxu1 %v9442_v63  ;;  %v717_v51 = vld [vmem:[#allocation6 + $0x7d0] sm:$0xff]  ;;  %v7501_v3 = vcombine.low %v908_v47, %v912_v48 }
 0x1fa   : > { %3641 = vmatpush1.bf16.msra.mxu1 %v7445_v57  ;;  %3629 = vmatprep.mubr.bf16.mxu1 %v9446_v5  ;;  %v7303_v57 = vcombine.low %v709_v40, %v713_v41  ;;  %v502_v41 = vld [vmem:[#allocation6 + $0x118] sm:$0xff] }
 0x1fb   : > { %3642 = vmatprep.subr.bf16.mxu1 %v7454_v59  ;;  %v7312_v59 = vcombine.high %v717_v51, %v721_v52 }
 0x1fc   : > { %3763 = vmatpush1.bf16.msra.mxu0 %v7255_v24  ;;  %v7502_v24 = vcombine.high %v908_v47, %v912_v48 }
 0x1fd   : > { %3764 = vmatprep.subr.bf16.mxu0 %v7264_v60  ;;  %v470_v60 = vld [vmem:[#allocation6 + $0x18] sm:$0xff] }
 0x1fe   : > { %3643 = vmatpush1.bf16.msra.mxu1 %v7453_v4  ;;  %v7311_v4 = vcombine.low %v717_v51, %v721_v52  ;;  %v510_v52 = vld [vmem:[#allocation6 + $0x158] sm:$0xff] }
 0x1ff   : > { %3644 = vmatprep.subr.bf16.mxu1 %v7462_v7  ;;  %v7320_v7 = vcombine.high %v725_v62, %v729_v0 }
 0x200   : > { %3765 = vmatpush1.bf16.msra.mxu0 %v7263_v6  ;;  %v7066_v6 = vcombine.high %v470_v60, %v474_v61 }
 0x201   : > { %3766 = vmatprep.subr.bf16.mxu0 %v7272_v8  ;;  %3630 = vmatmul.mubr.bf16.gmra.mrb[12].mxu1 %v9450_v25  ;;  %v478_v8 = vld [vmem:[#allocation6 + $0x58] sm:$0xff] }
 0x202   : > { %3645 = vmatpush1.bf16.msra.mxu1 %v7461_v15  ;;  %3672 = vmatprep.mubr.bf16.mxu1 %v9027_v21  ;;  %v7074_v19 = vcombine.high %v478_v8, %v482_v9  ;;  %v7073_v30 = vcombine.low %v478_v8, %v482_v9 }
 0x203   : > { %3646 = vmatprep.subr.bf16.mxu1 %v7470_v17 }
 0x204   : > { %3767 = vmatpush1.bf16.msra.mxu0 %v7271_v16  ;;  %v7065_v16 = vcombine.low %v470_v60, %v474_v61 }
 0x205   : > { %3768 = vmatprep.subr.bf16.mxu0 %v7280_v18  ;;  %v7319_v18 = vcombine.low %v725_v62, %v729_v0  ;;  %v518_v0 = vld [vmem:[#allocation6 + $0x198] sm:$0xff] }
 0x206   : > { %3647 = vmatpush1.bf16.msra.mxu1 %v7469_v26  ;;  %v490_v26 = vld [vmem:[#allocation6 + $0xb8] sm:$0xff] }
 0x207   : > { %3648 = vmatprep.subr.bf16.mxu1 %v7478_v28  ;;  %v741_v28 = vld [vmem:[#allocation6 + $0x890] sm:$0xff]  ;;  %v7082_v32 = vcombine.high %v486_v23, %v490_v26  ;;  %v7081_v38 = vcombine.low %v486_v23, %v490_v26  ;;  %v7122_v23 = vcombine.high %v526_v11, %v530_v14 }
 0x208   : > { %3769 = vmatpush1.bf16.msra.mxu0 %v7279_v27  ;;  %v9471_v27 = vld [vmem:[%s9351_s29 + $0x18] ss:$28 sps:$4 sm:$0xff]  }
 0x209   : > { %3770 = vmatprep.subr.bf16.mxu0 %v7288_v29  ;;  %v745_v29 = vld [vmem:[#allocation6 + $0x8b0] sm:$0xff] }
 0x20a   : > { %3649 = vmatpush1.bf16.msra.mxu1 %v7477_v1  ;;  %v7336_v33 = vcombine.high %v741_v28, %v745_v29  ;;  %v494_v1 = vld [vmem:[#allocation6 + $0xd8] sm:$0xff] }
 0x20b   : > { %3650 = vmatprep.subr.bf16.mxu1 %v7486_v35  ;;  %v749_v35 = vld [vmem:[#allocation6 + $0x8d0] sm:$0xff] }
 0x20c   : > { %3771 = vmatpush1.bf16.msra.mxu0 %v7287_v34  ;;  %v9454_v45 = vpop.f32.mrb[0].mxu1  ;;  %v498_v34 = vld [vmem:[#allocation6 + $0xf8] sm:$0xff] }
 0x20d   : > { %3772 = vmatprep.subr.bf16.mxu0 %v7296_v37  ;;  %v9456_v50 = vpop.f32.mrb[1].mxu1  ;;  %v753_v37 = vld [vmem:[#allocation6 + $0x8f0] sm:$0xff]  ;;  %v7090_v39 = vcombine.high %v494_v1, %v498_v34  ;;  %v7089_v47 = vcombine.low %v494_v1, %v498_v34 }
 0x20e   : > { %v9458_v53 = vpop.f32.mrb[2].mxu1  ;;  %3651 = vmatpush1.bf16.msra.mxu1 %v7485_v42  ;;  %v7344_v40 = vcombine.high %v749_v35, %v753_v37  ;;  %v506_v42 = vld [vmem:[#allocation6 + $0x138] sm:$0xff] }
 0x20f   : > { %v9460_v55 = vpop.f32.mrb[3].mxu1  ;;  %3652 = vmatprep.subr.bf16.mxu1 %v7494_v44  ;;  %v757_v44 = vld [vmem:[#allocation6 + $0x910] sm:$0xff]  ;;  %v7098_v48 = vcombine.high %v502_v41, %v506_v42  ;;  %v7097_v60 = vcombine.low %v502_v41, %v506_v42 }
 0x210   : > { %3773 = vmatpush1.bf16.msra.mxu0 %v7295_v43  ;;  %v9478_v43 = vld [vmem:[%s9351_s29 + $0x50] ss:$28 sps:$4 sm:$0xff]  }
 0x211   : > { %3774 = vmatprep.subr.bf16.mxu0 %v7304_v46  ;;  %v761_v46 = vld [vmem:[#allocation6 + $0x930] sm:$0xff] }
 0x212   : > { %3653 = vmatpush1.bf16.msra.mxu1 %v7493_v54  ;;  %v7352_v51 = vcombine.high %v757_v44, %v761_v46  ;;  %v514_v54 = vld [vmem:[#allocation6 + $0x178] sm:$0xff]  ;;  %v7351_v61 = vcombine.low %v757_v44, %v761_v46 }
 0x213   : > { %3654 = vmatprep.subr.bf16.mxu1 %v7502_v24  ;;  %v769_v24 = vld [vmem:[#allocation6 + $0x970] sm:$0xff]  ;;  %v550_v44 = vld [vmem:[#allocation6 + $0x298] sm:$0xff] }
 0x214   : > { %3775 = vmatpush1.bf16.msra.mxu0 %v7303_v57  ;;  %v9462_v10 = vpop.f32.mrb[4].mxu1  ;;  %v765_v57 = vld [vmem:[#allocation6 + $0x950] sm:$0xff]  ;;  %v554_v46 = vld [vmem:[#allocation6 + $0x2b8] sm:$0xff] }
 0x215   : > { %3776 = vmatprep.subr.bf16.mxu0 %v7312_v59  ;;  %v9464_v15 = vpop.f32.mrb[5].mxu1  ;;  %v8689_v59 = vld [vmem:[%s9351_s29 + $0x4] ss:$28 sps:$4 sm:$0xff]   ;;  %v7360_v62 = vcombine.high %v765_v57, %v769_v24 }
 0x216   : > { %3655 = vmatpush1.bf16.msra.mxu1 %v7501_v3  ;;  %v9466_v17 = vpop.f32.mrb[6].mxu1  ;;  %v522_v3 = vld [vmem:[#allocation6 + $0x1b8] sm:$0xff] }
 0x217   : > { %3905 = vmatprep.subr.bf16.mxu1 %v7066_v6  ;;  %v9468_v20 = vpop.f32.mrb[7].mxu1  ;;  %v777_v6 = vld [vmem:[#allocation6 + $0x9b0] sm:$0xff]  ;;  %v7114_v8 = vcombine.high %v518_v0, %v522_v3 }
 0x218   : > { %3777 = vmatpush1.bf16.msra.mxu0 %v7311_v4  ;;  %v773_v4 = vld [vmem:[#allocation6 + $0x990] sm:$0xff] }
 0x219   : > { %3799 = vmatprep.subr.bf16.mxu0 %v7320_v7  ;;  %3673 = vmatmul.mubr.bf16.vlgmr.msra.gmra.mrb[8].mxu1 %v9471_v27  ;;  %v7105_v7 = vcombine.low %v510_v52, %v514_v54  ;;  %v7368_v9 = vcombine.high %v773_v4, %v777_v6 }
 0x21a   : > { %3906 = vmatpush1.bf16.msra.mxu1 %v7065_v16  ;;  %3682 = vmatprep.mubr.bf16.mxu1 %v9027_v21  ;;  %v781_v16 = vld [vmem:[#allocation6 + $0x9d0] sm:$0xff] }
 0x21b   : > { %3779 = vmatmul.mubr.bf16.vlgmr.msra.gmra.mrb[8].mxu0 %v9413_v49  ;;  %3907 = vmatprep.subr.bf16.mxu1 %v7074_v19  ;;  %v7335_v49 = vcombine.low %v741_v28, %v745_v29  ;;  %v7113_v19 = vcombine.low %v518_v0, %v522_v3  ;;  %v534_v28 = vld [vmem:[#allocation6 + $0x218] sm:$0xff] }
 0x21c   : > { %3800 = vmatpush1.bf16.msra.mxu0 %v7319_v18  ;;  %3788 = vmatprep.mubr.bf16.mxu0 %v9417_v13  ;;  %v7343_v13 = vcombine.low %v749_v35, %v753_v37  ;;  %v785_v18 = vld [vmem:[#allocation6 + $0x9f0] sm:$0xff]  ;;  %v538_v29 = vld [vmem:[#allocation6 + $0x238] sm:$0xff] }
 0x21d   : > { %3801 = vmatprep.subr.bf16.mxu0 %v7328_v22  ;;  %v7367_v22 = vcombine.low %v773_v4, %v777_v6  ;;  %v7376_v26 = vcombine.high %v781_v16, %v785_v18  ;;  %v7130_v1 = vcombine.high %v534_v28, %v538_v29  ;;  %v542_v35 = vld [vmem:[#allocation6 + $0x258] sm:$0xff]  ;;  %v821_v6 = vld [vmem:[#allocation6 + $0xb10] sm:$0xff] }
 0x21e   : > { %3908 = vmatpush1.bf16.msra.mxu1 %v7073_v30  ;;  %v789_v30 = vld [vmem:[#allocation6 + $0xa10] sm:$0xff]  ;;  %v546_v37 = vld [vmem:[#allocation6 + $0x278] sm:$0xff] }
 0x21f   : > { %3909 = vmatprep.subr.bf16.mxu1 %v7082_v32  ;;  %v7121_v32 = vcombine.low %v526_v11, %v530_v14  ;;  %v7138_v41 = vcombine.high %v542_v35, %v546_v37  ;;  %v566_v3 = vld [vmem:[#allocation6 + $0x318] sm:$0xff] }
 0x220   : > { %3802 = vmatpush1.bf16.msra.mxu0 %v7327_v31  ;;  %v793_v31 = vld [vmem:[#allocation6 + $0xa30] sm:$0xff]  ;;  %v570_v4 = vld [vmem:[#allocation6 + $0x338] sm:$0xff] }
 0x221   : > { %3803 = vmatprep.subr.bf16.mxu0 %v7336_v33  ;;  %3683 = vmatmul.mubr.bf16.gmra.mrb[12].mxu1 %v9478_v43  ;;  %v7375_v33 = vcombine.low %v781_v16, %v785_v18  ;;  %v7384_v34 = vcombine.high %v789_v30, %v793_v31  ;;  %v574_v14 = vld [vmem:[#allocation6 + $0x358] sm:$0xff]  ;;  %v829_v18 = vld [vmem:[#allocation6 + $0xb50] sm:$0xff] }
 0x222   : > { %3910 = vmatpush1.bf16.msra.mxu1 %v7081_v38  ;;  %3937 = vmatprep.mubr.bf16.mxu1 %v8689_v59  ;;  %v797_v38 = vld [vmem:[#allocation6 + $0xa50] sm:$0xff]  ;;  %v578_v16 = vld [vmem:[#allocation6 + $0x378] sm:$0xff] }
 0x223   : > { %3789 = vmatmul.mubr.bf16.gmra.mrb[12].mxu0 %v9421_v2  ;;  %3911 = vmatprep.subr.bf16.mxu1 %v7090_v39  ;;  %v7106_v2 = vcombine.high %v510_v52, %v514_v54  ;;  %v7129_v39 = vcombine.low %v534_v28, %v538_v29  ;;  %v7146_v52 = vcombine.high %v550_v44, %v554_v46  ;;  %v813_v59 = vld [vmem:[#allocation6 + $0xad0] sm:$0xff]  ;;  %v582_v29 = vld [vmem:[#allocation6 + $0x398] sm:$0xff] }
 0x224   : > { %3804 = vmatpush1.bf16.msra.mxu0 %v7335_v49  ;;  %3831 = vmatprep.mubr.bf16.mxu0 %v9425_v58  ;;  %v7359_v58 = vcombine.low %v765_v57, %v769_v24  ;;  %v801_v49 = vld [vmem:[#allocation6 + $0xa70] sm:$0xff]  ;;  %v558_v57 = vld [vmem:[#allocation6 + $0x2d8] sm:$0xff] }
 0x225   : > { %3805 = vmatprep.subr.bf16.mxu0 %v7344_v40  ;;  %v7383_v40 = vcombine.low %v789_v30, %v793_v31  ;;  %v7392_v42 = vcombine.high %v797_v38, %v801_v49  ;;  %v562_v24 = vld [vmem:[#allocation6 + $0x2f8] sm:$0xff]  ;;  %v837_v31 = vld [vmem:[#allocation6 + $0xb90] sm:$0xff] }
 0x226   : > { %3912 = vmatpush1.bf16.msra.mxu1 %v7089_v47  ;;  %v805_v47 = vld [vmem:[#allocation6 + $0xa90] sm:$0xff]  ;;  %v586_v30 = vld [vmem:[#allocation6 + $0x3b8] sm:$0xff] }
 0x227   : > { %3913 = vmatprep.subr.bf16.mxu1 %v7098_v48  ;;  %v7137_v48 = vcombine.low %v542_v35, %v546_v37  ;;  %v590_v37 = vld [vmem:[#allocation6 + $0x3d8] sm:$0xff] }
 0x228   : > { %3806 = vmatpush1.bf16.msra.mxu0 %v7343_v13  ;;  %v809_v13 = vld [vmem:[#allocation6 + $0xab0] sm:$0xff] }
 0x229   : > { %3807 = vmatprep.subr.bf16.mxu0 %v7352_v51  ;;  %v7391_v51 = vcombine.low %v797_v38, %v801_v49  ;;  %v7400_v54 = vcombine.high %v805_v47, %v809_v13  ;;  %v594_v38 = vld [vmem:[#allocation6 + $0x3f8] sm:$0xff]  ;;  %v845_v49 = vld [vmem:[#allocation6 + $0xbd0] sm:$0xff] }
 0x22a   : > { %3914 = vmatpush1.bf16.msra.mxu1 %v7097_v60  ;;  %v817_v60 = vld [vmem:[#allocation6 + $0xaf0] sm:$0xff] }
 0x22b   : > { %3915 = vmatprep.subr.bf16.mxu1 %v7106_v2  ;;  %v7399_v2 = vcombine.low %v805_v47, %v809_v13  ;;  %v7408_v0 = vcombine.high %v813_v59, %v817_v60  ;;  %v602_v47 = vld [vmem:[#allocation6 + $0x438] sm:$0xff]  ;;  %v853_v13 = vld [vmem:[#allocation6 + $0xc10] sm:$0xff] }
 0x22c   : > { %3808 = vmatpush1.bf16.msra.mxu0 %v7351_v61  ;;  %v7145_v61 = vcombine.low %v550_v44, %v554_v46  ;;  %v598_v46 = vld [vmem:[#allocation6 + $0x418] sm:$0xff] }
 0x22d   : > { %3809 = vmatprep.subr.bf16.mxu0 %v7360_v62  ;;  %v7154_v62 = vcombine.high %v558_v57, %v562_v24 }
 0x22e   : > { %3916 = vmatpush1.bf16.msra.mxu1 %v7105_v7  ;;  %v825_v7 = vld [vmem:[#allocation6 + $0xb30] sm:$0xff] }
 0x22f   : > { %3917 = vmatprep.subr.bf16.mxu1 %v7114_v8  ;;  %v7407_v8 = vcombine.low %v813_v59, %v817_v60  ;;  %v7416_v11 = vcombine.high %v821_v6, %v825_v7  ;;  %v610_v59 = vld [vmem:[#allocation6 + $0x478] sm:$0xff]  ;;  %v861_v60 = vld [vmem:[#allocation6 + $0xc50] sm:$0xff] }
 0x230   : > { %3810 = vmatpush1.bf16.msra.mxu0 %v7359_v58  ;;  %v7153_v58 = vcombine.low %v558_v57, %v562_v24  ;;  %v606_v24 = vld [vmem:[#allocation6 + $0x458] sm:$0xff] }
 0x231   : > { %3811 = vmatprep.subr.bf16.mxu0 %v7368_v9  ;;  %v7162_v9 = vcombine.high %v566_v3, %v570_v4 }
 0x232   : > { %3918 = vmatpush1.bf16.msra.mxu1 %v7113_v19  ;;  %v833_v19 = vld [vmem:[#allocation6 + $0xb70] sm:$0xff] }
 0x233   : > { %3919 = vmatprep.subr.bf16.mxu1 %v7122_v23  ;;  %v7415_v23 = vcombine.low %v821_v6, %v825_v7  ;;  %v7424_v28 = vcombine.high %v829_v18, %v833_v19  ;;  %v618_v6 = vld [vmem:[#allocation6 + $0x4b8] sm:$0xff]  ;;  %v869_v7 = vld [vmem:[#allocation6 + $0xc90] sm:$0xff] }
 0x234   : > { %3812 = vmatpush1.bf16.msra.mxu0 %v7367_v22  ;;  %v7161_v22 = vcombine.low %v566_v3, %v570_v4  ;;  %v614_v4 = vld [vmem:[#allocation6 + $0x498] sm:$0xff] }
 0x235   : > { %3813 = vmatprep.subr.bf16.mxu0 %v7376_v26  ;;  %v7170_v26 = vcombine.high %v574_v14, %v578_v16 }
 0x236   : > { %3920 = vmatpush1.bf16.msra.mxu1 %v7121_v32  ;;  %v841_v32 = vld [vmem:[#allocation6 + $0xbb0] sm:$0xff] }
 0x237   : > { %3921 = vmatprep.subr.bf16.mxu1 %v7130_v1  ;;  %v7423_v1 = vcombine.low %v829_v18, %v833_v19  ;;  %v7432_v35 = vcombine.high %v837_v31, %v841_v32  ;;  %v622_v18 = vld [vmem:[#allocation6 + $0x4d8] sm:$0xff] }
 0x238   : > { %3814 = vmatpush1.bf16.msra.mxu0 %v7375_v33  ;;  %v7169_v33 = vcombine.low %v574_v14, %v578_v16  ;;  %v917_v14 = vlaneseq  ;;  %v626_v19 = vld [vmem:[#allocation6 + $0x4f8] sm:$0xff] }
 0x239   : > { %3815 = vmatprep.subr.bf16.mxu0 %v7384_v34  ;;  %v7178_v34 = vcombine.high %v582_v29, %v586_v30 }
 0x23a   : > { %3922 = vmatpush1.bf16.msra.mxu1 %v7129_v39  ;;  %v849_v39 = vld [vmem:[#allocation6 + $0xbf0] sm:$0xff] }
 0x23b   : > { %3923 = vmatprep.subr.bf16.mxu1 %v7138_v41  ;;  %v7431_v41 = vcombine.low %v837_v31, %v841_v32  ;;  %v7440_v44 = vcombine.high %v845_v49, %v849_v39  ;;  %v634_v31 = vld [vmem:[#allocation6 + $0x538] sm:$0xff]  ;;  %v885_v32 = vld [vmem:[#allocation6 + $0xd10] sm:$0xff] }
 0x23c   : > { %3816 = vmatpush1.bf16.msra.mxu0 %v7383_v40  ;;  %v7177_v40 = vcombine.low %v582_v29, %v586_v30  ;;  %v630_v30 = vld [vmem:[#allocation6 + $0x518] sm:$0xff] }
 0x23d   : > { %3817 = vmatprep.subr.bf16.mxu0 %v7392_v42  ;;  %v7186_v42 = vcombine.high %v590_v37, %v594_v38 }
 0x23e   : > { %3924 = vmatpush1.bf16.msra.mxu1 %v7137_v48  ;;  %v857_v48 = vld [vmem:[#allocation6 + $0xc30] sm:$0xff] }
 0x23f   : > { %3925 = vmatprep.subr.bf16.mxu1 %v7146_v52  ;;  %v7439_v52 = vcombine.low %v845_v49, %v849_v39  ;;  %v7448_v57 = vcombine.high %v853_v13, %v857_v48  ;;  %v9496_v49 = vld [vmem:[#allocation8] sm:$0xff]  ;;  %v893_v39 = vld [vmem:[#allocation6 + $0xd50] sm:$0xff] }
 0x240   : > { %3818 = vmatpush1.bf16.msra.mxu0 %v7391_v51  ;;  %v7185_v51 = vcombine.low %v590_v37, %v594_v38  ;;  %v638_v37 = vld [vmem:[#allocation6 + $0x558] sm:$0xff] }
 0x241   : > { %3819 = vmatprep.subr.bf16.mxu0 %v7400_v54  ;;  %v7194_v54 = vcombine.high %v598_v46, %v602_v47  ;;  %v642_v38 = vld [vmem:[#allocation6 + $0x578] sm:$0xff] }
 0x242   : > { %3926 = vmatpush1.bf16.msra.mxu1 %v7145_v61  ;;  %v865_v61 = vld [vmem:[#allocation6 + $0xc70] sm:$0xff] }
 0x243   : > { %3927 = vmatprep.subr.bf16.mxu1 %v7154_v62  ;;  %v7447_v62 = vcombine.low %v853_v13, %v857_v48  ;;  %v7456_v3 = vcombine.high %v861_v60, %v865_v61  ;;  %v646_v13 = vld [vmem:[#allocation6 + $0x598] sm:$0xff] }
 0x244   : > { %3820 = vmatpush1.bf16.msra.mxu0 %v7399_v2  ;;  %v7193_v2 = vcombine.low %v598_v46, %v602_v47  ;;  %v650_v48 = vld [vmem:[#allocation6 + $0x5b8] sm:$0xff] }
 0x245   : > { %3821 = vmatprep.subr.bf16.mxu0 %v7408_v0  ;;  %v7202_v0 = vcombine.high %v606_v24, %v610_v59 }
 0x246   : > { %3928 = vmatpush1.bf16.msra.mxu1 %v7153_v58  ;;  %v873_v58 = vld [vmem:[#allocation6 + $0xcb0] sm:$0xff] }
 0x247   : > { %3929 = vmatprep.subr.bf16.mxu1 %v7162_v9  ;;  %v7455_v9 = vcombine.low %v861_v60, %v865_v61  ;;  %v7464_v16 = vcombine.high %v869_v7, %v873_v58 }
 0x248   : > { %3822 = vmatpush1.bf16.msra.mxu0 %v7407_v8  ;;  %v7201_v8 = vcombine.low %v606_v24, %v610_v59  ;;  %v7242_v59 = vcombine.high %v646_v13, %v650_v48 }
 0x249   : > { %3823 = vmatprep.subr.bf16.mxu0 %v7416_v11  ;;  %v7210_v11 = vcombine.high %v614_v4, %v618_v6 }
 0x24a   : > { %3930 = vmatpush1.bf16.msra.mxu1 %v7161_v22  ;;  %v877_v22 = vld [vmem:[#allocation6 + $0xcd0] sm:$0xff] }
 0x24b   : > { %3931 = vmatprep.subr.bf16.mxu1 %v7170_v26  ;;  %v7218_v26 = vcombine.high %v622_v18, %v626_v19 }
 0x24c   : > { %3824 = vmatpush1.bf16.msra.mxu0 %v7415_v23  ;;  %v881_v23 = vld [vmem:[#allocation6 + $0xcf0] sm:$0xff] }
 0x24d   : > { %3825 = vmatprep.subr.bf16.mxu0 %v7424_v28  ;;  %v9488_v28 = vshrl.u32 %v917_v14, 7  ;;  %v7472_v29 = vcombine.high %v877_v22, %v881_v23 }
 0x24e   : > { %3932 = vmatpush1.bf16.msra.mxu1 %v7169_v33  ;;  %v889_v33 = vld [vmem:[#allocation6 + $0xd30] sm:$0xff] }
 0x24f   : > { %3933 = vmatprep.subr.bf16.mxu1 %v7178_v34  ;;  %v9493_v34 = vsub.s32 0, %v9488_v28 }
 0x250   : > { %3826 = vmatpush1.bf16.msra.mxu0 %v7423_v1  ;;  %v7226_v1 = vcombine.high %v630_v30, %v634_v31 }
 0x251   : > { %3827 = vmatprep.subr.bf16.mxu0 %v7432_v35  ;;  %v7480_v35 = vcombine.high %v885_v32, %v889_v33  ;;  %v9504_v46 = vrot.slane %v9496_v49, %v9493_v34 }
 0x252   : > { %3934 = vmatpush1.bf16.msra.mxu1 %v7177_v40  ;;  %v8690_v40 = vld [vmem:[%s9351_s29 + $0xc] ss:$28 sps:$4 sm:$0xff]  }
 0x253   : > { %3935 = vmatprep.subr.bf16.mxu1 %v7186_v42  ;;  %v7479_v42 = vcombine.low %v885_v32, %v889_v33  ;;  %v3304_v60 = vadd.f32 %v9454_v45, %v9504_v46  ;;  %v3314_v33 = vadd.f32 %v9462_v10, %v9504_v46 }
 0x254   : > { %3828 = vmatpush1.bf16.msra.mxu0 %v7431_v41  ;;  %v7225_v41 = vcombine.low %v630_v30, %v634_v31 }
 0x255   : > { %3829 = vmatprep.subr.bf16.mxu0 %v7440_v44  ;;  %v7234_v44 = vcombine.high %v638_v37, %v642_v38 }
 0x256   : > { %3936 = vmatpush1.bf16.msra.mxu1 %v7185_v51 }
 0x257   : > { %3958 = vmatprep.subr.bf16.mxu1 %v7194_v54  ;;  %v905_v54 = vld [vmem:[#allocation6 + $0xdb0] sm:$0xff] }
 0x258   : > { %3830 = vmatpush1.bf16.msra.mxu0 %v7439_v52  ;;  %v901_v52 = vld [vmem:[#allocation6 + $0xd90] sm:$0xff] }
 0x259   : > { %3852 = vmatprep.subr.bf16.mxu0 %v7448_v57  ;;  %3938 = vmatmul.mubr.bf16.vlgmr.msra.gmra.mrb[16].mxu1 %v9429_v56  ;;  %v7209_v56 = vcombine.low %v614_v4, %v618_v6  ;;  %v7233_v57 = vcombine.low %v638_v37, %v642_v38  ;;  %v7496_v61 = vcombine.high %v901_v52, %v905_v54  ;;  %v909_v4 = vld [vmem:[#allocation6 + $0xdd0] sm:$0xff]  ;;  %v674_v37 = vld [vmem:[#allocation6 + $0x678] sm:$0xff] }
 0x25a   : > { %3959 = vmatpush1.bf16.msra.mxu1 %v7193_v2  ;;  %3947 = vmatprep.mubr.bf16.mxu1 %v9433_v36  ;;  %v7471_v36 = vcombine.low %v877_v22, %v881_v23  ;;  %v654_v2 = vld [vmem:[#allocation6 + $0x5d8] sm:$0xff]  ;;  %v913_v6 = vld [vmem:[#allocation6 + $0xdf0] sm:$0xff] }
 0x25b   : > { %3832 = vmatmul.mubr.bf16.vlgmr.msra.gmra.mrb[8].mxu0 %v9442_v63  ;;  %3960 = vmatprep.subr.bf16.mxu1 %v7202_v0  ;;  %v7463_v63 = vcombine.low %v869_v7, %v873_v58  ;;  %v3308_v7 = vadd.f32 %v9458_v53, %v9504_v46  ;;  %v7504_v23 = vcombine.high %v909_v4, %v913_v6  ;;  %v666_v53 = vld [vmem:[#allocation6 + $0x638] sm:$0xff] }
 0x25c   : > { %3853 = vmatpush1.bf16.msra.mxu0 %v7447_v62  ;;  %3841 = vmatprep.mubr.bf16.mxu0 %v9446_v5  ;;  %v7217_v5 = vcombine.low %v622_v18, %v626_v19  ;;  %v658_v62 = vld [vmem:[#allocation6 + $0x5f8] sm:$0xff]  ;;  %v7503_v31 = vcombine.low %v909_v4, %v913_v6 }
 0x25d   : > { %3854 = vmatprep.subr.bf16.mxu0 %v7456_v3  ;;  %v7250_v18 = vcombine.high %v654_v2, %v658_v62  ;;  %v8203_v6 = vld [vmem:[#allocation9 + $0x44] ss:$16 sps:$4 sm:$0xff]  }
 0x25e   : > { %3961 = vmatpush1.bf16.msra.mxu1 %v7201_v8 }
 0x25f   : > { %3962 = vmatprep.subr.bf16.mxu1 %v7210_v11  ;;  %v7241_v11 = vcombine.low %v646_v13, %v650_v48 }
 0x260   : > { %3855 = vmatpush1.bf16.msra.mxu0 %v7455_v9  ;;  %v7495_v9 = vcombine.low %v901_v52, %v905_v54  ;;  %v8195_v54 = vld [vmem:[#allocation9] ss:$16 sps:$4 sm:$0xff]  }
 0x261   : > { %3856 = vmatprep.subr.bf16.mxu0 %v7464_v16  ;;  %3948 = vmatmul.mubr.bf16.gmra.mrb[20].mxu1 %v9437_v12  ;;  %v9499_v12 = vsub.s32 1, %v9488_v28 }
 0x262   : > { %3963 = vmatpush1.bf16.msra.mxu1 %v7209_v56  ;;  %3990 = vmatprep.mubr.bf16.mxu1 %v8690_v40  ;;  %v662_v56 = vld [vmem:[#allocation6 + $0x618] sm:$0xff] }
 0x263   : > { %3842 = vmatmul.mubr.bf16.gmra.mrb[12].mxu0 %v9450_v25  ;;  %3964 = vmatprep.subr.bf16.mxu1 %v7218_v26  ;;  %v897_v25 = vld [vmem:[#allocation6 + $0xd70] sm:$0xff]  ;;  %v9508_v51 = vrot.slane %v9496_v49, %v9499_v12  ;;  %v7258_v32 = vcombine.high %v662_v56, %v666_v53 }
 0x264   : > { %3857 = vmatpush1.bf16.msra.mxu0 %v7463_v63  ;;  %3884 = vmatprep.mubr.bf16.mxu0 %v9027_v21  ;;  %v7488_v47 = vcombine.high %v893_v39, %v897_v25  ;;  %v7487_v24 = vcombine.low %v893_v39, %v897_v25 }
 0x265   : > { %3858 = vmatprep.subr.bf16.mxu0 %v7472_v29  ;;  %v3306_v0 = vadd.f32 %v9456_v50, %v9508_v51  ;;  %v3310_v45 = vadd.f32 %v9460_v55, %v9508_v51  ;;  %v7249_v55 = vcombine.low %v654_v2, %v658_v62  ;;  %v3316_v38 = vadd.f32 %v9464_v15, %v9508_v51 }
 0x266   : > { %3965 = vmatpush1.bf16.msra.mxu1 %v7217_v5  ;;  %v3320_v48 = vadd.f32 %v9468_v20, %v9508_v51 }
 0x267   : > { %3966 = vmatprep.subr.bf16.mxu1 %v7226_v1  ;;  %v8197_v1 = vld [vmem:[#allocation9 + $0x4] ss:$16 sps:$4 sm:$0xff]  }
 0x268   : > { %3859 = vmatpush1.bf16.msra.mxu0 %v7471_v36 }
 0x269   : > { %3860 = vmatprep.subr.bf16.mxu0 %v7480_v35  ;;  %v670_v35 = vld [vmem:[#allocation6 + $0x658] sm:$0xff] }
 0x26a   : > { %3967 = vmatpush1.bf16.msra.mxu1 %v7225_v41  ;;  %v7265_v20 = vcombine.low %v670_v35, %v674_v37 }
 0x26b   : > { %3968 = vmatprep.subr.bf16.mxu1 %v7234_v44 }
 0x26c   : > { %3861 = vmatpush1.bf16.msra.mxu0 %v7479_v42  ;;  %v3318_v42 = vadd.f32 %v9466_v17, %v9504_v46  ;;  %v678_v17 = vld [vmem:[#allocation6 + $0x698] sm:$0xff] }
 0x26d   : > { %3862 = vmatprep.subr.bf16.mxu0 %v7488_v47  ;;  %v7257_v47 = vcombine.low %v662_v56, %v666_v53  ;;  %v682_v46 = vld [vmem:[#allocation6 + $0x6b8] sm:$0xff] }
 0x26e   : > { %v3462_v3 = vpop.f32.mrb[0].mxu0  ;;  %3969 = vmatpush1.bf16.msra.mxu1 %v7233_v57  ;;  %v7266_v57 = vcombine.high %v670_v35, %v674_v37  ;;  %v7274_v4 = vcombine.high %v678_v17, %v682_v46  ;;  %v8204_v53 = vld [vmem:[#allocation9 + $0x60] ss:$16 sps:$4 sm:$0xff]   ;;  %v8215_v37 = vld [vmem:[#allocation9 + $0xc4] ss:$16 sps:$4 sm:$0xff]  }
 0x26f   : > { %v7835_v58 = vadd.f32 %v3462_v3, %v3304_v60  ;;  %v3464_v8 = vpop.f32.mrb[1].mxu0  ;;  %3970 = vmatprep.subr.bf16.mxu1 %v7242_v59  ;;  %v8198_v3 = vld [vmem:[#allocation9 + $0x20] ss:$16 sps:$4 sm:$0xff]  }
 0x270   : > { %v7837_v14 = vadd.f32 %v3464_v8, %v3306_v0  ;;  %v3466_v16 = vpop.f32.mrb[2].mxu0  ;;  %3863 = vmatpush1.bf16.msra.mxu0 %v7487_v24  ;;  %v8200_v24 = vld [vmem:[#allocation9 + $0x24] ss:$16 sps:$4 sm:$0xff]  }
 0x271   : > { %v4149_v50 = vmul.f32 0.2, %v7835_v58  ;;  %v7839_v19 = vadd.f32 %v3466_v16, %v3308_v7  ;;  %v3468_v22 = vpop.f32.mrb[3].mxu0  ;;  %3864 = vmatprep.subr.bf16.mxu0 %v7496_v61  ;;  %vm4117_vm0 = vcmp.gt.f32.partialorder %v7835_v58, 0.0  ;;  %v686_v8 = vld [vmem:[#allocation6 + $0x6d8] sm:$0xff] }
 0x272   : > { %v4150_v63 = vmul.f32 0.2, %v7837_v14  ;;  %v7841_v26 = vadd.f32 %v3468_v22, %v3310_v45  ;;  %vm4118_vm1 = vcmp.gt.f32.partialorder %v7837_v14, 0.0  ;;  %3971 = vmatpush1.bf16.msra.mxu1 %v7241_v11  ;;  %v694_v22 = vld [vmem:[#allocation6 + $0x718] sm:$0xff] }
 0x273   : > { %vm4125_vm2 = vcmp.gt.f32.partialorder %v7839_v19, 0.0  ;;  %v4157_v29 = vmul.f32 0.2, %v7839_v19  ;;  %3972 = vmatprep.subr.bf16.mxu1 %v7250_v18  ;;  %v4181_v5 = vsel %vm4117_vm0, %v7835_v58, %v4149_v50  ;;  %v8201_v18 = vld [vmem:[#allocation9 + $0x40] ss:$16 sps:$4 sm:$0xff]  }
 0x274   : > { %vm4126_vm3 = vcmp.gt.f32.partialorder %v7841_v26, 0.0  ;;  %v4158_v30 = vmul.f32 0.2, %v7841_v26  ;;  %3865 = vmatpush1.bf16.msra.mxu0 %v7495_v9  ;;  %v4182_v40 = vsel %vm4118_vm1, %v7837_v14, %v4150_v63  ;;  %v690_v9 = vld [vmem:[#allocation6 + $0x6f8] sm:$0xff]  ;;  %v7273_v14 = vcombine.low %v678_v17, %v682_v46 }
 0x275   : > { %v4189_v36 = vsel %vm4125_vm2, %v7839_v19, %v4157_v29  ;;  %3866 = vmatprep.subr.bf16.mxu0 %v7504_v23  ;;  %v7282_v50 = vcombine.high %v686_v8, %v690_v9  ;;  %v8206_v19 = vld [vmem:[#allocation9 + $0x64] ss:$16 sps:$4 sm:$0xff]   ;;  %v7281_v56 = vcombine.low %v686_v8, %v690_v9  ;;  %v8225_v8 = vld [vmem:[#allocation9 + $0x140] ss:$16 sps:$4 sm:$0xff]  }
 0x276   : > { %v9522_v39 = vpack.c.bf16 %v4189_v36, %v4181_v5  ;;  %v3472_v25 = vpop.f32.mrb[4].mxu0  ;;  %v4190_v41 = vsel %vm4126_vm3, %v7841_v26, %v4158_v30  ;;  %3973 = vmatpush1.bf16.msra.mxu1 %v7249_v55  ;;  %v698_v23 = vld [vmem:[#allocation6 + $0x738] sm:$0xff] }
 0x277   : > { %v7843_v10 = vadd.f32 %v3472_v25, %v3314_v33  ;;  %v3474_v44 = vpop.f32.mrb[5].mxu0  ;;  %v9528_v13 = vpack.c.bf16 %v4190_v41, %v4182_v40  ;;  %3974 = vmatprep.subr.bf16.mxu1 %v7258_v32  ;;  %v7290_v63 = vcombine.high %v694_v22, %v698_v23  ;;  %v8209_v26 = vld [vmem:[#allocation9 + $0x84] ss:$16 sps:$4 sm:$0xff]   ;;  %v7289_v30 = vcombine.low %v694_v22, %v698_v23  ;;  %v8213_v41 = vld [vmem:[#allocation9 + $0xc0] ss:$16 sps:$4 sm:$0xff]  }
 0x278   : > { %v7845_v15 = vadd.f32 %v3474_v44, %v3316_v38  ;;  %v3476_v52 = vpop.f32.mrb[6].mxu0  ;;  %3867 = vmatpush1.bf16.msra.mxu0 %v7503_v31  ;;  %v702_v29 = vld [vmem:[#allocation6 + $0x758] sm:$0xff] }
 0x279   : > { %v4165_v59 = vmul.f32 0.2, %v7843_v10  ;;  %v7847_v60 = vadd.f32 %v3476_v52, %v3318_v42  ;;  %v3478_v61 = vpop.f32.mrb[7].mxu0  ;;  %5787 = vmatprep.subr.bf16.mxu0 %v8197_v1  ;;  %vm4133_vm4 = vcmp.gt.f32.partialorder %v7843_v10, 0.0  ;;  %v706_v55 = vld [vmem:[#allocation6 + $0x778] sm:$0xff] }
 0x27a   : > { %v4166_v2 = vmul.f32 0.2, %v7845_v15  ;;  %v7849_v62 = vadd.f32 %v3478_v61, %v3320_v48  ;;  %vm4134_vm5 = vcmp.gt.f32.partialorder %v7845_v15, 0.0  ;;  %3975 = vmatpush1.bf16.msra.mxu1 %v7257_v47  ;;  %v8207_v31 = vld [vmem:[#allocation9 + $0x80] ss:$16 sps:$4 sm:$0xff]   ;;  %v7298_v32 = vcombine.high %v702_v29, %v706_v55 }
 0x27b   : > { %vm4141_vm6 = vcmp.gt.f32.partialorder %v7847_v60, 0.0  ;;  %v4173_v0 = vmul.f32 0.2, %v7847_v60  ;;  %3885 = vmatmul.mubr.bf16.vlgmr.msra.gmra.mrb[8].mxu0 %v9471_v27  ;;  %3976 = vmatprep.subr.bf16.mxu1 %v7266_v57  ;;  %v4197_v7 = vsel %vm4133_vm4, %v7843_v10, %v4165_v59  ;;  %v710_v33 = vld [vmem:[#allocation6 + $0x798] sm:$0xff]  ;;  %v7297_v36 = vcombine.low %v702_v29, %v706_v55 }
 0x27c   : > { %vm4142_vm7 = vcmp.gt.f32.partialorder %v7849_v62, 0.0  ;;  %v4174_v51 = vmul.f32 0.2, %v7849_v62  ;;  %5788 = vmatpush1.bf16.msra.mxu0 %v8195_v54  ;;  %3894 = vmatprep.mubr.bf16.mxu0 %v9027_v21  ;;  %v4198_v11 = vsel %vm4134_vm5, %v7845_v15, %v4166_v2  ;;  %v714_v5 = vld [vmem:[#allocation6 + $0x7b8] sm:$0xff] }
 0x27d   : > { %5789 = vmatprep.subr.bf16.mxu0 %v8200_v24  ;;  %v4205_v58 = vsel %vm4141_vm6, %v7847_v60, %v4173_v0  ;;  %v8210_v1 = vld [vmem:[#allocation9 + $0xa0] ss:$16 sps:$4 sm:$0xff]   ;;  %v7306_v35 = vcombine.high %v710_v33, %v714_v5  ;;  %v7305_v40 = vcombine.low %v710_v33, %v714_v5  ;;  %v8218_v10 = vld [vmem:[#allocation9 + $0xe4] ss:$16 sps:$4 sm:$0xff]  }
 0x27e   : > { %v4206_v27 = vsel %vm4142_vm7, %v7849_v62, %v4174_v51  ;;  %v9536_v45 = vpack.c.bf16 %v4205_v58, %v4197_v7  ;;  %3977 = vmatpush1.bf16.msra.mxu1 %v7265_v20  ;;  %v718_v38 = vld [vmem:[#allocation6 + $0x7d8] sm:$0xff]  ;;  %v8692_v20 = vld [vmem:[%s9351_s29 + $0x44] ss:$28 sps:$4 sm:$0xff]  }
 0x27f   : > { %v9538_v16 = vpack.c.bf16 %v4206_v27, %v4198_v11  ;;  %3978 = vmatprep.subr.bf16.mxu1 %v7274_v4  ;;  %v722_v25 = vld [vmem:[#allocation6 + $0x7f8] sm:$0xff] }
 0x280   : > { %5790 = vmatpush1.bf16.msra.mxu0 %v8198_v3  ;;  %v7314_v42 = vcombine.high %v718_v38, %v722_v25  ;;  %v726_v44 = vld [vmem:[#allocation6 + $0x818] sm:$0xff]  ;;  %v7313_v48 = vcombine.low %v718_v38, %v722_v25 }
 0x281   : > { %5791 = vmatprep.subr.bf16.mxu0 %v8203_v6  ;;  %v730_v47 = vld [vmem:[#allocation6 + $0x838] sm:$0xff] }
 0x282   : > { %3979 = vmatpush1.bf16.msra.mxu1 %v7273_v14  ;;  %v8216_v15 = vld [vmem:[#allocation9 + $0xe0] ss:$16 sps:$4 sm:$0xff]   ;;  %v7322_v52 = vcombine.high %v726_v44, %v730_v47  ;;  %v8221_v54 = vld [vmem:[#allocation9 + $0x104] ss:$16 sps:$4 sm:$0xff]   ;;  %v7321_v59 = vcombine.low %v726_v44, %v730_v47 }
 0x283   : > { %3895 = vmatmul.mubr.bf16.gmra.mrb[12].mxu0 %v9478_v43  ;;  %3980 = vmatprep.subr.bf16.mxu1 %v7282_v50  ;;  %v8212_v43 = vld [vmem:[#allocation9 + $0xa4] ss:$16 sps:$4 sm:$0xff]   ;;  %v8219_v60 = vld [vmem:[#allocation9 + $0x100] ss:$16 sps:$4 sm:$0xff]  }
 0x284   : > { %5792 = vmatpush1.bf16.msra.mxu0 %v8201_v18  ;;  %5819 = vmatprep.mubr.bf16.mxu0 %v9528_v13  ;;  %v734_v57 = vld [vmem:[#allocation6 + $0x858] sm:$0xff] }
 0x285   : > { %5793 = vmatprep.subr.bf16.mxu0 %v8206_v19  ;;  %v738_v24 = vld [vmem:[#allocation6 + $0x878] sm:$0xff]  ;;  %v8694_v19 = vld [vmem:[%s9351_s29 + $0x14] ss:$28 sps:$4 sm:$0xff]  }
 0x286   : > { %3981 = vmatpush1.bf16.msra.mxu1 %v7281_v56  ;;  %v7330_v61 = vcombine.high %v734_v57, %v738_v24  ;;  %v8224_v17 = vld [vmem:[#allocation9 + $0x124] ss:$16 sps:$4 sm:$0xff]   ;;  %v8691_v62 = vld [vmem:[%s9351_s29 + $0x8] ss:$28 sps:$4 sm:$0xff]   ;;  %v7329_v0 = vcombine.low %v734_v57, %v738_v24 }
 0x287   : > { %3982 = vmatprep.subr.bf16.mxu1 %v7290_v63  ;;  %v742_v46 = vld [vmem:[#allocation6 + $0x898] sm:$0xff] }
 0x288   : > { %5794 = vmatpush1.bf16.msra.mxu0 %v8204_v53  ;;  %v746_v2 = vld [vmem:[#allocation6 + $0x8b8] sm:$0xff] }
 0x289   : > { %5795 = vmatprep.subr.bf16.mxu0 %v8209_v26  ;;  %v8222_v51 = vld [vmem:[#allocation9 + $0x120] ss:$16 sps:$4 sm:$0xff]   ;;  %v7338_v3 = vcombine.high %v742_v46, %v746_v2  ;;  %v8227_v4 = vld [vmem:[#allocation9 + $0x144] ss:$16 sps:$4 sm:$0xff]   ;;  %v7337_v58 = vcombine.low %v742_v46, %v746_v2 }
 0x28a   : > { %3983 = vmatpush1.bf16.msra.mxu1 %v7289_v30  ;;  %v750_v6 = vld [vmem:[#allocation6 + $0x8d8] sm:$0xff] }
 0x28b   : > { %3984 = vmatprep.subr.bf16.mxu1 %v7298_v32  ;;  %v754_v7 = vld [vmem:[#allocation6 + $0x8f8] sm:$0xff] }
 0x28c   : > { %5796 = vmatpush1.bf16.msra.mxu0 %v8207_v31  ;;  %v7346_v9 = vcombine.high %v750_v6, %v754_v7  ;;  %v8230_v11 = vld [vmem:[#allocation9 + $0x164] ss:$16 sps:$4 sm:$0xff]   ;;  %v7345_v50 = vcombine.low %v750_v6, %v754_v7  ;;  %v8228_v22 = vld [vmem:[#allocation9 + $0x160] ss:$16 sps:$4 sm:$0xff]  }
 0x28d   : > { %5797 = vmatprep.subr.bf16.mxu0 %v8212_v43  ;;  %v758_v27 = vld [vmem:[#allocation6 + $0x918] sm:$0xff] }
 0x28e   : > { %3985 = vmatpush1.bf16.msra.mxu1 %v7297_v36  ;;  %v762_v14 = vld [vmem:[#allocation6 + $0x938] sm:$0xff] }
 0x28f   : > { %3986 = vmatprep.subr.bf16.mxu1 %v7306_v35  ;;  %v8693_v18 = vld [vmem:[%s9351_s29 + $0x40] ss:$28 sps:$4 sm:$0xff]   ;;  %v7354_v23 = vcombine.high %v758_v27, %v762_v14  ;;  %v7353_v26 = vcombine.low %v758_v27, %v762_v14  ;;  %v8231_v29 = vld [vmem:[#allocation9 + $0x180] ss:$16 sps:$4 sm:$0xff]  }
 0x290   : > { %5798 = vmatpush1.bf16.msra.mxu0 %v8210_v1  ;;  %v8233_v56 = vld [vmem:[#allocation9 + $0x184] ss:$16 sps:$4 sm:$0xff]   ;;  %v8234_v33 = vld [vmem:[#allocation9 + $0x1a0] ss:$16 sps:$4 sm:$0xff]  }
 0x291   : > { %5799 = vmatprep.subr.bf16.mxu0 %v8215_v37  ;;  %v766_v53 = vld [vmem:[#allocation6 + $0x958] sm:$0xff] }
 0x292   : > { %3987 = vmatpush1.bf16.msra.mxu1 %v7305_v40  ;;  %v770_v63 = vld [vmem:[#allocation6 + $0x978] sm:$0xff] }
 0x293   : > { %3988 = vmatprep.subr.bf16.mxu1 %v7314_v42  ;;  %v7362_v55 = vcombine.high %v766_v53, %v770_v63  ;;  %v8236_v30 = vld [vmem:[#allocation9 + $0x1a4] ss:$16 sps:$4 sm:$0xff]   ;;  %v7361_v43 = vcombine.low %v766_v53, %v770_v63  ;;  %v8237_v38 = vld [vmem:[#allocation9 + $0x1c0] ss:$16 sps:$4 sm:$0xff]  }
 0x294   : > { %5800 = vmatpush1.bf16.msra.mxu0 %v8213_v41  ;;  %v774_v31 = vld [vmem:[#allocation6 + $0x998] sm:$0xff] }
 0x295   : > { %5801 = vmatprep.subr.bf16.mxu0 %v8218_v10  ;;  %v778_v32 = vld [vmem:[#allocation6 + $0x9b8] sm:$0xff] }
 0x296   : > { %3989 = vmatpush1.bf16.msra.mxu1 %v7313_v48  ;;  %v7370_v5 = vcombine.high %v774_v31, %v778_v32  ;;  %v8239_v36 = vld [vmem:[#allocation9 + $0x1c4] ss:$16 sps:$4 sm:$0xff]   ;;  %v7369_v37 = vcombine.low %v774_v31, %v778_v32  ;;  %v8240_v44 = vld [vmem:[#allocation9 + $0x1e0] ss:$16 sps:$4 sm:$0xff]  }
 0x297   : > { %4011 = vmatprep.subr.bf16.mxu1 %v7322_v52  ;;  %v782_v1 = vld [vmem:[#allocation6 + $0x9d8] sm:$0xff] }
 0x298   : > { %5802 = vmatpush1.bf16.msra.mxu0 %v8216_v15  ;;  %v786_v35 = vld [vmem:[#allocation6 + $0x9f8] sm:$0xff] }
 0x299   : > { %5803 = vmatprep.subr.bf16.mxu0 %v8221_v54  ;;  %3991 = vmatmul.mubr.bf16.vlgmr.msra.gmra.mrb[16].mxu1 %v8691_v62  ;;  %v7378_v25 = vcombine.high %v782_v1, %v786_v35  ;;  %v8242_v40 = vld [vmem:[#allocation9 + $0x1e4] ss:$16 sps:$4 sm:$0xff]   ;;  %v7377_v10 = vcombine.low %v782_v1, %v786_v35  ;;  %v8243_v57 = vld [vmem:[#allocation9 + $0x200] ss:$16 sps:$4 sm:$0xff]  }
 0x29a   : > { %4012 = vmatpush1.bf16.msra.mxu1 %v7321_v59  ;;  %4000 = vmatprep.mubr.bf16.mxu1 %v8692_v20  ;;  %v790_v41 = vld [vmem:[#allocation6 + $0xa18] sm:$0xff] }
 0x29b   : > { %4013 = vmatprep.subr.bf16.mxu1 %v7330_v61  ;;  %v794_v42 = vld [vmem:[#allocation6 + $0xa38] sm:$0xff] }
 0x29c   : > { %5804 = vmatpush1.bf16.msra.mxu0 %v8219_v60  ;;  %v7386_v47 = vcombine.high %v790_v41, %v794_v42  ;;  %v8245_v48 = vld [vmem:[#allocation9 + $0x204] ss:$16 sps:$4 sm:$0xff]   ;;  %v7385_v54 = vcombine.low %v790_v41, %v794_v42  ;;  %v8246_v46 = vld [vmem:[#allocation9 + $0x220] ss:$16 sps:$4 sm:$0xff]  }
 0x29d   : > { %5805 = vmatprep.subr.bf16.mxu0 %v8224_v17  ;;  %v798_v15 = vld [vmem:[#allocation6 + $0xa58] sm:$0xff] }
 0x29e   : > { %4014 = vmatpush1.bf16.msra.mxu1 %v7329_v0  ;;  %v802_v52 = vld [vmem:[#allocation6 + $0xa78] sm:$0xff] }
 0x29f   : > { %4015 = vmatprep.subr.bf16.mxu1 %v7338_v3  ;;  %v7394_v24 = vcombine.high %v798_v15, %v802_v52  ;;  %v8248_v59 = vld [vmem:[#allocation9 + $0x224] ss:$16 sps:$4 sm:$0xff]   ;;  %v7393_v17 = vcombine.low %v798_v15, %v802_v52  ;;  %v8249_v3 = vld [vmem:[#allocation9 + $0x240] ss:$16 sps:$4 sm:$0xff]  }
 0x2a0   : > { %5806 = vmatpush1.bf16.msra.mxu0 %v8222_v51  ;;  %v806_v60 = vld [vmem:[#allocation6 + $0xa98] sm:$0xff] }
 0x2a1   : > { %5807 = vmatprep.subr.bf16.mxu0 %v8227_v4  ;;  %4001 = vmatmul.mubr.bf16.gmra.mrb[20].mxu1 %v8693_v18  ;;  %v810_v61 = vld [vmem:[#allocation6 + $0xab8] sm:$0xff] }
 0x2a2   : > { %4016 = vmatpush1.bf16.msra.mxu1 %v7337_v58  ;;  %4043 = vmatprep.mubr.bf16.mxu1 %v8694_v19  ;;  %v7402_v2 = vcombine.high %v806_v60, %v810_v61  ;;  %v8251_v62 = vld [vmem:[#allocation9 + $0x244] ss:$16 sps:$4 sm:$0xff]   ;;  %v7401_v51 = vcombine.low %v806_v60, %v810_v61  ;;  %v8255_v19 = vld [vmem:[#allocation9 + $0x280] ss:$16 sps:$4 sm:$0xff]  }
 0x2a3   : > { %4017 = vmatprep.subr.bf16.mxu1 %v7346_v9  ;;  %v814_v0 = vld [vmem:[#allocation6 + $0xad8] sm:$0xff] }
 0x2a4   : > { %5808 = vmatpush1.bf16.msra.mxu0 %v8225_v8  ;;  %v818_v20 = vld [vmem:[#allocation6 + $0xaf8] sm:$0xff] }
 0x2a5   : > { %5809 = vmatprep.subr.bf16.mxu0 %v8230_v11  ;;  %v7410_v4 = vcombine.high %v814_v0, %v818_v20  ;;  %v8254_v6 = vld [vmem:[#allocation9 + $0x264] ss:$16 sps:$4 sm:$0xff]   ;;  %v7409_v8 = vcombine.low %v814_v0, %v818_v20  ;;  %v8252_v9 = vld [vmem:[#allocation9 + $0x260] ss:$16 sps:$4 sm:$0xff]  }
 0x2a6   : > { %4018 = vmatpush1.bf16.msra.mxu1 %v7345_v50  ;;  %v822_v7 = vld [vmem:[#allocation6 + $0xb18] sm:$0xff] }
 0x2a7   : > { %4019 = vmatprep.subr.bf16.mxu1 %v7354_v23  ;;  %v826_v58 = vld [vmem:[#allocation6 + $0xb38] sm:$0xff] }
 0x2a8   : > { %5810 = vmatpush1.bf16.msra.mxu0 %v8228_v22  ;;  %v7418_v11 = vcombine.high %v822_v7, %v826_v58  ;;  %v8257_v27 = vld [vmem:[#allocation9 + $0x284] ss:$16 sps:$4 sm:$0xff]   ;;  %v7417_v50 = vcombine.low %v822_v7, %v826_v58 }
 0x2a9   : > { %5811 = vmatprep.subr.bf16.mxu0 %v8233_v56  ;;  %v830_v14 = vld [vmem:[#allocation6 + $0xb58] sm:$0xff] }
 0x2aa   : > { %4020 = vmatpush1.bf16.msra.mxu1 %v7353_v26  ;;  %v834_v18 = vld [vmem:[#allocation6 + $0xb78] sm:$0xff] }
 0x2ab   : > { %4021 = vmatprep.subr.bf16.mxu1 %v7362_v55  ;;  %v7426_v22 = vcombine.high %v830_v14, %v834_v18  ;;  %v8260_v23 = vld [vmem:[#allocation9 + $0x2a4] ss:$16 sps:$4 sm:$0xff]   ;;  %v7425_v63 = vcombine.low %v830_v14, %v834_v18  ;;  %v8258_v26 = vld [vmem:[#allocation9 + $0x2a0] ss:$16 sps:$4 sm:$0xff]   ;;  %v931_v14 = vsub.s32 3, %v9488_v28 }
 0x2ac   : > { %5812 = vmatpush1.bf16.msra.mxu0 %v8231_v29  ;;  %v838_v56 = vld [vmem:[#allocation6 + $0xb98] sm:$0xff] }
 0x2ad   : > { %5813 = vmatprep.subr.bf16.mxu0 %v8236_v30  ;;  %v842_v53 = vld [vmem:[#allocation6 + $0xbb8] sm:$0xff] }
 0x2ae   : > { %4022 = vmatpush1.bf16.msra.mxu1 %v7361_v43  ;;  %v7434_v29 = vcombine.high %v838_v56, %v842_v53  ;;  %v8263_v55 = vld [vmem:[#allocation9 + $0x2c4] ss:$16 sps:$4 sm:$0xff]   ;;  %v7433_v32 = vcombine.low %v838_v56, %v842_v53  ;;  %v8261_v43 = vld [vmem:[#allocation9 + $0x2c0] ss:$16 sps:$4 sm:$0xff]   ;;  %v9562_v53 = vrot.slane %v9496_v49, %v931_v14 }
 0x2af   : > { %4023 = vmatprep.subr.bf16.mxu1 %v7370_v5  ;;  %v846_v30 = vld [vmem:[#allocation6 + $0xbd8] sm:$0xff] }
 0x2b0   : > { %5814 = vmatpush1.bf16.msra.mxu0 %v8234_v33  ;;  %v850_v31 = vld [vmem:[#allocation6 + $0xbf8] sm:$0xff] }
 0x2b1   : > { %5815 = vmatprep.subr.bf16.mxu0 %v8239_v36  ;;  %v7442_v33 = vcombine.high %v846_v30, %v850_v31  ;;  %v8266_v5 = vld [vmem:[#allocation9 + $0x2e4] ss:$16 sps:$4 sm:$0xff]   ;;  %v7441_v35 = vcombine.low %v846_v30, %v850_v31  ;;  %v8279_v18 = vld [vmem:[#allocation9 + $0x380] ss:$16 sps:$4 sm:$0xff]  }
 0x2b2   : > { %4024 = vmatpush1.bf16.msra.mxu1 %v7369_v37  ;;  %v854_v36 = vld [vmem:[#allocation6 + $0xc18] sm:$0xff] }
 0x2b3   : > { %4025 = vmatprep.subr.bf16.mxu1 %v7378_v25  ;;  %v858_v1 = vld [vmem:[#allocation6 + $0xc38] sm:$0xff] }
 0x2b4   : > { %5816 = vmatpush1.bf16.msra.mxu0 %v8237_v38  ;;  %v8264_v37 = vld [vmem:[#allocation9 + $0x2e0] ss:$16 sps:$4 sm:$0xff]   ;;  %v7450_v38 = vcombine.high %v854_v36, %v858_v1  ;;  %v8269_v25 = vld [vmem:[#allocation9 + $0x304] ss:$16 sps:$4 sm:$0xff]   ;;  %v7449_v42 = vcombine.low %v854_v36, %v858_v1 }
 0x2b5   : > { %5817 = vmatprep.subr.bf16.mxu0 %v8242_v40  ;;  %v862_v40 = vld [vmem:[#allocation6 + $0xc58] sm:$0xff] }
 0x2b6   : > { %4026 = vmatpush1.bf16.msra.mxu1 %v7377_v10  ;;  %v866_v41 = vld [vmem:[#allocation6 + $0xc78] sm:$0xff] }
 0x2b7   : > { %4027 = vmatprep.subr.bf16.mxu1 %v7386_v47  ;;  %v8267_v10 = vld [vmem:[#allocation9 + $0x300] ss:$16 sps:$4 sm:$0xff]   ;;  %v8272_v47 = vld [vmem:[#allocation9 + $0x324] ss:$16 sps:$4 sm:$0xff]  }
 0x2b8   : > { %5818 = vmatpush1.bf16.msra.mxu0 %v8240_v44  ;;  %v7458_v44 = vcombine.high %v862_v40, %v866_v41  ;;  %v874_v15 = vld [vmem:[#allocation6 + $0xcb8] sm:$0xff] }
 0x2b9   : > { %5840 = vmatprep.subr.bf16.mxu0 %v8245_v48  ;;  %v870_v48 = vld [vmem:[#allocation6 + $0xc98] sm:$0xff] }
 0x2ba   : > { %4028 = vmatpush1.bf16.msra.mxu1 %v7385_v54  ;;  %v8695_v52 = vld [vmem:[%s9351_s29 + $0x10] ss:$28 sps:$4 sm:$0xff]   ;;  %v7457_v54 = vcombine.low %v862_v40, %v866_v41 }
 0x2bb   : > { %5820 = vmatmul.mubr.bf16.vlgmr.msra.gmra.mrb[16].mxu0 %v9522_v39  ;;  %4029 = vmatprep.subr.bf16.mxu1 %v7394_v24  ;;  %v8270_v24 = vld [vmem:[#allocation9 + $0x320] ss:$16 sps:$4 sm:$0xff]   ;;  %v8275_v60 = vld [vmem:[#allocation9 + $0x344] ss:$16 sps:$4 sm:$0xff]  }
 0x2bc   : > { %5829 = vmatprep.mubr.bf16.mxu0 %v9538_v16  ;;  %5841 = vmatpush1.bf16.msra.mxu0 %v8243_v57  ;;  %v8696_v57 = vld [vmem:[%s9351_s29 + $0x4c] ss:$28 sps:$4 sm:$0xff]  }
 0x2bd   : > { %5842 = vmatprep.subr.bf16.mxu0 %v8248_v59  ;;  %v7466_v59 = vcombine.high %v870_v48, %v874_v15  ;;  %v878_v61 = vld [vmem:[#allocation6 + $0xcd8] sm:$0xff] }
 0x2be   : > { %4030 = vmatpush1.bf16.msra.mxu1 %v7393_v17  ;;  %v882_v17 = vld [vmem:[#allocation6 + $0xcf8] sm:$0xff] }
 0x2bf   : > { %4031 = vmatprep.subr.bf16.mxu1 %v7402_v2  ;;  %v8273_v2 = vld [vmem:[#allocation9 + $0x340] ss:$16 sps:$4 sm:$0xff]   ;;  %v8278_v0 = vld [vmem:[#allocation9 + $0x364] ss:$16 sps:$4 sm:$0xff]  }
 0x2c0   : > { %5843 = vmatpush1.bf16.msra.mxu0 %v8246_v46  ;;  %v7465_v46 = vcombine.low %v870_v48, %v874_v15  ;;  %v886_v20 = vld [vmem:[#allocation6 + $0xd18] sm:$0xff] }
 0x2c1   : > { %5844 = vmatprep.subr.bf16.mxu0 %v8251_v62  ;;  %v7474_v62 = vcombine.high %v878_v61, %v882_v17  ;;  %v8281_v58 = vld [vmem:[#allocation9 + $0x384] ss:$16 sps:$4 sm:$0xff]  }
 0x2c2   : > { %4032 = vmatpush1.bf16.msra.mxu1 %v7401_v51  ;;  %v890_v51 = vld [vmem:[#allocation6 + $0xd38] sm:$0xff] }
 0x2c3   : > { %5830 = vmatmul.mubr.bf16.gmra.mrb[20].mxu0 %v9536_v45  ;;  %4033 = vmatprep.subr.bf16.mxu1 %v7410_v4  ;;  %v7473_v4 = vcombine.low %v878_v61, %v882_v17  ;;  %v7482_v7 = vcombine.high %v886_v20, %v890_v51  ;;  %v8287_v30 = vld [vmem:[#allocation9 + $0x3c4] ss:$16 sps:$4 sm:$0xff]  }
 0x2c4   : > { %5845 = vmatpush1.bf16.msra.mxu0 %v8249_v3  ;;  %v8697_v3 = vld [vmem:[%s9351_s29 + $0x48] ss:$28 sps:$4 sm:$0xff]   ;;  %v8317_v61 = vld [vmem:[#allocation9 + $0x404] ss:$16 sps:$4 sm:$0xff]  }
 0x2c5   : > { %5846 = vmatprep.subr.bf16.mxu0 %v8254_v6  ;;  %v8276_v6 = vld [vmem:[#allocation9 + $0x360] ss:$16 sps:$4 sm:$0xff]  }
 0x2c6   : > { %4034 = vmatpush1.bf16.msra.mxu1 %v7409_v8  ;;  %v894_v8 = vld [vmem:[#allocation6 + $0xd58] sm:$0xff] }
 0x2c7   : > { %4035 = vmatprep.subr.bf16.mxu1 %v7418_v11  ;;  %v9554_v11 = vsub.s32 2, %v9488_v28  ;;  %v910_v31 = vld [vmem:[#allocation6 + $0xdd8] sm:$0xff] }
 0x2c8   : > { %5847 = vmatpush1.bf16.msra.mxu0 %v8252_v9  ;;  %v898_v9 = vld [vmem:[#allocation6 + $0xd78] sm:$0xff] }
 0x2c9   : > { %5848 = vmatprep.subr.bf16.mxu0 %v8257_v27  ;;  %v7481_v27 = vcombine.low %v886_v20, %v890_v51  ;;  %v928_v56 = vrot.slane %v9496_v49, %v9554_v11  ;;  %v8291_v20 = vld [vmem:[#allocation9 + $0x8] ss:$16 sps:$4 sm:$0xff]  }
 0x2ca   : > { %4036 = vmatpush1.bf16.msra.mxu1 %v7417_v50  ;;  %v7490_v50 = vcombine.high %v894_v8, %v898_v9 }
 0x2cb   : > { %4037 = vmatprep.subr.bf16.mxu1 %v7426_v22  ;;  %v902_v22 = vld [vmem:[#allocation6 + $0xd98] sm:$0xff] }
 0x2cc   : > { %5849 = vmatpush1.bf16.msra.mxu0 %v8255_v19  ;;  %v8284_v19 = vld [vmem:[#allocation9 + $0x3a4] ss:$16 sps:$4 sm:$0xff]  }
 0x2cd   : > { %5850 = vmatprep.subr.bf16.mxu0 %v8260_v23  ;;  %v906_v23 = vld [vmem:[#allocation6 + $0xdb8] sm:$0xff] }
 0x2ce   : > { %4038 = vmatpush1.bf16.msra.mxu1 %v7425_v63  ;;  %v7489_v63 = vcombine.low %v894_v8, %v898_v9  ;;  %v7497_v1 = vcombine.low %v902_v22, %v906_v23  ;;  %v8315_v8 = vld [vmem:[#allocation9 + $0x400] ss:$16 sps:$4 sm:$0xff]  }
 0x2cf   : > { %4039 = vmatprep.subr.bf16.mxu1 %v7434_v29  ;;  %v7498_v29 = vcombine.high %v902_v22, %v906_v23 }
 0x2d0   : > { %5851 = vmatpush1.bf16.msra.mxu0 %v8258_v26  ;;  %v8282_v26 = vld [vmem:[#allocation9 + $0x3a0] ss:$16 sps:$4 sm:$0xff]  }
 0x2d1   : > { %5852 = vmatprep.subr.bf16.mxu0 %v8263_v55 }
 0x2d2   : > { %4040 = vmatpush1.bf16.msra.mxu1 %v7433_v32  ;;  %v914_v32 = vld [vmem:[#allocation6 + $0xdf8] sm:$0xff] }
 0x2d3   : > { %4041 = vmatprep.subr.bf16.mxu1 %v7442_v33 }
 0x2d4   : > { %5853 = vmatpush1.bf16.msra.mxu0 %v8261_v43 }
 0x2d5   : > { %5854 = vmatprep.subr.bf16.mxu0 %v8266_v5 }
 0x2d6   : > { %4042 = vmatpush1.bf16.msra.mxu1 %v7441_v35 }
 0x2d7   : > { %4064 = vmatprep.subr.bf16.mxu1 %v7450_v38  ;;  %v8285_v38 = vld [vmem:[#allocation9 + $0x3c0] ss:$16 sps:$4 sm:$0xff]  }
 0x2d8   : > { %5855 = vmatpush1.bf16.msra.mxu0 %v8264_v37 }
 0x2d9   : > { %5856 = vmatprep.subr.bf16.mxu0 %v8269_v25  ;;  %4044 = vmatmul.mubr.bf16.vlgmr.msra.gmra.mrb[16].mxu1 %v8695_v52  ;;  %v7506_v25 = vcombine.high %v910_v31, %v914_v32  ;;  %v8288_v52 = vld [vmem:[#allocation9 + $0x3e0] ss:$16 sps:$4 sm:$0xff]  }
 0x2da   : > { %4065 = vmatpush1.bf16.msra.mxu1 %v7449_v42  ;;  %4053 = vmatprep.mubr.bf16.mxu1 %v8696_v57  ;;  %v8290_v42 = vld [vmem:[#allocation9 + $0x3e4] ss:$16 sps:$4 sm:$0xff]  }
 0x2db   : > { %4066 = vmatprep.subr.bf16.mxu1 %v7458_v44 }
 0x2dc   : > { %5857 = vmatpush1.bf16.msra.mxu0 %v8267_v10 }
 0x2dd   : > { %5858 = vmatprep.subr.bf16.mxu0 %v8272_v47  ;;  %v7505_v47 = vcombine.low %v910_v31, %v914_v32  ;;  %v8297_v31 = vld [vmem:[#allocation9 + $0x48] ss:$16 sps:$4 sm:$0xff]   ;;  %v8327_v32 = vld [vmem:[#allocation9 + $0x440] ss:$16 sps:$4 sm:$0xff]  }
 0x2de   : > { %4067 = vmatpush1.bf16.msra.mxu1 %v7457_v54 }
 0x2df   : > { %4068 = vmatprep.subr.bf16.mxu1 %v7466_v59 }
 0x2e0   : > { %5859 = vmatpush1.bf16.msra.mxu0 %v8270_v24 }
 0x2e1   : > { %5860 = vmatprep.subr.bf16.mxu0 %v8275_v60  ;;  %4054 = vmatmul.mubr.bf16.gmra.mrb[20].mxu1 %v8697_v3  ;;  %v8293_v60 = vld [vmem:[#allocation9 + $0xc] ss:$16 sps:$4 sm:$0xff]  }
 0x2e2   : > { %4069 = vmatpush1.bf16.msra.mxu1 %v7465_v46  ;;  %4096 = vmatprep.mubr.bf16.mxu1 %v9027_v21 }
 0x2e3   : > { %4070 = vmatprep.subr.bf16.mxu1 %v7474_v62 }
 0x2e4   : > { %5861 = vmatpush1.bf16.msra.mxu0 %v8273_v2 }
 0x2e5   : > { %5862 = vmatprep.subr.bf16.mxu0 %v8278_v0 }
 0x2e6   : > { %4071 = vmatpush1.bf16.msra.mxu1 %v7473_v4 }
 0x2e7   : > { %4072 = vmatprep.subr.bf16.mxu1 %v7482_v7 }
 0x2e8   : > { %5863 = vmatpush1.bf16.msra.mxu0 %v8276_v6  ;;  %v8296_v6 = vld [vmem:[#allocation9 + $0x2c] ss:$16 sps:$4 sm:$0xff]  }
 0x2e9   : > { %5864 = vmatprep.subr.bf16.mxu0 %v8281_v58 }
 0x2ea   : > { %4073 = vmatpush1.bf16.msra.mxu1 %v7481_v27  ;;  %v8698_v27 = vld [vmem:[%s9351_s29 + $0x18] ss:$28 sps:$4 sm:$0xff]  }
 0x2eb   : > { %4074 = vmatprep.subr.bf16.mxu1 %v7490_v50 }
 0x2ec   : > { %5865 = vmatpush1.bf16.msra.mxu0 %v8279_v18  ;;  %v3674_v55 = vpop.f32.mrb[8].mxu1  ;;  %v8323_v18 = vld [vmem:[#allocation9 + $0x424] ss:$16 sps:$4 sm:$0xff]  }
 0x2ed   : > { %5866 = vmatprep.subr.bf16.mxu0 %v8284_v19  ;;  %v7850_v43 = vadd.f32 %v3674_v55, %v928_v56  ;;  %v3676_v33 = vpop.f32.mrb[9].mxu1  ;;  %v8294_v19 = vld [vmem:[#allocation9 + $0x28] ss:$16 sps:$4 sm:$0xff]  }
 0x2ee   : > { %v7851_v5 = vadd.f32 %v3676_v33, %v9562_v53  ;;  %v3678_v36 = vpop.f32.mrb[10].mxu1  ;;  %4075 = vmatpush1.bf16.msra.mxu1 %v7489_v63  ;;  %v8335_v33 = vld [vmem:[#allocation9 + $0x464] ss:$16 sps:$4 sm:$0xff]  }
 0x2ef   : > { %v4151_v35 = vmul.f32 0.2, %v7850_v43  ;;  %v7852_v49 = vadd.f32 %v3678_v36, %v928_v56  ;;  %v3680_v37 = vpop.f32.mrb[11].mxu1  ;;  %4076 = vmatprep.subr.bf16.mxu1 %v7498_v29  ;;  %vm4119_vm8 = vcmp.gt.f32.partialorder %v7850_v43, 0.0  ;;  %v8321_v29 = vld [vmem:[#allocation9 + $0x420] ss:$16 sps:$4 sm:$0xff]  }
 0x2f0   : > { %5867 = vmatpush1.bf16.msra.mxu0 %v8282_v26  ;;  %v4152_v40 = vmul.f32 0.2, %v7851_v5  ;;  %v7853_v41 = vadd.f32 %v3680_v37, %v9562_v53  ;;  %vm4120_vm9 = vcmp.gt.f32.partialorder %v7851_v5, 0.0  ;;  %v8305_v36 = vld [vmem:[#allocation9 + $0x8c] ss:$16 sps:$4 sm:$0xff]  }
 0x2f1   : > { %5868 = vmatprep.subr.bf16.mxu0 %v8287_v30  ;;  %vm4127_vm10 = vcmp.gt.f32.partialorder %v7852_v49, 0.0  ;;  %v4159_v10 = vmul.f32 0.2, %v7852_v49  ;;  %v4183_v48 = vsel %vm4119_vm8, %v7850_v43, %v4151_v35  ;;  %v8329_v30 = vld [vmem:[#allocation9 + $0x444] ss:$16 sps:$4 sm:$0xff]  }
 0x2f2   : > { %vm4128_vm11 = vcmp.gt.f32.partialorder %v7853_v41, 0.0  ;;  %v4160_v44 = vmul.f32 0.2, %v7853_v41  ;;  %4077 = vmatpush1.bf16.msra.mxu1 %v7497_v1  ;;  %v4184_v24 = vsel %vm4120_vm9, %v7851_v5, %v4152_v40  ;;  %v8699_v43 = vld [vmem:[%s9351_s29 + $0x50] ss:$28 sps:$4 sm:$0xff]  }
 0x2f3   : > { %v4191_v15 = vsel %vm4127_vm10, %v7852_v49, %v4159_v10  ;;  %4078 = vmatprep.subr.bf16.mxu1 %v7506_v25  ;;  %v8300_v5 = vld [vmem:[#allocation9 + $0x68] ss:$16 sps:$4 sm:$0xff]   ;;  %v8333_v1 = vld [vmem:[#allocation9 + $0x460] ss:$16 sps:$4 sm:$0xff]   ;;  %v8341_v35 = vld [vmem:[#allocation9 + $0x484] ss:$16 sps:$4 sm:$0xff]  }
 0x2f4   : > { %5869 = vmatpush1.bf16.msra.mxu0 %v8285_v38  ;;  %v9566_v54 = vpack.c.bf16 %v4191_v15, %v4183_v48  ;;  %v3684_v57 = vpop.f32.mrb[12].mxu1  ;;  %v4192_v59 = vsel %vm4128_vm11, %v7853_v41, %v4160_v44  ;;  %v8303_v49 = vld [vmem:[#allocation9 + $0x88] ss:$16 sps:$4 sm:$0xff]   ;;  %v8308_v37 = vld [vmem:[#allocation9 + $0xac] ss:$16 sps:$4 sm:$0xff]  }
 0x2f5   : > { %5870 = vmatprep.subr.bf16.mxu0 %v8290_v42  ;;  %v7854_v17 = vadd.f32 %v3684_v57, %v928_v56  ;;  %v3686_v46 = vpop.f32.mrb[13].mxu1  ;;  %v9568_v2 = vpack.c.bf16 %v4192_v59, %v4184_v24  ;;  %v8339_v38 = vld [vmem:[#allocation9 + $0x480] ss:$16 sps:$4 sm:$0xff]   ;;  %v8347_v25 = vld [vmem:[#allocation9 + $0x4a4] ss:$16 sps:$4 sm:$0xff]  }
 0x2f6   : > { %v7855_v62 = vadd.f32 %v3686_v46, %v9562_v53  ;;  %v3688_v0 = vpop.f32.mrb[14].mxu1  ;;  %4079 = vmatpush1.bf16.msra.mxu1 %v7505_v47  ;;  %v8306_v40 = vld [vmem:[#allocation9 + $0xa8] ss:$16 sps:$4 sm:$0xff]   ;;  %v8311_v41 = vld [vmem:[#allocation9 + $0xcc] ss:$16 sps:$4 sm:$0xff]  }
 0x2f7   : > { %v4167_v51 = vmul.f32 0.2, %v7854_v17  ;;  %v7856_v3 = vadd.f32 %v3688_v0, %v928_v56  ;;  %v3690_v4 = vpop.f32.mrb[15].mxu1  ;;  %5872 = vmatprep.mubr.bf16.mxu0 %v9568_v2  ;;  %vm4135_vm12 = vcmp.gt.f32.partialorder %v7854_v17, 0.0  ;;  %5999 = vmatprep.subr.bf16.mxu1 %v8293_v60  ;;  %v8299_v56 = vld [vmem:[#allocation9 + $0x4c] ss:$16 sps:$4 sm:$0xff]  }
 0x2f8   : > { %5871 = vmatpush1.bf16.msra.mxu0 %v8288_v52  ;;  %v4168_v7 = vmul.f32 0.2, %v7855_v62  ;;  %v7857_v58 = vadd.f32 %v3690_v4, %v9562_v53  ;;  %vm4136_vm13 = vcmp.gt.f32.partialorder %v7855_v62, 0.0  ;;  %v8353_v42 = vld [vmem:[#allocation9 + $0x4c4] ss:$16 sps:$4 sm:$0xff]  }
 0x2f9   : > { %5893 = vmatprep.subr.bf16.mxu0 %v8317_v61  ;;  %vm4143_vm14 = vcmp.gt.f32.partialorder %v7856_v3, 0.0  ;;  %v4175_v9 = vmul.f32 0.2, %v7856_v3  ;;  %4097 = vmatmul.mubr.bf16.vlgmr.msra.gmra.mrb[16].mxu1 %v8698_v27  ;;  %v4199_v22 = vsel %vm4135_vm12, %v7854_v17, %v4167_v51  ;;  %v8309_v10 = vld [vmem:[#allocation9 + $0xc8] ss:$16 sps:$4 sm:$0xff]  }
 0x2fa   : > { %vm4144_vm15 = vcmp.gt.f32.partialorder %v7857_v58, 0.0  ;;  %v4176_v50 = vmul.f32 0.2, %v7857_v58  ;;  %6000 = vmatpush1.bf16.msra.mxu1 %v8291_v20  ;;  %4106 = vmatprep.mubr.bf16.mxu1 %v9027_v21  ;;  %v4200_v53 = vsel %vm4136_vm13, %v7855_v62, %v4168_v7  ;;  %v8302_v21 = vld [vmem:[#allocation9 + $0x6c] ss:$16 sps:$4 sm:$0xff]  }
 0x2fb   : > { %5873 = vmatmul.mubr.bf16.vlgmr.msra.gmra.mrb[16].mxu0 %v9566_v54  ;;  %6001 = vmatprep.subr.bf16.mxu1 %v8296_v6  ;;  %v4207_v23 = vsel %vm4143_vm14, %v7856_v3, %v4175_v9  ;;  %v8314_v44 = vld [vmem:[#allocation9 + $0xec] ss:$16 sps:$4 sm:$0xff]   ;;  %v8351_v47 = vld [vmem:[#allocation9 + $0x4c0] ss:$16 sps:$4 sm:$0xff]   ;;  %v8359_v48 = vld [vmem:[#allocation9 + $0x4e4] ss:$16 sps:$4 sm:$0xff]  }
 0x2fc   : > { %v4208_v63 = vsel %vm4144_vm15, %v7857_v58, %v4176_v50  ;;  %v9578_v26 = vpack.c.bf16 %v4207_v23, %v4199_v22  ;;  %5894 = vmatpush1.bf16.msra.mxu0 %v8315_v8  ;;  %v8312_v15 = vld [vmem:[#allocation9 + $0xe8] ss:$16 sps:$4 sm:$0xff]   ;;  %v8320_v52 = vld [vmem:[#allocation9 + $0x10c] ss:$16 sps:$4 sm:$0xff]   ;;  %v8357_v57 = vld [vmem:[#allocation9 + $0x4e0] ss:$16 sps:$4 sm:$0xff]  }
 0x2fd   : > { %v9580_v55 = vpack.c.bf16 %v4208_v63, %v4200_v53  ;;  %5895 = vmatprep.subr.bf16.mxu0 %v8323_v18  ;;  %v8365_v24 = vld [vmem:[#allocation9 + $0x504] ss:$16 sps:$4 sm:$0xff]   ;;  %v8318_v59 = vld [vmem:[#allocation9 + $0x108] ss:$16 sps:$4 sm:$0xff]   ;;  %v8326_v60 = vld [vmem:[#allocation9 + $0x12c] ss:$16 sps:$4 sm:$0xff]  }
 0x2fe   : > { %6002 = vmatpush1.bf16.msra.mxu1 %v8294_v19  ;;  %v8363_v61 = vld [vmem:[#allocation9 + $0x500] ss:$16 sps:$4 sm:$0xff]   ;;  %v8371_v17 = vld [vmem:[#allocation9 + $0x524] ss:$16 sps:$4 sm:$0xff]   ;;  %v8324_v46 = vld [vmem:[#allocation9 + $0x128] ss:$16 sps:$4 sm:$0xff]  }
 0x2ff   : > { %5882 = vmatprep.mubr.bf16.mxu0 %v9580_v55  ;;  %6003 = vmatprep.subr.bf16.mxu1 %v8299_v56  ;;  %v8332_v62 = vld [vmem:[#allocation9 + $0x14c] ss:$16 sps:$4 sm:$0xff]   ;;  %v8369_v0 = vld [vmem:[#allocation9 + $0x520] ss:$16 sps:$4 sm:$0xff]   ;;  %v8377_v20 = vld [vmem:[#allocation9 + $0x544] ss:$16 sps:$4 sm:$0xff]  }
 0x300   : > { %5896 = vmatpush1.bf16.msra.mxu0 %v8321_v29  ;;  %v8330_v51 = vld [vmem:[#allocation9 + $0x148] ss:$16 sps:$4 sm:$0xff]   ;;  %v8338_v3 = vld [vmem:[#allocation9 + $0x16c] ss:$16 sps:$4 sm:$0xff]   ;;  %v8375_v4 = vld [vmem:[#allocation9 + $0x540] ss:$16 sps:$4 sm:$0xff]  }
 0x301   : > { %4107 = vmatmul.mubr.bf16.gmra.mrb[20].mxu1 %v8699_v43  ;;  %5897 = vmatprep.subr.bf16.mxu0 %v8329_v30  ;;  %v8383_v6 = vld [vmem:[#allocation9 + $0x564] ss:$16 sps:$4 sm:$0xff]   ;;  %v8336_v7 = vld [vmem:[#allocation9 + $0x168] ss:$16 sps:$4 sm:$0xff]   ;;  %v8344_v58 = vld [vmem:[#allocation9 + $0x18c] ss:$16 sps:$4 sm:$0xff]  }
 0x302   : > { %6004 = vmatpush1.bf16.msra.mxu1 %v8297_v31  ;;  %6031 = vmatprep.mubr.bf16.mxu1 %v9528_v13  ;;  %v8345_v13 = vld [vmem:[#allocation9 + $0x4a0] ss:$16 sps:$4 sm:$0xff]   ;;  %v8389_v9 = vld [vmem:[#allocation9 + $0x584] ss:$16 sps:$4 sm:$0xff]   ;;  %v8342_v27 = vld [vmem:[#allocation9 + $0x188] ss:$16 sps:$4 sm:$0xff]  }
 0x303   : > { %5883 = vmatmul.mubr.bf16.gmra.mrb[20].mxu0 %v9578_v26  ;;  %6005 = vmatprep.subr.bf16.mxu1 %v8302_v21  ;;  %v8381_v8 = vld [vmem:[#allocation9 + $0x560] ss:$16 sps:$4 sm:$0xff]   ;;  %v8350_v18 = vld [vmem:[#allocation9 + $0x1ac] ss:$16 sps:$4 sm:$0xff]   ;;  %v8395_v19 = vld [vmem:[#allocation9 + $0x5a4] ss:$16 sps:$4 sm:$0xff]  }
 0x304   : > { %5898 = vmatpush1.bf16.msra.mxu0 %v8327_v32  ;;  %v8387_v50 = vld [vmem:[#allocation9 + $0x580] ss:$16 sps:$4 sm:$0xff]   ;;  %v8348_v22 = vld [vmem:[#allocation9 + $0x1a8] ss:$16 sps:$4 sm:$0xff]   ;;  %v8356_v23 = vld [vmem:[#allocation9 + $0x1cc] ss:$16 sps:$4 sm:$0xff]  }
 0x305   : > { %5899 = vmatprep.subr.bf16.mxu0 %v8335_v33  ;;  %v8393_v56 = vld [vmem:[#allocation9 + $0x5a0] ss:$16 sps:$4 sm:$0xff]   ;;  %v8401_v53 = vld [vmem:[#allocation9 + $0x5c4] ss:$16 sps:$4 sm:$0xff]   ;;  %v8354_v63 = vld [vmem:[#allocation9 + $0x1c8] ss:$16 sps:$4 sm:$0xff]  }
 0x306   : > { %6006 = vmatpush1.bf16.msra.mxu1 %v8300_v5  ;;  %v8362_v29 = vld [vmem:[#allocation9 + $0x1ec] ss:$16 sps:$4 sm:$0xff]   ;;  %v8399_v30 = vld [vmem:[#allocation9 + $0x5c0] ss:$16 sps:$4 sm:$0xff]   ;;  %v8407_v31 = vld [vmem:[#allocation9 + $0x5e4] ss:$16 sps:$4 sm:$0xff]  }
 0x307   : > { %6007 = vmatprep.subr.bf16.mxu1 %v8305_v36  ;;  %v8360_v21 = vld [vmem:[#allocation9 + $0x1e8] ss:$16 sps:$4 sm:$0xff]   ;;  %v8368_v32 = vld [vmem:[#allocation9 + $0x20c] ss:$16 sps:$4 sm:$0xff]   ;;  %v8405_v43 = vld [vmem:[#allocation9 + $0x5e0] ss:$16 sps:$4 sm:$0xff]  }
 0x308   : > { %5900 = vmatpush1.bf16.msra.mxu0 %v8333_v1  ;;  %v8461_v33 = vld [vmem:[#allocation9 + $0x604] ss:$16 sps:$4 sm:$0xff]   ;;  %v8366_v5 = vld [vmem:[#allocation9 + $0x208] ss:$16 sps:$4 sm:$0xff]   ;;  %v8374_v36 = vld [vmem:[#allocation9 + $0x22c] ss:$16 sps:$4 sm:$0xff]  }
 0x309   : > { %5901 = vmatprep.subr.bf16.mxu0 %v8341_v35  ;;  %v8372_v1 = vld [vmem:[#allocation9 + $0x228] ss:$16 sps:$4 sm:$0xff]   ;;  %v8380_v35 = vld [vmem:[#allocation9 + $0x24c] ss:$16 sps:$4 sm:$0xff]  }
 0x30a   : > { %6008 = vmatpush1.bf16.msra.mxu1 %v8303_v49  ;;  %v8378_v49 = vld [vmem:[#allocation9 + $0x248] ss:$16 sps:$4 sm:$0xff]  }
 0x30b   : > { %6009 = vmatprep.subr.bf16.mxu1 %v8308_v37  ;;  %v8386_v37 = vld [vmem:[#allocation9 + $0x26c] ss:$16 sps:$4 sm:$0xff]  }
 0x30c   : > { %5902 = vmatpush1.bf16.msra.mxu0 %v8339_v38  ;;  %v8384_v38 = vld [vmem:[#allocation9 + $0x268] ss:$16 sps:$4 sm:$0xff]  }
 0x30d   : > { %5903 = vmatprep.subr.bf16.mxu0 %v8347_v25  ;;  %v8392_v25 = vld [vmem:[#allocation9 + $0x28c] ss:$16 sps:$4 sm:$0xff]  }
 0x30e   : > { %6010 = vmatpush1.bf16.msra.mxu1 %v8306_v40  ;;  %v939_v40 = vsub.s32 5, %v9488_v28 }
 0x30f   : > { %6011 = vmatprep.subr.bf16.mxu1 %v8311_v41  ;;  %v8398_v41 = vld [vmem:[#allocation9 + $0x2ac] ss:$16 sps:$4 sm:$0xff]  }
 0x310   : > { %5904 = vmatpush1.bf16.msra.mxu0 %v8345_v13  ;;  %v9592_v13 = vld [vmem:[#allocation8] sm:$0xff] }
 0x311   : > { %5905 = vmatprep.subr.bf16.mxu0 %v8353_v42 }
 0x312   : > { %6012 = vmatpush1.bf16.msra.mxu1 %v8309_v10  ;;  %v940_v10 = vrot.slane %v9592_v13, %v939_v40  ;;  %v8471_v40 = vld [vmem:[#allocation9 + $0x640] ss:$16 sps:$4 sm:$0xff]  }
 0x313   : > { %6013 = vmatprep.subr.bf16.mxu1 %v8314_v44 }
 0x314   : > { %5906 = vmatpush1.bf16.msra.mxu0 %v8351_v47 }
 0x315   : > { %5907 = vmatprep.subr.bf16.mxu0 %v8359_v48 }
 0x316   : > { %6014 = vmatpush1.bf16.msra.mxu1 %v8312_v15  ;;  %v8402_v15 = vld [vmem:[#allocation9 + $0x2c8] ss:$16 sps:$4 sm:$0xff]  }
 0x317   : > { %6015 = vmatprep.subr.bf16.mxu1 %v8320_v52 }
 0x318   : > { %5908 = vmatpush1.bf16.msra.mxu0 %v8357_v57 }
 0x319   : > { %5909 = vmatprep.subr.bf16.mxu0 %v8365_v24  ;;  %v8410_v24 = vld [vmem:[#allocation9 + $0x2ec] ss:$16 sps:$4 sm:$0xff]  }
 0x31a   : > { %6016 = vmatpush1.bf16.msra.mxu1 %v8318_v59 }
 0x31b   : > { %6017 = vmatprep.subr.bf16.mxu1 %v8326_v60 }
 0x31c   : > { %5910 = vmatpush1.bf16.msra.mxu0 %v8363_v61 }
 0x31d   : > { %5911 = vmatprep.subr.bf16.mxu0 %v8371_v17 }
 0x31e   : > { %6018 = vmatpush1.bf16.msra.mxu1 %v8324_v46 }
 0x31f   : > { %6019 = vmatprep.subr.bf16.mxu1 %v8332_v62 }
 0x320   : > { %5912 = vmatpush1.bf16.msra.mxu0 %v8369_v0  ;;  %v8408_v0 = vld [vmem:[#allocation9 + $0x2e8] ss:$16 sps:$4 sm:$0xff]  }
 0x321   : > { %5913 = vmatprep.subr.bf16.mxu0 %v8377_v20 }
 0x322   : > { %6020 = vmatpush1.bf16.msra.mxu1 %v8330_v51  ;;  %v8413_v51 = vld [vmem:[#allocation9 + $0x30c] ss:$16 sps:$4 sm:$0xff]  }
 0x323   : > { %6021 = vmatprep.subr.bf16.mxu1 %v8338_v3 }
 0x324   : > { %5914 = vmatpush1.bf16.msra.mxu0 %v8375_v4 }
 0x325   : > { %5915 = vmatprep.subr.bf16.mxu0 %v8383_v6 }
 0x326   : > { %6022 = vmatpush1.bf16.msra.mxu1 %v8336_v7 }
 0x327   : > { %6023 = vmatprep.subr.bf16.mxu1 %v8344_v58 }
 0x328   : > { %5916 = vmatpush1.bf16.msra.mxu0 %v8381_v8 }
 0x329   : > { %5917 = vmatprep.subr.bf16.mxu0 %v8389_v9 }
 0x32a   : > { %6024 = vmatpush1.bf16.msra.mxu1 %v8342_v27 }
 0x32b   : > { %6025 = vmatprep.subr.bf16.mxu1 %v8350_v18 }
 0x32c   : > { %5918 = vmatpush1.bf16.msra.mxu0 %v8387_v50  ;;  %v8411_v50 = vld [vmem:[#allocation9 + $0x308] ss:$16 sps:$4 sm:$0xff]  }
 0x32d   : > { %5919 = vmatprep.subr.bf16.mxu0 %v8395_v19  ;;  %v8459_v19 = vld [vmem:[#allocation9 + $0x600] ss:$16 sps:$4 sm:$0xff]  }
 0x32e   : > { %6026 = vmatpush1.bf16.msra.mxu1 %v8348_v22 }
 0x32f   : > { %6027 = vmatprep.subr.bf16.mxu1 %v8356_v23 }
 0x330   : > { %5920 = vmatpush1.bf16.msra.mxu0 %v8393_v56  ;;  %v8416_v56 = vld [vmem:[#allocation9 + $0x32c] ss:$16 sps:$4 sm:$0xff]  }
 0x331   : > { %5921 = vmatprep.subr.bf16.mxu0 %v8401_v53  ;;  %v8467_v53 = vld [vmem:[#allocation9 + $0x624] ss:$16 sps:$4 sm:$0xff]  }
 0x332   : > { %6028 = vmatpush1.bf16.msra.mxu1 %v8354_v63 }
 0x333   : > { %6029 = vmatprep.subr.bf16.mxu1 %v8362_v29 }
 0x334   : > { %5922 = vmatpush1.bf16.msra.mxu0 %v8399_v30 }
 0x335   : > { %5923 = vmatprep.subr.bf16.mxu0 %v8407_v31  ;;  %v8414_v31 = vld [vmem:[#allocation9 + $0x328] ss:$16 sps:$4 sm:$0xff]  }
 0x336   : > { %6030 = vmatpush1.bf16.msra.mxu1 %v8360_v21 }
 0x337   : > { %6052 = vmatprep.subr.bf16.mxu1 %v8368_v32 }
 0x338   : > { %5924 = vmatpush1.bf16.msra.mxu0 %v8405_v43  ;;  %v8419_v43 = vld [vmem:[#allocation9 + $0x34c] ss:$16 sps:$4 sm:$0xff]  }
 0x339   : > { %6032 = vmatmul.mubr.bf16.vlgmr.msra.gmra.mrb[24].mxu1 %v9522_v39  ;;  %5946 = vmatprep.subr.bf16.mxu0 %v8461_v33  ;;  %v8390_v39 = vld [vmem:[#allocation9 + $0x288] ss:$16 sps:$4 sm:$0xff]  }
 0x33a   : > { %6041 = vmatprep.mubr.bf16.mxu1 %v9538_v16  ;;  %6053 = vmatpush1.bf16.msra.mxu1 %v8366_v5  ;;  %v935_v16 = vsub.s32 4, %v9488_v28  ;;  %v8465_v5 = vld [vmem:[#allocation9 + $0x620] ss:$16 sps:$4 sm:$0xff]  }
 0x33b   : > { %6054 = vmatprep.subr.bf16.mxu1 %v8374_v36 }
 0x33c   : > { %v936_v42 = vrot.slane %v9592_v13, %v935_v16  ;;  %v8417_v16 = vld [vmem:[#allocation9 + $0x348] ss:$16 sps:$4 sm:$0xff]  }
 0x33e   : > { %6055 = vmatpush1.bf16.msra.mxu1 %v8372_v1  ;;  %v8473_v1 = vld [vmem:[#allocation9 + $0x644] ss:$16 sps:$4 sm:$0xff]  }
 0x33f   : > { %6056 = vmatprep.subr.bf16.mxu1 %v8380_v35 }
 0x341   : > { %6042 = vmatmul.mubr.bf16.gmra.mrb[28].mxu1 %v9536_v45  ;;  %v8396_v45 = vld [vmem:[#allocation9 + $0x2a8] ss:$16 sps:$4 sm:$0xff]  }
 0x342   : > { %6057 = vmatpush1.bf16.msra.mxu1 %v8378_v49  ;;  %6084 = vmatprep.mubr.bf16.mxu1 %v9568_v2  ;;  %v8404_v2 = vld [vmem:[#allocation9 + $0x2cc] ss:$16 sps:$4 sm:$0xff]  }
 0x343   : > { %6058 = vmatprep.subr.bf16.mxu1 %v8386_v37 }
 0x346   : > { %6059 = vmatpush1.bf16.msra.mxu1 %v8384_v38 }
 0x347   : > { %6060 = vmatprep.subr.bf16.mxu1 %v8392_v25 }
 0x34a   : > { %6061 = vmatpush1.bf16.msra.mxu1 %v8390_v39 }
 0x34b   : > { %6062 = vmatprep.subr.bf16.mxu1 %v8398_v41  ;;  %v8422_v41 = vld [vmem:[#allocation9 + $0x36c] ss:$16 sps:$4 sm:$0xff]  }
 0x34e   : > { %v3886_v44 = vpop.f32.mrb[8].mxu0  ;;  %6063 = vmatpush1.bf16.msra.mxu1 %v8396_v45  ;;  %v8420_v45 = vld [vmem:[#allocation9 + $0x368] ss:$16 sps:$4 sm:$0xff]  }
 0x34f   : > { %v7858_v47 = vadd.f32 %v3886_v44, %v936_v42  ;;  %v3888_v48 = vpop.f32.mrb[9].mxu0  ;;  %6064 = vmatprep.subr.bf16.mxu1 %v8404_v2  ;;  %v8425_v2 = vld [vmem:[#allocation9 + $0x38c] ss:$16 sps:$4 sm:$0xff]   ;;  %v8485_v44 = vld [vmem:[#allocation9 + $0x684] ss:$16 sps:$4 sm:$0xff]  }
 0x350   : > { %v7859_v52 = vadd.f32 %v3888_v48, %v940_v10  ;;  %v3890_v57 = vpop.f32.mrb[10].mxu0  ;;  %v8483_v48 = vld [vmem:[#allocation9 + $0x680] ss:$16 sps:$4 sm:$0xff]  }
 0x351   : > { %v4153_v59 = vmul.f32 0.2, %v7858_v47  ;;  %v7860_v60 = vadd.f32 %v3890_v57, %v936_v42  ;;  %v3892_v61 = vpop.f32.mrb[11].mxu0  ;;  %vm4121_vm0 = vcmp.gt.f32.partialorder %v7858_v47, 0.0  ;;  %v8426_v57 = vld [vmem:[#allocation9 + $0x3a8] ss:$16 sps:$4 sm:$0xff]  }
 0x352   : > { %v4154_v17 = vmul.f32 0.2, %v7859_v52  ;;  %v7861_v46 = vadd.f32 %v3892_v61, %v940_v10  ;;  %vm4122_vm1 = vcmp.gt.f32.partialorder %v7859_v52, 0.0  ;;  %6065 = vmatpush1.bf16.msra.mxu1 %v8402_v15  ;;  %v8428_v15 = vld [vmem:[#allocation9 + $0x3ac] ss:$16 sps:$4 sm:$0xff]  }
 0x353   : > { %vm4129_vm2 = vcmp.gt.f32.partialorder %v7860_v60, 0.0  ;;  %v4161_v62 = vmul.f32 0.2, %v7860_v60  ;;  %6066 = vmatprep.subr.bf16.mxu1 %v8410_v24  ;;  %v4185_v3 = vsel %vm4121_vm0, %v7858_v47, %v4153_v59  ;;  %v8423_v47 = vld [vmem:[#allocation9 + $0x388] ss:$16 sps:$4 sm:$0xff]  }
 0x354   : > { %vm4130_vm3 = vcmp.gt.f32.partialorder %v7861_v46, 0.0  ;;  %v4162_v20 = vmul.f32 0.2, %v7861_v46  ;;  %v4186_v58 = vsel %vm4122_vm1, %v7859_v52, %v4154_v17  ;;  %v8491_v52 = vld [vmem:[#allocation9 + $0x6a4] ss:$16 sps:$4 sm:$0xff]  }
 0x355   : > { %v4193_v4 = vsel %vm4129_vm2, %v7860_v60, %v4161_v62  ;;  %v8489_v24 = vld [vmem:[#allocation9 + $0x6a0] ss:$16 sps:$4 sm:$0xff]   ;;  %v8431_v59 = vld [vmem:[#allocation9 + $0x3cc] ss:$16 sps:$4 sm:$0xff]   ;;  %v8497_v60 = vld [vmem:[#allocation9 + $0x6c4] ss:$16 sps:$4 sm:$0xff]  }
 0x356   : > { %v9596_v6 = vpack.c.bf16 %v4193_v4, %v4185_v3  ;;  %v3896_v7 = vpop.f32.mrb[12].mxu0  ;;  %v4194_v8 = vsel %vm4130_vm3, %v7861_v46, %v4162_v20  ;;  %6067 = vmatpush1.bf16.msra.mxu1 %v8408_v0  ;;  %v8429_v61 = vld [vmem:[#allocation9 + $0x3c8] ss:$16 sps:$4 sm:$0xff]   ;;  %v8495_v17 = vld [vmem:[#allocation9 + $0x6c0] ss:$16 sps:$4 sm:$0xff]  }
 0x357   : > { %v7862_v9 = vadd.f32 %v3896_v7, %v936_v42  ;;  %v3898_v27 = vpop.f32.mrb[13].mxu0  ;;  %v9598_v18 = vpack.c.bf16 %v4194_v8, %v4186_v58  ;;  %6068 = vmatprep.subr.bf16.mxu1 %v8413_v51  ;;  %v8434_v46 = vld [vmem:[#allocation9 + $0x3ec] ss:$16 sps:$4 sm:$0xff]   ;;  %v8503_v62 = vld [vmem:[#allocation9 + $0x6e4] ss:$16 sps:$4 sm:$0xff]  }
 0x358   : > { %v7863_v22 = vadd.f32 %v3898_v27, %v940_v10  ;;  %v3900_v23 = vpop.f32.mrb[14].mxu0  ;;  %v8432_v0 = vld [vmem:[#allocation9 + $0x3e8] ss:$16 sps:$4 sm:$0xff]   ;;  %v8501_v20 = vld [vmem:[#allocation9 + $0x6e0] ss:$16 sps:$4 sm:$0xff]  }
 0x359   : > { %v4169_v63 = vmul.f32 0.2, %v7862_v9  ;;  %v7864_v29 = vadd.f32 %v3900_v23, %v936_v42  ;;  %v3902_v30 = vpop.f32.mrb[15].mxu0  ;;  %5925 = vmatprep.mubr.bf16.mxu0 %v9598_v18  ;;  %vm4137_vm4 = vcmp.gt.f32.partialorder %v7862_v9, 0.0  ;;  %v8479_v42 = vld [vmem:[#allocation9 + $0x664] ss:$16 sps:$4 sm:$0xff]  }
 0x35a   : > { %v4170_v21 = vmul.f32 0.2, %v7863_v22  ;;  %v7865_v32 = vadd.f32 %v3902_v30, %v940_v10  ;;  %5926 = vmatmul.mubr.bf16.vlgmr.msra.gmra.mrb[16].mxu0 %v9596_v6  ;;  %vm4138_vm5 = vcmp.gt.f32.partialorder %v7863_v22, 0.0  ;;  %6069 = vmatpush1.bf16.msra.mxu1 %v8411_v50  ;;  %v8477_v10 = vld [vmem:[#allocation9 + $0x660] ss:$16 sps:$4 sm:$0xff]  }
 0x35b   : > { %vm4145_vm6 = vcmp.gt.f32.partialorder %v7864_v29, 0.0  ;;  %v4177_v33 = vmul.f32 0.2, %v7864_v29  ;;  %5947 = vmatpush1.bf16.msra.mxu0 %v8459_v19  ;;  %6070 = vmatprep.subr.bf16.mxu1 %v8416_v56  ;;  %v4201_v35 = vsel %vm4137_vm4, %v7862_v9, %v4169_v63  ;;  %v8437_v51 = vld [vmem:[#allocation9 + $0x40c] ss:$16 sps:$4 sm:$0xff]  }
 0x35c   : > { %vm4146_vm7 = vcmp.gt.f32.partialorder %v7865_v32, 0.0  ;;  %v4178_v36 = vmul.f32 0.2, %v7865_v32  ;;  %5948 = vmatprep.subr.bf16.mxu0 %v8467_v53  ;;  %v4202_v37 = vsel %vm4138_vm5, %v7863_v22, %v4170_v21  ;;  %v8509_v3 = vld [vmem:[#allocation9 + $0x704] ss:$16 sps:$4 sm:$0xff]  }
 0x35d   : > { %v4209_v49 = vsel %vm4145_vm6, %v7864_v29, %v4177_v33  ;;  %v8435_v4 = vld [vmem:[#allocation9 + $0x408] ss:$16 sps:$4 sm:$0xff]   ;;  %v8440_v7 = vld [vmem:[#allocation9 + $0x42c] ss:$16 sps:$4 sm:$0xff]   ;;  %v8507_v58 = vld [vmem:[#allocation9 + $0x700] ss:$16 sps:$4 sm:$0xff]  }
 0x35e   : > { %v4210_v38 = vsel %vm4146_vm7, %v7865_v32, %v4178_v36  ;;  %v9603_v25 = vpack.c.bf16 %v4209_v49, %v4201_v35  ;;  %6071 = vmatpush1.bf16.msra.mxu1 %v8414_v31  ;;  %v8515_v8 = vld [vmem:[#allocation9 + $0x724] ss:$16 sps:$4 sm:$0xff]   ;;  %v8438_v9 = vld [vmem:[#allocation9 + $0x428] ss:$16 sps:$4 sm:$0xff]   ;;  %v8443_v27 = vld [vmem:[#allocation9 + $0x44c] ss:$16 sps:$4 sm:$0xff]  }
 0x35f   : > { %v9605_v39 = vpack.c.bf16 %v4210_v38, %v4202_v37  ;;  %5949 = vmatpush1.bf16.msra.mxu0 %v8465_v5  ;;  %6072 = vmatprep.subr.bf16.mxu1 %v8419_v43  ;;  %v8513_v50 = vld [vmem:[#allocation9 + $0x720] ss:$16 sps:$4 sm:$0xff]   ;;  %v8521_v19 = vld [vmem:[#allocation9 + $0x744] ss:$16 sps:$4 sm:$0xff]   ;;  %v8441_v22 = vld [vmem:[#allocation9 + $0x448] ss:$16 sps:$4 sm:$0xff]  }
 0x360   : > { %5950 = vmatprep.subr.bf16.mxu0 %v8473_v1  ;;  %v8446_v23 = vld [vmem:[#allocation9 + $0x46c] ss:$16 sps:$4 sm:$0xff]   ;;  %v8519_v56 = vld [vmem:[#allocation9 + $0x740] ss:$16 sps:$4 sm:$0xff]   ;;  %v8527_v53 = vld [vmem:[#allocation9 + $0x764] ss:$16 sps:$4 sm:$0xff]  }
 0x361   : > { %5935 = vmatprep.mubr.bf16.mxu0 %v9605_v39  ;;  %v8525_v63 = vld [vmem:[#allocation9 + $0x760] ss:$16 sps:$4 sm:$0xff]   ;;  %v8533_v29 = vld [vmem:[#allocation9 + $0x784] ss:$16 sps:$4 sm:$0xff]   ;;  %v8447_v30 = vld [vmem:[#allocation9 + $0x488] ss:$16 sps:$4 sm:$0xff]  }
 0x362   : > { %5936 = vmatmul.mubr.bf16.gmra.mrb[20].mxu0 %v9603_v25  ;;  %6073 = vmatpush1.bf16.msra.mxu1 %v8417_v16  ;;  %v8452_v31 = vld [vmem:[#allocation9 + $0x4ac] ss:$16 sps:$4 sm:$0xff]   ;;  %v8531_v21 = vld [vmem:[#allocation9 + $0x780] ss:$16 sps:$4 sm:$0xff]   ;;  %v8539_v32 = vld [vmem:[#allocation9 + $0x7a4] ss:$16 sps:$4 sm:$0xff]  }
 0x363   : > { %5951 = vmatpush1.bf16.msra.mxu0 %v8471_v40  ;;  %6074 = vmatprep.subr.bf16.mxu1 %v8422_v41  ;;  %v8455_v43 = vld [vmem:[#allocation9 + $0x4cc] ss:$16 sps:$4 sm:$0xff]   ;;  %v8545_v33 = vld [vmem:[#allocation9 + $0x7c4] ss:$16 sps:$4 sm:$0xff]   ;;  %v8453_v5 = vld [vmem:[#allocation9 + $0x4c8] ss:$16 sps:$4 sm:$0xff]  }
 0x364   : > { %5952 = vmatprep.subr.bf16.mxu0 %v8479_v42  ;;  %v8458_v36 = vld [vmem:[#allocation9 + $0x4ec] ss:$16 sps:$4 sm:$0xff]   ;;  %v8543_v1 = vld [vmem:[#allocation9 + $0x7c0] ss:$16 sps:$4 sm:$0xff]   ;;  %v8551_v35 = vld [vmem:[#allocation9 + $0x7e4] ss:$16 sps:$4 sm:$0xff]  }
 0x365   : > { %v8456_v49 = vld [vmem:[#allocation9 + $0x4e8] ss:$16 sps:$4 sm:$0xff]   ;;  %v8464_v37 = vld [vmem:[#allocation9 + $0x50c] ss:$16 sps:$4 sm:$0xff]   ;;  %v8549_v38 = vld [vmem:[#allocation9 + $0x7e0] ss:$16 sps:$4 sm:$0xff]  }
 0x366   : > { %6075 = vmatpush1.bf16.msra.mxu1 %v8420_v45  ;;  %v8581_v16 = vld [vmem:[#allocation12 + $0x4] ss:$8 sps:$4 sm:$0xff]   ;;  %v8470_v41 = vld [vmem:[#allocation9 + $0x52c] ss:$16 sps:$4 sm:$0xff]  }
 0x367   : > { %5953 = vmatpush1.bf16.msra.mxu0 %v8477_v10  ;;  %6076 = vmatprep.subr.bf16.mxu1 %v8425_v2  ;;  %v8462_v40 = vld [vmem:[#allocation9 + $0x508] ss:$16 sps:$4 sm:$0xff]   ;;  %v8476_v45 = vld [vmem:[#allocation9 + $0x54c] ss:$16 sps:$4 sm:$0xff]  }
 0x368   : > { %5954 = vmatprep.subr.bf16.mxu0 %v8485_v44  ;;  %v8468_v42 = vld [vmem:[#allocation9 + $0x528] ss:$16 sps:$4 sm:$0xff]   ;;  %v8482_v2 = vld [vmem:[#allocation9 + $0x56c] ss:$16 sps:$4 sm:$0xff]  }
 0x369   : > { %v8474_v10 = vld [vmem:[#allocation9 + $0x548] ss:$16 sps:$4 sm:$0xff]  }
 0x36a   : > { %6077 = vmatpush1.bf16.msra.mxu1 %v8423_v47  ;;  %v8480_v44 = vld [vmem:[#allocation9 + $0x568] ss:$16 sps:$4 sm:$0xff]   ;;  %v8488_v47 = vld [vmem:[#allocation9 + $0x58c] ss:$16 sps:$4 sm:$0xff]  }
 0x36b   : > { %5955 = vmatpush1.bf16.msra.mxu0 %v8483_v48  ;;  %6078 = vmatprep.subr.bf16.mxu1 %v8428_v15  ;;  %v8486_v48 = vld [vmem:[#allocation9 + $0x588] ss:$16 sps:$4 sm:$0xff]   ;;  %v8494_v15 = vld [vmem:[#allocation9 + $0x5ac] ss:$16 sps:$4 sm:$0xff]  }
 0x36c   : > { %5956 = vmatprep.subr.bf16.mxu0 %v8491_v52  ;;  %v8492_v52 = vld [vmem:[#allocation9 + $0x5a8] ss:$16 sps:$4 sm:$0xff]  }
 0x36e   : > { %6079 = vmatpush1.bf16.msra.mxu1 %v8426_v57  ;;  %v8500_v57 = vld [vmem:[#allocation9 + $0x5cc] ss:$16 sps:$4 sm:$0xff]  }
 0x36f   : > { %5957 = vmatpush1.bf16.msra.mxu0 %v8489_v24  ;;  %6080 = vmatprep.subr.bf16.mxu1 %v8431_v59  ;;  %v8498_v24 = vld [vmem:[#allocation9 + $0x5c8] ss:$16 sps:$4 sm:$0xff]   ;;  %v8506_v59 = vld [vmem:[#allocation9 + $0x5ec] ss:$16 sps:$4 sm:$0xff]  }
 0x370   : > { %5958 = vmatprep.subr.bf16.mxu0 %v8497_v60  ;;  %v8504_v60 = vld [vmem:[#allocation9 + $0x5e8] ss:$16 sps:$4 sm:$0xff]  }
 0x372   : > { %6081 = vmatpush1.bf16.msra.mxu1 %v8429_v61  ;;  %v8512_v61 = vld [vmem:[#allocation9 + $0x60c] ss:$16 sps:$4 sm:$0xff]  }
 0x373   : > { %5959 = vmatpush1.bf16.msra.mxu0 %v8495_v17  ;;  %6082 = vmatprep.subr.bf16.mxu1 %v8434_v46  ;;  %v8510_v17 = vld [vmem:[#allocation9 + $0x608] ss:$16 sps:$4 sm:$0xff]   ;;  %v8518_v46 = vld [vmem:[#allocation9 + $0x62c] ss:$16 sps:$4 sm:$0xff]  }
 0x374   : > { %5960 = vmatprep.subr.bf16.mxu0 %v8503_v62  ;;  %v8516_v62 = vld [vmem:[#allocation9 + $0x628] ss:$16 sps:$4 sm:$0xff]  }
 0x376   : > { %6083 = vmatpush1.bf16.msra.mxu1 %v8432_v0  ;;  %v8524_v0 = vld [vmem:[#allocation9 + $0x64c] ss:$16 sps:$4 sm:$0xff]  }
 0x377   : > { %5961 = vmatpush1.bf16.msra.mxu0 %v8501_v20  ;;  %6105 = vmatprep.subr.bf16.mxu1 %v8437_v51  ;;  %v8522_v20 = vld [vmem:[#allocation9 + $0x648] ss:$16 sps:$4 sm:$0xff]   ;;  %v8530_v51 = vld [vmem:[#allocation9 + $0x66c] ss:$16 sps:$4 sm:$0xff]  }
 0x378   : > { %5962 = vmatprep.subr.bf16.mxu0 %v8509_v3  ;;  %v8528_v3 = vld [vmem:[#allocation9 + $0x668] ss:$16 sps:$4 sm:$0xff]  }
 0x379   : > { %6085 = vmatmul.mubr.bf16.vlgmr.msra.gmra.mrb[24].mxu1 %v9566_v54  ;;  %v8444_v54 = vld [vmem:[#allocation9 + $0x468] ss:$16 sps:$4 sm:$0xff]  }
 0x37a   : > { %6094 = vmatprep.mubr.bf16.mxu1 %v9580_v55  ;;  %6106 = vmatpush1.bf16.msra.mxu1 %v8435_v4  ;;  %v8449_v55 = vld [vmem:[#allocation9 + $0x48c] ss:$16 sps:$4 sm:$0xff]  }
 0x37b   : > { %6107 = vmatprep.subr.bf16.mxu1 %v8440_v7  ;;  %5963 = vmatpush1.bf16.msra.mxu0 %v8507_v58  ;;  %v8536_v4 = vld [vmem:[#allocation9 + $0x68c] ss:$16 sps:$4 sm:$0xff]   ;;  %v943_v7 = vsub.s32 6, %v9488_v28 }
 0x37c   : > { %5964 = vmatprep.subr.bf16.mxu0 %v8515_v8  ;;  %v8542_v58 = vld [vmem:[#allocation9 + $0x6ac] ss:$16 sps:$4 sm:$0xff]  }
 0x37d   : > { %v944_v8 = vrot.slane %v9592_v13, %v943_v7  ;;  %v8566_v7 = vld [vmem:[#allocation9 + $0x76c] ss:$16 sps:$4 sm:$0xff]  }
 0x37e   : > { %6108 = vmatpush1.bf16.msra.mxu1 %v8438_v9 }
 0x37f   : > { %6109 = vmatprep.subr.bf16.mxu1 %v8443_v27  ;;  %5965 = vmatpush1.bf16.msra.mxu0 %v8513_v50  ;;  %v8540_v27 = vld [vmem:[#allocation9 + $0x6a8] ss:$16 sps:$4 sm:$0xff]  }
 0x380   : > { %5966 = vmatprep.subr.bf16.mxu0 %v8521_v19 }
 0x381   : > { %6095 = vmatmul.mubr.bf16.gmra.mrb[28].mxu1 %v9578_v26  ;;  %v8450_v26 = vld [vmem:[#allocation9 + $0x4a8] ss:$16 sps:$4 sm:$0xff]  }
 0x382   : > { %6110 = vmatpush1.bf16.msra.mxu1 %v8441_v22  ;;  %6137 = vmatprep.mubr.bf16.mxu1 %v9598_v18  ;;  %v8537_v18 = vld [vmem:[#allocation9 + $0x7a0] ss:$16 sps:$4 sm:$0xff]  }
 0x383   : > { %6111 = vmatprep.subr.bf16.mxu1 %v8446_v23  ;;  %5967 = vmatpush1.bf16.msra.mxu0 %v8519_v56 }
 0x384   : > { %5968 = vmatprep.subr.bf16.mxu0 %v8527_v53  ;;  %v8546_v53 = vld [vmem:[#allocation9 + $0x6c8] ss:$16 sps:$4 sm:$0xff]  }
 0x386   : > { %6112 = vmatpush1.bf16.msra.mxu1 %v8444_v54 }
 0x387   : > { %6113 = vmatprep.subr.bf16.mxu1 %v8449_v55  ;;  %5969 = vmatpush1.bf16.msra.mxu0 %v8525_v63 }
 0x388   : > { %5970 = vmatprep.subr.bf16.mxu0 %v8533_v29  ;;  %v8554_v29 = vld [vmem:[#allocation9 + $0x6ec] ss:$16 sps:$4 sm:$0xff]  }
 0x38a   : > { %6114 = vmatpush1.bf16.msra.mxu1 %v8447_v30 }
 0x38b   : > { %6115 = vmatprep.subr.bf16.mxu1 %v8452_v31  ;;  %5971 = vmatpush1.bf16.msra.mxu0 %v8531_v21 }
 0x38c   : > { %5972 = vmatprep.subr.bf16.mxu0 %v8539_v32  ;;  %v8552_v32 = vld [vmem:[#allocation9 + $0x6e8] ss:$16 sps:$4 sm:$0xff]  }
 0x38e   : > { %6116 = vmatpush1.bf16.msra.mxu1 %v8450_v26 }
 0x38f   : > { %6117 = vmatprep.subr.bf16.mxu1 %v8455_v43  ;;  %5973 = vmatpush1.bf16.msra.mxu0 %v8537_v18 }
 0x390   : > { %5974 = vmatprep.subr.bf16.mxu0 %v8545_v33 }
 0x392   : > { %6118 = vmatpush1.bf16.msra.mxu1 %v8453_v5 }
 0x393   : > { %6119 = vmatprep.subr.bf16.mxu1 %v8458_v36  ;;  %5975 = vmatpush1.bf16.msra.mxu0 %v8543_v1  ;;  %v8557_v1 = vld [vmem:[#allocation9 + $0x70c] ss:$16 sps:$4 sm:$0xff]  }
 0x394   : > { %5976 = vmatprep.subr.bf16.mxu0 %v8551_v35 }
 0x396   : > { %6120 = vmatpush1.bf16.msra.mxu1 %v8456_v49 }
 0x397   : > { %6121 = vmatprep.subr.bf16.mxu1 %v8464_v37  ;;  %5977 = vmatpush1.bf16.msra.mxu0 %v8549_v38  ;;  %v8579_v38 = vld [vmem:[#allocation12] ss:$8 sps:$4 sm:$0xff]  }
 0x398   : > { %6663 = vmatprep.subr.bf16.mxu0 %v8581_v16 }
 0x39a   : > { %6122 = vmatpush1.bf16.msra.mxu1 %v8462_v40 }
 0x39b   : > { %6123 = vmatprep.subr.bf16.mxu1 %v8470_v41  ;;  %v8555_v41 = vld [vmem:[#allocation9 + $0x708] ss:$16 sps:$4 sm:$0xff]  }
 0x39e   : > { %6124 = vmatpush1.bf16.msra.mxu1 %v8468_v42  ;;  %v8584_v42 = vld [vmem:[#allocation12 + $0x14] ss:$8 sps:$4 sm:$0xff]  }
 0x39f   : > { %6125 = vmatprep.subr.bf16.mxu1 %v8476_v45 }
 0x3a2   : > { %6126 = vmatpush1.bf16.msra.mxu1 %v8474_v10 }
 0x3a3   : > { %6127 = vmatprep.subr.bf16.mxu1 %v8482_v2 }
 0x3a6   : > { %6128 = vmatpush1.bf16.msra.mxu1 %v8480_v44  ;;  %v8560_v44 = vld [vmem:[#allocation9 + $0x72c] ss:$16 sps:$4 sm:$0xff]  }
 0x3a7   : > { %6129 = vmatprep.subr.bf16.mxu1 %v8488_v47 }
 0x3aa   : > { %6130 = vmatpush1.bf16.msra.mxu1 %v8486_v48 }
 0x3ab   : > { %6131 = vmatprep.subr.bf16.mxu1 %v8494_v15  ;;  %v8558_v15 = vld [vmem:[#allocation9 + $0x728] ss:$16 sps:$4 sm:$0xff]  }
 0x3ae   : > { %6132 = vmatpush1.bf16.msra.mxu1 %v8492_v52 }
 0x3af   : > { %6133 = vmatprep.subr.bf16.mxu1 %v8500_v57  ;;  %v8582_v57 = vld [vmem:[#allocation12 + $0x10] ss:$8 sps:$4 sm:$0xff]  }
 0x3b2   : > { %6134 = vmatpush1.bf16.msra.mxu1 %v8498_v24 }
 0x3b3   : > { %6135 = vmatprep.subr.bf16.mxu1 %v8506_v59  ;;  %v8587_v59 = vld [vmem:[#allocation12 + $0x24] ss:$8 sps:$4 sm:$0xff]  }
 0x3b6   : > { %6136 = vmatpush1.bf16.msra.mxu1 %v8504_v60 }
 0x3b7   : > { %6158 = vmatprep.subr.bf16.mxu1 %v8512_v61 }
 0x3b9   : > { %6138 = vmatmul.mubr.bf16.vlgmr.msra.gmra.mrb[24].mxu1 %v9596_v6  ;;  %v8534_v6 = vld [vmem:[#allocation9 + $0x688] ss:$16 sps:$4 sm:$0xff]  }
 0x3ba   : > { %6147 = vmatprep.mubr.bf16.mxu1 %v9605_v39  ;;  %6159 = vmatpush1.bf16.msra.mxu1 %v8510_v17  ;;  %v947_v39 = vsub.s32 7, %v9488_v28  ;;  %v8563_v17 = vld [vmem:[#allocation9 + $0x74c] ss:$16 sps:$4 sm:$0xff]  }
 0x3bb   : > { %6160 = vmatprep.subr.bf16.mxu1 %v8518_v46 }
 0x3bc   : > { %v948_v9 = vrot.slane %v9592_v13, %v947_v39  ;;  %v8564_v39 = vld [vmem:[#allocation9 + $0x768] ss:$16 sps:$4 sm:$0xff]  }
 0x3be   : > { %6161 = vmatpush1.bf16.msra.mxu1 %v8516_v62 }
 0x3bf   : > { %6162 = vmatprep.subr.bf16.mxu1 %v8524_v0 }
 0x3c1   : > { %6148 = vmatmul.mubr.bf16.gmra.mrb[28].mxu1 %v9603_v25  ;;  %v8548_v25 = vld [vmem:[#allocation9 + $0x6cc] ss:$16 sps:$4 sm:$0xff]  }
 0x3c2   : > { %6163 = vmatpush1.bf16.msra.mxu1 %v8522_v20 }
 0x3c3   : > { %6164 = vmatprep.subr.bf16.mxu1 %v8530_v51  ;;  %v8585_v51 = vld [vmem:[#allocation12 + $0x20] ss:$8 sps:$4 sm:$0xff]  }
 0x3c6   : > { %6165 = vmatpush1.bf16.msra.mxu1 %v8528_v3  ;;  %v8561_v3 = vld [vmem:[#allocation9 + $0x748] ss:$16 sps:$4 sm:$0xff]  }
 0x3c7   : > { %6166 = vmatprep.subr.bf16.mxu1 %v8536_v4  ;;  %v8590_v4 = vld [vmem:[#allocation12 + $0x34] ss:$8 sps:$4 sm:$0xff]  }
 0x3ca   : > { %6167 = vmatpush1.bf16.msra.mxu1 %v8534_v6  ;;  %v8588_v6 = vld [vmem:[#allocation12 + $0x30] ss:$8 sps:$4 sm:$0xff]  }
 0x3cb   : > { %6168 = vmatprep.subr.bf16.mxu1 %v8542_v58  ;;  %v8593_v58 = vld [vmem:[#allocation12 + $0x44] ss:$8 sps:$4 sm:$0xff]  }
 0x3cc   : > { %v4098_v50 = vpop.f32.mrb[16].mxu1 }
 0x3cd   : > { %v7866_v19 = vadd.f32 %v4098_v50, %v944_v8  ;;  %v4100_v22 = vpop.f32.mrb[17].mxu1  ;;  %v8572_v50 = vld [vmem:[#allocation9 + $0x7ac] ss:$16 sps:$4 sm:$0xff]  }
 0x3ce   : > { %v7867_v23 = vadd.f32 %v4100_v22, %v948_v9  ;;  %v4102_v56 = vpop.f32.mrb[18].mxu1  ;;  %6169 = vmatpush1.bf16.msra.mxu1 %v8540_v27  ;;  %v8567_v27 = vld [vmem:[#allocation9 + $0x788] ss:$16 sps:$4 sm:$0xff]  }
 0x3cf   : > { %v4155_v54 = vmul.f32 0.2, %v7866_v19  ;;  %v7868_v55 = vadd.f32 %v4102_v56, %v944_v8  ;;  %v4104_v63 = vpop.f32.mrb[19].mxu1  ;;  %6170 = vmatprep.subr.bf16.mxu1 %v8548_v25  ;;  %vm4123_vm8 = vcmp.gt.f32.partialorder %v7866_v19, 0.0  ;;  %v8596_v25 = vld [vmem:[#allocation12 + $0x54] ss:$8 sps:$4 sm:$0xff]  }
 0x3d0   : > { %v4156_v30 = vmul.f32 0.2, %v7867_v23  ;;  %v7869_v31 = vadd.f32 %v4104_v63, %v948_v9  ;;  %vm4124_vm9 = vcmp.gt.f32.partialorder %v7867_v23, 0.0  ;;  %v8570_v22 = vld [vmem:[#allocation9 + $0x7a8] ss:$16 sps:$4 sm:$0xff]  }
 0x3d1   : > { %vm4131_vm10 = vcmp.gt.f32.partialorder %v7868_v55, 0.0  ;;  %v4163_v13 = vmul.f32 0.2, %v7868_v55  ;;  %v4187_v26 = vsel %vm4123_vm8, %v7866_v19, %v4155_v54  ;;  %v8594_v19 = vld [vmem:[#allocation12 + $0x50] ss:$8 sps:$4 sm:$0xff]  }
 0x3d2   : > { %vm4132_vm11 = vcmp.gt.f32.partialorder %v7869_v31, 0.0  ;;  %v4164_v21 = vmul.f32 0.2, %v7869_v31  ;;  %6171 = vmatpush1.bf16.msra.mxu1 %v8546_v53  ;;  %v4188_v5 = vsel %vm4124_vm9, %v7867_v23, %v4156_v30  ;;  %v8599_v23 = vld [vmem:[#allocation12 + $0x64] ss:$8 sps:$4 sm:$0xff]  }
 0x3d3   : > { %v4195_v43 = vsel %vm4131_vm10, %v7868_v55, %v4163_v13  ;;  %6172 = vmatprep.subr.bf16.mxu1 %v8554_v29  ;;  %v8575_v56 = vld [vmem:[#allocation9 + $0x7cc] ss:$16 sps:$4 sm:$0xff]   ;;  %v8573_v54 = vld [vmem:[#allocation9 + $0x7c8] ss:$16 sps:$4 sm:$0xff]  }
 0x3d4   : > { %v9620_v18 = vpack.c.bf16 %v4195_v43, %v4187_v26  ;;  %v4108_v33 = vpop.f32.mrb[20].mxu1  ;;  %v4196_v36 = vsel %vm4132_vm11, %v7869_v31, %v4164_v21  ;;  %v8597_v53 = vld [vmem:[#allocation12 + $0x60] ss:$8 sps:$4 sm:$0xff]   ;;  %v8602_v55 = vld [vmem:[#allocation12 + $0x74] ss:$8 sps:$4 sm:$0xff]  }
 0x3d5   : > { %v7870_v35 = vadd.f32 %v4108_v33, %v944_v8  ;;  %v4110_v49 = vpop.f32.mrb[21].mxu1  ;;  %v4220_v37 = vpack.c.bf16 %v4196_v36, %v4188_v5  ;;  %v8578_v63 = vld [vmem:[#allocation9 + $0x7ec] ss:$16 sps:$4 sm:$0xff]   ;;  %v8576_v30 = vld [vmem:[#allocation9 + $0x7e8] ss:$16 sps:$4 sm:$0xff]  }
 0x3d6   : > { %v7871_v16 = vadd.f32 %v4110_v49, %v948_v9  ;;  %v4112_v40 = vpop.f32.mrb[22].mxu1  ;;  %6173 = vmatpush1.bf16.msra.mxu1 %v8552_v32  ;;  %v8600_v29 = vld [vmem:[#allocation12 + $0x70] ss:$8 sps:$4 sm:$0xff]   ;;  %v8605_v31 = vld [vmem:[#allocation12 + $0x84] ss:$8 sps:$4 sm:$0xff]  }
 0x3d7   : > { %v4171_v45 = vmul.f32 0.2, %v7870_v35  ;;  %v7872_v10 = vadd.f32 %v4112_v40, %v944_v8  ;;  %v4114_v2 = vpop.f32.mrb[23].mxu1  ;;  %5978 = vmatprep.mubr.bf16.mxu0 %v4220_v37  ;;  %6190 = vmatprep.mubr.bf16.mxu1 %v4220_v37  ;;  %vm4139_vm12 = vcmp.gt.f32.partialorder %v7870_v35, 0.0  ;;  %v8569_v8 = vld [vmem:[#allocation9 + $0x78c] ss:$16 sps:$4 sm:$0xff]  }
 0x3d8   : > { %v4172_v47 = vmul.f32 0.2, %v7871_v16  ;;  %v7873_v48 = vadd.f32 %v4114_v2, %v948_v9  ;;  %5979 = vmatmul.mubr.bf16.vlgmr.msra.gmra.mrb[16].mxu0 %v9620_v18  ;;  %6174 = vmatprep.subr.bf16.mxu1 %v8557_v1  ;;  %vm4140_vm13 = vcmp.gt.f32.partialorder %v7871_v16, 0.0  ;;  %v8591_v9 = vld [vmem:[#allocation12 + $0x40] ss:$8 sps:$4 sm:$0xff]  }
 0x3d9   : > { %vm4147_vm14 = vcmp.gt.f32.partialorder %v7872_v10, 0.0  ;;  %v4179_v52 = vmul.f32 0.2, %v7872_v10  ;;  %6664 = vmatpush1.bf16.msra.mxu0 %v8579_v38  ;;  %v4203_v60 = vsel %vm4139_vm12, %v7870_v35, %v4171_v45  ;;  %v8603_v13 = vld [vmem:[#allocation12 + $0x80] ss:$8 sps:$4 sm:$0xff]  }
 0x3da   : > { %vm4148_vm15 = vcmp.gt.f32.partialorder %v7873_v48, 0.0  ;;  %v4180_v24 = vmul.f32 0.2, %v7873_v48  ;;  %6175 = vmatpush1.bf16.msra.mxu1 %v8555_v41  ;;  %6665 = vmatprep.subr.bf16.mxu0 %v8584_v42  ;;  %v4204_v46 = vsel %vm4140_vm13, %v7871_v16, %v4172_v47  ;;  %v8608_v21 = vld [vmem:[#allocation12 + $0x94] ss:$8 sps:$4 sm:$0xff]  }
 0x3db   : > { %6176 = vmatprep.subr.bf16.mxu1 %v8560_v44  ;;  %v4211_v61 = vsel %vm4147_vm14, %v7872_v10, %v4179_v52  ;;  %v8606_v32 = vld [vmem:[#allocation12 + $0x90] ss:$8 sps:$4 sm:$0xff]   ;;  %v8611_v26 = vld [vmem:[#allocation12 + $0xa4] ss:$8 sps:$4 sm:$0xff]   ;;  %v8609_v43 = vld [vmem:[#allocation12 + $0xa0] ss:$8 sps:$4 sm:$0xff]  }
 0x3dc   : > { %v4212_v62 = vsel %vm4148_vm15, %v7873_v48, %v4180_v24  ;;  %v9624_v0 = vpack.c.bf16 %v4211_v61, %v4203_v60  ;;  %v8614_v33 = vld [vmem:[#allocation12 + $0xb4] ss:$8 sps:$4 sm:$0xff]   ;;  %v8612_v5 = vld [vmem:[#allocation12 + $0xb0] ss:$8 sps:$4 sm:$0xff]   ;;  %v8617_v36 = vld [vmem:[#allocation12 + $0xc4] ss:$8 sps:$4 sm:$0xff]  }
 0x3dd   : > { %v4228_v20 = vpack.c.bf16 %v4212_v62, %v4204_v46  ;;  %6666 = vmatpush1.bf16.msra.mxu0 %v8582_v57  ;;  %v8615_v1 = vld [vmem:[#allocation12 + $0xc0] ss:$8 sps:$4 sm:$0xff]   ;;  %v8620_v35 = vld [vmem:[#allocation12 + $0xd4] ss:$8 sps:$4 sm:$0xff]   ;;  %v8623_v49 = vld [vmem:[#allocation12 + $0xe4] ss:$8 sps:$4 sm:$0xff]  }
 0x3de   : > { %6177 = vmatpush1.bf16.msra.mxu1 %v8558_v15  ;;  %6667 = vmatprep.subr.bf16.mxu0 %v8587_v59  ;;  %v8621_v37 = vld [vmem:[#allocation12 + $0xe0] ss:$8 sps:$4 sm:$0xff]   ;;  %v8626_v38 = vld [vmem:[#allocation12 + $0xf4] ss:$8 sps:$4 sm:$0xff]   ;;  %v8624_v16 = vld [vmem:[#allocation12 + $0xf0] ss:$8 sps:$4 sm:$0xff]  }
 0x3df   : > { %5988 = vmatprep.mubr.bf16.mxu0 %v4228_v20  ;;  %6178 = vmatprep.subr.bf16.mxu1 %v8563_v17  ;;  %v8629_v40 = vld [vmem:[#allocation12 + $0x104] ss:$8 sps:$4 sm:$0xff]   ;;  %v9629_v41 = vld [vmem:[#allocation11] sm:$0xf] }
 0x3e0   : > { %5989 = vmatmul.mubr.bf16.gmra.mrb[20].mxu0 %v9624_v0  ;;  %v4490_v42 = vrot.slane %v9629_v41, %v9493_v34  ;;  %v4494_v45 = vrot.slane %v9629_v41, %v9499_v12 }
 0x3e1   : > { %6668 = vmatpush1.bf16.msra.mxu0 %v8585_v51 }
 0x3e2   : > { %6179 = vmatpush1.bf16.msra.mxu1 %v8561_v3  ;;  %6669 = vmatprep.subr.bf16.mxu0 %v8590_v4 }
 0x3e3   : > { %6180 = vmatprep.subr.bf16.mxu1 %v8566_v7 }
 0x3e5   : > { %6670 = vmatpush1.bf16.msra.mxu0 %v8588_v6  ;;  %v8627_v6 = vld [vmem:[#allocation12 + $0x100] ss:$8 sps:$4 sm:$0xff]  }
 0x3e6   : > { %6181 = vmatpush1.bf16.msra.mxu1 %v8564_v39  ;;  %6671 = vmatprep.subr.bf16.mxu0 %v8593_v58 }
 0x3e7   : > { %6182 = vmatprep.subr.bf16.mxu1 %v8569_v8  ;;  %v8632_v8 = vld [vmem:[#allocation12 + $0x114] ss:$8 sps:$4 sm:$0xff]  }
 0x3e9   : > { %6672 = vmatpush1.bf16.msra.mxu0 %v8591_v9 }
 0x3ea   : > { %6183 = vmatpush1.bf16.msra.mxu1 %v8567_v27  ;;  %6673 = vmatprep.subr.bf16.mxu0 %v8596_v25 }
 0x3eb   : > { %6184 = vmatprep.subr.bf16.mxu1 %v8572_v50 }
 0x3ed   : > { %6674 = vmatpush1.bf16.msra.mxu0 %v8594_v19 }
 0x3ee   : > { %6185 = vmatpush1.bf16.msra.mxu1 %v8570_v22  ;;  %6675 = vmatprep.subr.bf16.mxu0 %v8599_v23  ;;  %v8630_v23 = vld [vmem:[#allocation12 + $0x110] ss:$8 sps:$4 sm:$0xff]  }
 0x3ef   : > { %6186 = vmatprep.subr.bf16.mxu1 %v8575_v56 }
 0x3f1   : > { %6676 = vmatpush1.bf16.msra.mxu0 %v8597_v53  ;;  %v8635_v53 = vld [vmem:[#allocation12 + $0x124] ss:$8 sps:$4 sm:$0xff]  }
 0x3f2   : > { %6187 = vmatpush1.bf16.msra.mxu1 %v8573_v54  ;;  %6677 = vmatprep.subr.bf16.mxu0 %v8602_v55 }
 0x3f3   : > { %6188 = vmatprep.subr.bf16.mxu1 %v8578_v63 }
 0x3f5   : > { %6678 = vmatpush1.bf16.msra.mxu0 %v8600_v29 }
 0x3f6   : > { %6189 = vmatpush1.bf16.msra.mxu1 %v8576_v30  ;;  %6679 = vmatprep.subr.bf16.mxu0 %v8605_v31 }
 0x3f9   : > { %6191 = vmatmul.mubr.bf16.vlgmr.msra.gmra.mrb[24].mxu1 %v9620_v18  ;;  %6680 = vmatpush1.bf16.msra.mxu0 %v8603_v13  ;;  %v8618_v18 = vld [vmem:[#allocation12 + $0xd0] ss:$8 sps:$4 sm:$0xff]   ;;  %v8633_v13 = vld [vmem:[#allocation12 + $0x120] ss:$8 sps:$4 sm:$0xff]  }
 0x3fa   : > { %6200 = vmatprep.mubr.bf16.mxu1 %v4228_v20  ;;  %6681 = vmatprep.subr.bf16.mxu0 %v8608_v21  ;;  %v8638_v21 = vld [vmem:[#allocation12 + $0x134] ss:$8 sps:$4 sm:$0xff]  }
 0x3fd   : > { %6682 = vmatpush1.bf16.msra.mxu0 %v8606_v32  ;;  %v8636_v32 = vld [vmem:[#allocation12 + $0x130] ss:$8 sps:$4 sm:$0xff]  }
 0x3fe   : > { %6683 = vmatprep.subr.bf16.mxu0 %v8611_v26  ;;  %v8641_v26 = vld [vmem:[#allocation12 + $0x144] ss:$8 sps:$4 sm:$0xff]  }
 0x401   : > { %6201 = vmatmul.mubr.bf16.gmra.mrb[28].mxu1 %v9624_v0  ;;  %6684 = vmatpush1.bf16.msra.mxu0 %v8609_v43  ;;  %v8639_v43 = vld [vmem:[#allocation12 + $0x140] ss:$8 sps:$4 sm:$0xff]  }
 0x402   : > { %6685 = vmatprep.subr.bf16.mxu0 %v8614_v33  ;;  %v8644_v33 = vld [vmem:[#allocation12 + $0x154] ss:$8 sps:$4 sm:$0xff]  }
 0x405   : > { %6686 = vmatpush1.bf16.msra.mxu0 %v8612_v5  ;;  %v8642_v5 = vld [vmem:[#allocation12 + $0x150] ss:$8 sps:$4 sm:$0xff]  }
 0x406   : > { %6687 = vmatprep.subr.bf16.mxu0 %v8617_v36  ;;  %v4498_v36 = vrot.slane %v9629_v41, %v9554_v11 }
 0x409   : > { %6688 = vmatpush1.bf16.msra.mxu0 %v8615_v1  ;;  %v8647_v1 = vld [vmem:[#allocation12 + $0x164] ss:$8 sps:$4 sm:$0xff]  }
 0x40a   : > { %6689 = vmatprep.subr.bf16.mxu0 %v8620_v35  ;;  %v4502_v35 = vrot.slane %v9629_v41, %v931_v14  ;;  %v8653_v14 = vld [vmem:[#allocation12 + $0x184] ss:$8 sps:$4 sm:$0xff]  }
 0x40d   : > { %6690 = vmatpush1.bf16.msra.mxu0 %v8618_v18 }
 0x40e   : > { %6691 = vmatprep.subr.bf16.mxu0 %v8623_v49  ;;  %v8645_v49 = vld [vmem:[#allocation12 + $0x160] ss:$8 sps:$4 sm:$0xff]  }
 0x411   : > { %6692 = vmatpush1.bf16.msra.mxu0 %v8621_v37 }
 0x412   : > { %6693 = vmatprep.subr.bf16.mxu0 %v8626_v38 }
 0x415   : > { %6694 = vmatpush1.bf16.msra.mxu0 %v8624_v16  ;;  %v8650_v16 = vld [vmem:[#allocation12 + $0x174] ss:$8 sps:$4 sm:$0xff]  }
 0x416   : > { %6716 = vmatprep.subr.bf16.mxu0 %v8629_v40 }
 0x4ab   : > { %v5980_v10 = vpop.f32.mrb[16].mxu0 }
 0x4ac   : > { %v7874_v2 = vadd.f32 %v5980_v10, %v4490_v42  ;;  %v5982_v44 = vpop.f32.mrb[17].mxu0 }
 0x4ad   : > { %v7875_v47 = vadd.f32 %v5982_v44, %v4494_v45  ;;  %v5984_v48 = vpop.f32.mrb[18].mxu0 }
 0x4ae   : > { %v6227_v15 = vmul.f32 0.2, %v7874_v2  ;;  %v7876_v52 = vadd.f32 %v5984_v48, %v4490_v42  ;;  %v5986_v57 = vpop.f32.mrb[19].mxu0  ;;  %vm6211_vm0 = vcmp.gt.f32.partialorder %v7874_v2, 0.0  ;;  %v8648_v48 = vld [vmem:[#allocation12 + $0x170] ss:$8 sps:$4 sm:$0xff]  }
 0x4af   : > { %v6228_v24 = vmul.f32 0.2, %v7875_v47  ;;  %v7877_v59 = vadd.f32 %v5986_v57, %v4494_v45  ;;  %vm6212_vm1 = vcmp.gt.f32.partialorder %v7875_v47, 0.0 }
 0x4b0   : > { %vm6215_vm2 = vcmp.gt.f32.partialorder %v7876_v52, 0.0  ;;  %v6231_v60 = vmul.f32 0.2, %v7876_v52  ;;  %v6243_v17 = vsel %vm6211_vm0, %v7874_v2, %v6227_v15 }
 0x4b1   : > { %vm6216_vm3 = vcmp.gt.f32.partialorder %v7877_v59, 0.0  ;;  %v6232_v61 = vmul.f32 0.2, %v7877_v59  ;;  %v6244_v20 = vsel %vm6212_vm1, %v7875_v47, %v6228_v24 }
 0x4b2   : > { %v6247_v46 = vsel %vm6215_vm2, %v7876_v52, %v6231_v60 }
 0x4b3   : > { %v6259_v62 = vpack.c.bf16 %v6247_v46, %v6243_v17  ;;  %v5990_v0 = vpop.f32.mrb[20].mxu0  ;;  %v6248_v51 = vsel %vm6216_vm3, %v7877_v59, %v6232_v61  ;;  %v8651_v59 = vld [vmem:[#allocation12 + $0x180] ss:$8 sps:$4 sm:$0xff]  }
 0x4b4   : > { %v7878_v3 = vadd.f32 %v5990_v0, %v4490_v42  ;;  %v5992_v4 = vpop.f32.mrb[21].mxu0  ;;  %v6260_v7 = vpack.c.bf16 %v6248_v51, %v6244_v20  ;;  %v8656_v0 = vld [vmem:[#allocation12 + $0x194] ss:$8 sps:$4 sm:$0xff]  }
 0x4b5   : > { %v7879_v39 = vadd.f32 %v5992_v4, %v4494_v45  ;;  %v5994_v58 = vpop.f32.mrb[22].mxu0 }
 0x4b6   : > { %v6235_v9 = vmul.f32 0.2, %v7878_v3  ;;  %v7880_v27 = vadd.f32 %v5994_v58, %v4490_v42  ;;  %v5996_v25 = vpop.f32.mrb[23].mxu0  ;;  %6695 = vmatprep.mubr.bf16.mxu0 %v6260_v7  ;;  %vm6219_vm4 = vcmp.gt.f32.partialorder %v7878_v3, 0.0  ;;  %v8654_v58 = vld [vmem:[#allocation12 + $0x190] ss:$8 sps:$4 sm:$0xff]  }
 0x4b7   : > { %v6236_v50 = vmul.f32 0.2, %v7879_v39  ;;  %v7881_v19 = vadd.f32 %v5996_v25, %v4494_v45  ;;  %6696 = vmatmul.mubr.bf16.vlgmr.msra.gmra.mrb[24].mxu0 %v6259_v62  ;;  %vm6220_vm5 = vcmp.gt.f32.partialorder %v7879_v39, 0.0 }
 0x4b8   : > { %vm6223_vm6 = vcmp.gt.f32.partialorder %v7880_v27, 0.0  ;;  %v6239_v22 = vmul.f32 0.2, %v7880_v27  ;;  %6717 = vmatpush1.bf16.msra.mxu0 %v8627_v6  ;;  %v6251_v54 = vsel %vm6219_vm4, %v7878_v3, %v6235_v9  ;;  %v8659_v9 = vld [vmem:[#allocation12 + $0x1a4] ss:$8 sps:$4 sm:$0xff]  }
 0x4b9   : > { %vm6224_vm7 = vcmp.gt.f32.partialorder %v7881_v19, 0.0  ;;  %v6240_v56 = vmul.f32 0.2, %v7881_v19  ;;  %6718 = vmatprep.subr.bf16.mxu0 %v8632_v8  ;;  %v6252_v63 = vsel %vm6220_vm5, %v7879_v39, %v6236_v50 }
 0x4ba   : > { %v6255_v55 = vsel %vm6223_vm6, %v7880_v27, %v6239_v22 }
 0x4bb   : > { %v6256_v29 = vsel %vm6224_vm7, %v7881_v19, %v6240_v56  ;;  %v6263_v30 = vpack.c.bf16 %v6255_v55, %v6251_v54  ;;  %v8657_v19 = vld [vmem:[#allocation12 + $0x1a0] ss:$8 sps:$4 sm:$0xff]   ;;  %v8660_v55 = vld [vmem:[#allocation12 + $0x1b0] ss:$8 sps:$4 sm:$0xff]  }
 0x4bc   : > { %6719 = vmatpush1.bf16.msra.mxu0 %v8630_v23  ;;  %v6264_v31 = vpack.c.bf16 %v6256_v29, %v6252_v63  ;;  %v8665_v63 = vld [vmem:[#allocation12 + $0x1c4] ss:$8 sps:$4 sm:$0xff]   ;;  %v8663_v29 = vld [vmem:[#allocation12 + $0x1c0] ss:$8 sps:$4 sm:$0xff]  }
 0x4bd   : > { %6720 = vmatprep.subr.bf16.mxu0 %v8635_v53  ;;  %v8662_v53 = vld [vmem:[#allocation12 + $0x1b4] ss:$8 sps:$4 sm:$0xff]  }
 0x4be   : > { %6705 = vmatprep.mubr.bf16.mxu0 %v6264_v31  ;;  %v8666_v31 = vld [vmem:[#allocation12 + $0x1d0] ss:$8 sps:$4 sm:$0xff]  }
 0x4bf   : > { %6706 = vmatmul.mubr.bf16.gmra.mrb[28].mxu0 %v6263_v30  ;;  %v8668_v30 = vld [vmem:[#allocation12 + $0x1d4] ss:$8 sps:$4 sm:$0xff]  }
 0x4c0   : > { %6721 = vmatpush1.bf16.msra.mxu0 %v8633_v13  ;;  %v8671_v13 = vld [vmem:[#allocation12 + $0x1e4] ss:$8 sps:$4 sm:$0xff]  }
 0x4c1   : > { %6722 = vmatprep.subr.bf16.mxu0 %v8638_v21  ;;  %v8669_v21 = vld [vmem:[#allocation12 + $0x1e0] ss:$8 sps:$4 sm:$0xff]  }
 0x4c4   : > { %6723 = vmatpush1.bf16.msra.mxu0 %v8636_v32  ;;  %v8674_v32 = vld [vmem:[#allocation12 + $0x1f4] ss:$8 sps:$4 sm:$0xff]  }
 0x4c5   : > { %6724 = vmatprep.subr.bf16.mxu0 %v8641_v26  ;;  %v8672_v26 = vld [vmem:[#allocation12 + $0x1f0] ss:$8 sps:$4 sm:$0xff]  }
 0x4c8   : > { %6725 = vmatpush1.bf16.msra.mxu0 %v8639_v43  ;;  %v6793_v43 = vld [vmem:[#allocation15] sm:$0x3] }
 0x4c9   : > { %6726 = vmatprep.subr.bf16.mxu0 %v8644_v33  ;;  %v6331_v33 = vld [vmem:[#allocation14] sm:$0x3] }
 0x4cc   : > { %6727 = vmatpush1.bf16.msra.mxu0 %v8642_v5  ;;  %v6192_v18 = vpop.f32.mrb[24].mxu1  ;;  %v6794_v5 = vunpack.c.l.bf16 %v6793_v43 }
 0x4cd   : > { %v7882_v37 = vadd.f32 %v6192_v18, %v4498_v36  ;;  %v6194_v38 = vpop.f32.mrb[25].mxu1  ;;  %6728 = vmatprep.subr.bf16.mxu0 %v8647_v1  ;;  %v6340_v1 = vrot.slane %v6331_v33, %v9499_v12 }
 0x4ce   : > { %v7883_v40 = vadd.f32 %v6194_v38, %v4502_v35  ;;  %v6196_v42 = vpop.f32.mrb[26].mxu1  ;;  %v6803_v18 = vrot.slane %v6794_v5, %v9554_v11 }
 0x4cf   : > { %v6229_v45 = vmul.f32 0.2, %v7882_v37  ;;  %v7884_v10 = vadd.f32 %v6196_v42, %v4498_v36  ;;  %v6198_v2 = vpop.f32.mrb[27].mxu1  ;;  %vm6213_vm8 = vcmp.gt.f32.partialorder %v7882_v37, 0.0 }
 0x4d0   : > { %v6230_v44 = vmul.f32 0.2, %v7883_v40  ;;  %v7885_v47 = vadd.f32 %v6198_v2, %v4502_v35  ;;  %6729 = vmatpush1.bf16.msra.mxu0 %v8645_v49  ;;  %vm6214_vm9 = vcmp.gt.f32.partialorder %v7883_v40, 0.0 }
 0x4d1   : > { %vm6217_vm10 = vcmp.gt.f32.partialorder %v7884_v10, 0.0  ;;  %v6233_v28 = vmul.f32 0.2, %v7884_v10  ;;  %6730 = vmatprep.subr.bf16.mxu0 %v8650_v16  ;;  %v6245_v15 = vsel %vm6213_vm8, %v7882_v37, %v6229_v45 }
 0x4d2   : > { %vm6218_vm11 = vcmp.gt.f32.partialorder %v7885_v47, 0.0  ;;  %v6234_v41 = vmul.f32 0.2, %v7885_v47  ;;  %v6246_v60 = vsel %vm6214_vm9, %v7883_v40, %v6230_v44  ;;  %v6813_v44 = vrot.slane %v6803_v18, %v9493_v34 }
 0x4d3   : > { %v6249_v52 = vsel %vm6217_vm10, %v7884_v10, %v6233_v28 }
 0x4d4   : > { %v6261_v57 = vpack.c.bf16 %v6249_v52, %v6245_v15  ;;  %6731 = vmatpush1.bf16.msra.mxu0 %v8648_v48  ;;  %v6202_v24 = vpop.f32.mrb[28].mxu1  ;;  %v6250_v61 = vsel %vm6218_vm11, %v7885_v47, %v6234_v41 }
 0x4d5   : > { %v7886_v17 = vadd.f32 %v6202_v24, %v4498_v36  ;;  %v6204_v46 = vpop.f32.mrb[29].mxu1  ;;  %6732 = vmatprep.subr.bf16.mxu0 %v8653_v14  ;;  %v6262_v62 = vpack.c.bf16 %v6250_v61, %v6246_v60 }
 0x4d6   : > { %v7887_v20 = vadd.f32 %v6204_v46, %v4502_v35  ;;  %v6206_v51 = vpop.f32.mrb[30].mxu1 }
 0x4d7   : > { %v6237_v3 = vmul.f32 0.2, %v7886_v17  ;;  %v7888_v4 = vadd.f32 %v6206_v51, %v4498_v36  ;;  %v6208_v7 = vpop.f32.mrb[31].mxu1  ;;  %6748 = vmatprep.mubr.bf16.mxu0 %v6262_v62  ;;  %vm6221_vm12 = vcmp.gt.f32.partialorder %v7886_v17, 0.0  ;;  %v6336_v36 = vrot.slane %v6331_v33, %v9493_v34 }
 0x4d8   : > { %v6238_v6 = vmul.f32 0.2, %v7887_v20  ;;  %v7889_v39 = vadd.f32 %v6208_v7, %v4502_v35  ;;  %6733 = vmatpush1.bf16.msra.mxu0 %v8651_v59  ;;  %vm6222_vm13 = vcmp.gt.f32.partialorder %v7887_v20, 0.0  ;;  %v6799_v35 = vrot.slane %v6794_v5, %v9493_v34 }
 0x4d9   : > { %vm6225_vm14 = vcmp.gt.f32.partialorder %v7888_v4, 0.0  ;;  %v6241_v8 = vmul.f32 0.2, %v7888_v4  ;;  %6734 = vmatprep.subr.bf16.mxu0 %v8656_v0  ;;  %v6253_v25 = vsel %vm6221_vm12, %v7886_v17, %v6237_v3 }
 0x4da   : > { %vm6226_vm15 = vcmp.gt.f32.partialorder %v7889_v39, 0.0  ;;  %v6242_v27 = vmul.f32 0.2, %v7889_v39  ;;  %v6254_v22 = vsel %vm6222_vm13, %v7887_v20, %v6238_v6  ;;  %v6809_v42 = vrot.slane %v6799_v35, %v9493_v34 }
 0x4db   : > { %v6257_v50 = vsel %vm6225_vm14, %v7888_v4, %v6241_v8 }
 0x4dc   : > { %6735 = vmatpush1.bf16.msra.mxu0 %v8654_v58  ;;  %v6258_v23 = vsel %vm6226_vm15, %v7889_v39, %v6242_v27  ;;  %v6265_v56 = vpack.c.bf16 %v6257_v50, %v6253_v25 }
 0x4dd   : > { %6736 = vmatprep.subr.bf16.mxu0 %v8659_v9  ;;  %v6266_v54 = vpack.c.bf16 %v6258_v23, %v6254_v22 }
 0x4e0   : > { %6737 = vmatpush1.bf16.msra.mxu0 %v8657_v19 }
 0x4e1   : > { %6738 = vmatprep.subr.bf16.mxu0 %v8662_v53  ;;  %v7827_v53 = vld [vmem:[#allocation2] ss:$0 sm:$0xff] }
 0x4e4   : > { %6739 = vmatpush1.bf16.msra.mxu0 %v8660_v55 }
 0x4e5   : > { %6740 = vmatprep.subr.bf16.mxu0 %v8665_v63 }
 0x4e8   : > { %6741 = vmatpush1.bf16.msra.mxu0 %v8663_v29 }
 0x4e9   : > { %6742 = vmatprep.subr.bf16.mxu0 %v8668_v30 }
 0x4ec   : > { %6743 = vmatpush1.bf16.msra.mxu0 %v8666_v31 }
 0x4ed   : > { %6744 = vmatprep.subr.bf16.mxu0 %v8671_v13 }
 0x4f0   : > { %6745 = vmatpush1.bf16.msra.mxu0 %v8669_v21 }
 0x4f1   : > { %6746 = vmatprep.subr.bf16.mxu0 %v8674_v32 }
 0x4f4   : > { %6747 = vmatpush1.bf16.msra.mxu0 %v8672_v26 }
 0x4f7   : > { %6749 = vmatmul.mubr.bf16.vlgmr.msra.gmra.mrb[24].mxu0 %v6261_v57 }
 0x4f8   : > { %6758 = vmatprep.mubr.bf16.mxu0 %v6266_v54 }
 0x4ff   : > { %6759 = vmatmul.mubr.bf16.gmra.mrb[28].mxu0 %v6265_v56 }
 0x5ca   : > { %v6750_v49 = vpop.f32.mrb[24].mxu0 }
 0x5cb   : > { %v7890_v37 = vadd.f32 %v6750_v49, %v6336_v36  ;;  %v6752_v38 = vpop.f32.mrb[25].mxu0 }
 0x5cc   : > { %v7891_v16 = vadd.f32 %v6752_v38, %v6340_v1  ;;  %v6754_v40 = vpop.f32.mrb[26].mxu0 }
 0x5cd   : > { %vm6769_vm0 = vcmp.gt.f32.partialorder %v7890_v37, 0.0  ;;  %v6777_v45 = vmul.f32 0.2, %v7890_v37  ;;  %v7892_v10 = vadd.f32 %v6754_v40, %v6336_v36  ;;  %v6756_v2 = vpop.f32.mrb[27].mxu0 }
 0x5ce   : > { %vm6770_vm1 = vcmp.gt.f32.partialorder %v7891_v16, 0.0  ;;  %v6778_v47 = vmul.f32 0.2, %v7891_v16  ;;  %v7893_v12 = vadd.f32 %v6756_v2, %v6340_v1 }
 0x5cf   : > { %vm6771_vm2 = vcmp.gt.f32.partialorder %v7892_v10, 0.0  ;;  %v6779_v48 = vmul.f32 0.2, %v7892_v10  ;;  %v6785_v28 = vsel %vm6769_vm0, %v7890_v37, %v6777_v45 }
 0x5d0   : > { %vm6772_vm3 = vcmp.gt.f32.partialorder %v7893_v12, 0.0  ;;  %v6780_v11 = vmul.f32 0.2, %v7893_v12  ;;  %v6786_v14 = vsel %vm6770_vm1, %v7891_v16, %v6778_v47  ;;  %v6814_v41 = vmul.f32 %v6809_v42, %v6785_v28 }
 0x5d1   : > { %v6815_v15 = vmul.f32 %v6813_v44, %v6786_v14  ;;  %v6787_v52 = vsel %vm6771_vm2, %v7892_v10, %v6779_v48 }
 0x5d2   : > { %v6760_v57 = vpop.f32.mrb[28].mxu0  ;;  %v6788_v24 = vsel %vm6772_vm3, %v7893_v12, %v6780_v11  ;;  %v6816_v59 = vmul.f32 %v6809_v42, %v6787_v52 }
 0x5d3   : > { %v7894_v60 = vadd.f32 %v6760_v57, %v6336_v36  ;;  %v6762_v61 = vpop.f32.mrb[29].mxu0  ;;  %v6822_v17 = vadd.f32 %v6815_v15, %v6814_v41  ;;  %v6817_v46 = vmul.f32 %v6813_v44, %v6788_v24 }
 0x5d4   : > { %v7895_v34 = vadd.f32 %v6762_v61, %v6340_v1  ;;  %v6764_v62 = vpop.f32.mrb[30].mxu0 }
 0x5d5   : > { %vm6773_vm4 = vcmp.gt.f32.partialorder %v7894_v60, 0.0  ;;  %v6781_v0 = vmul.f32 0.2, %v7894_v60  ;;  %v7896_v20 = vadd.f32 %v6764_v62, %v6336_v36  ;;  %v6766_v51 = vpop.f32.mrb[31].mxu0  ;;  %6823 = vadd.xlane.f32.xlu0 %v6822_v17  ;;  %v6825_v3 = vadd.f32 %v6817_v46, %v6816_v59 }
 0x5d6   : > { %vm6774_vm5 = vcmp.gt.f32.partialorder %v7895_v34, 0.0  ;;  %v6782_v4 = vmul.f32 0.2, %v7895_v34  ;;  %v7897_v7 = vadd.f32 %v6766_v51, %v6340_v1 }
 0x5d7   : > { %vm6775_vm6 = vcmp.gt.f32.partialorder %v7896_v20, 0.0  ;;  %v6783_v6 = vmul.f32 0.2, %v7896_v20  ;;  %v6789_v39 = vsel %vm6773_vm4, %v7894_v60, %v6781_v0 }
 0x5d8   : > { %vm6776_vm7 = vcmp.gt.f32.partialorder %v7897_v7, 0.0  ;;  %v6784_v58 = vmul.f32 0.2, %v7897_v7  ;;  %v6790_v8 = vsel %vm6774_vm5, %v7895_v34, %v6782_v4  ;;  %v6818_v9 = vmul.f32 %v6809_v42, %v6789_v39 }
 0x5d9   : > { %6826 = vadd.xlane.f32.xlu0 %v6825_v3  ;;  %v6819_v27 = vmul.f32 %v6813_v44, %v6790_v8  ;;  %v6791_v25 = vsel %vm6775_vm6, %v7896_v20, %v6783_v6 }
 0x5da   : > { %v6792_v50 = vsel %vm6776_vm7, %v7897_v7, %v6784_v58  ;;  %v6820_v19 = vmul.f32 %v6809_v42, %v6791_v25 }
 0x5db   : > { %v6828_v22 = vadd.f32 %v6819_v27, %v6818_v9  ;;  %v6821_v23 = vmul.f32 %v6813_v44, %v6792_v50 }
 0x5dd   : > { %6829 = vadd.xlane.f32.xlu1 %v6828_v22  ;;  %v6831_v56 = vadd.f32 %v6821_v23, %v6820_v19 }
 0x5e1   : > { %6832 = vadd.xlane.f32.xlu1 %v6831_v56 }
 0x662   : > { %v6824_v54 = vpop.xlane.xlu0 %6823 }
 0x663   : > { %v6841_v55 = vadd.f32 %v7827_v53, %v6824_v54 }
 0x665   : > { %6847 = vperm.xlu0 %8173, %v6841_v55  }
 0x666   : > { %v6827_v63 = vpop.xlane.xlu0 %6826 }
 0x667   : > { %v6842_v29 = vadd.f32 %v7827_v53, %v6827_v63 }
 0x669   : > { %6852 = vperm.xlu1 %8174, %v6842_v29  }
 0x66a   : > { %v6830_v30 = vpop.xlane.xlu1 %6829 }
 0x66b   : > { %v6843_v31 = vadd.f32 %v7827_v53, %v6830_v30 }
 0x66d   : > { %6857 = vperm.xlu1 %8174, %v6843_v31  }
 0x66e   : > { %v6833_v13 = vpop.xlane.xlu1 %6832 }
 0x66f   : > { %v6844_v21 = vadd.f32 %v7827_v53, %v6833_v13 }
 0x671   : > { %6862 = vperm.xlu1 %8174, %v6844_v21  }
 0x6e4   : > { %v6848_v32 = vpop.permute.xlu0 %6847 }
 0x6e5   : > { %6865 = vst [vmem:[%s447_s27] sm:$0xff] %v6848_v32 }
 0x6e8   : > { %v6853_v26 = vpop.permute.xlu1 %6852 }
 0x6e9   : > { %6866 = vst [vmem:[%s447_s27 + $0x8] sm:$0xff] %v6853_v26 }
 0x6ec   : > { %v6858_v43 = vpop.permute.xlu1 %6857 }
 0x6ed   : > { %6867 = vst [vmem:[%s447_s27 + $0x10] sm:$0xff] %v6858_v43 }
 0x6f0   : > { %v6863_v33 = vpop.permute.xlu1 %6862 }
 0x6f1   : > { %6868 = vst [vmem:[%s447_s27 + $0x18] sm:$0xff] %v6863_v33 }
 0x6f2   : > { %8940 = shalt.err (!%p8937_p9)
}
 0x6f3   : > { %s8941_s8 = scalar_lea.hbm %s9653_s30, 512  ;;  %s8945_s17 = scalar_lea.hbm %s9706_s9, 1024 }
 0x6f4   : > { %p8942_p4 = scmp.ne.s32.totalorder %s9653_s30, %s8941_s8  ;;  %p8946_p5 = scmp.lt.u32.totalorder %s9653_s30, %s9706_s9 }
 0x6f5   : > { %p8947_p2 = scmp.lt.u32.totalorder %s8945_s17, %s8941_s8  ;;  %p8949_p10 = scmp.lt.u32.totalorder %s8941_s8, %s9653_s30 }
 0x6f6   : > { %p8943_p3 = pnand %p8942_p4, %p9731_p1 }
 0x6f7   : > { %p8948_p7 = por %p8947_p2, %p8946_p5 }
 0x6f8   : > { %p8944_p0 = pneg %p8943_p3 }
 0x6f9   : > { %p8950_p11 = por %p8949_p10, %p8948_p7 }
 0x6fb   : > { %p8951_p12 = pnand %p8950_p11, %p8944_p0 }
 0x6fd   : > { %8954 = shalt.err (!%p8951_p12)
}
 0x6fe   : > { %s9029_s15 = smov 128   ;;  %s9030_s21 = smov 8  }
 0x6ff   : > { %8075 = dma.vmem_to_hbm [thread:$0]  (%p9731_p1), %s9648_s10, 512, %s9653_s30, %s6870_s18, %s9029_s15, %s9029_s15, %s9030_s21  }
 0x700 PF: > { %s6898_s23 = sand.u32 1, %s8997_s11   ;;  %p9732_p13 = scmp.ne.s32.totalorder %s9720_s24, 0 }
 0x701   : > { %p9733_p8 = scmp.ge.s32.totalorder %s9009_s14, 2  ;;  %s6899_s16 = scalar_lea.sflag [#allocation5], %s6898_s23 }
 0x703   : > { %p8104_p6 = pnand %p9733_p8, %p9732_p13 }
 0x705   : > { %8992 = dma.done.wait (!%p8104_p6), %s6899_s16, 512  }
 0x706   : > { %8994 = vsyncadd (!%p8104_p6), %s6899_s16, 4294966784  ;;  %p28_p9 = scmp.ge.s32.totalorder %s9274_s20, 4   ;;  %s9734_s11 = smov %s9001_s12 }
 0x707   : > { %s9735_s12 = smov %s9005_s13  ;;  %s9736_s13 = smov %s9286_s26 }
 0x708   : > { %s9737_s14 = smov %s9274_s20  ;;  %30 = sbr.rel (!%p28_p9) target bundleno = 12 (0xc), region = 129 }
 0x70f   :  { %6904 = vsyncpa [#allocation4], 1 }
 0x710   :  { %6906 = vsyncpa [#allocation4 + $0x1], 1 }
 0x711   :  { %6907 = vsyncpa [#allocation7], 1 }
 0x712   :  { %6908 = vsyncpa [#allocation10], 1 }
 0x713   :  { %6909 = vsyncpa [#allocation13], 1 }
 0x714   :  { %6910 = vsyncpa [#allocation16], 1 }
 0x715   :  { %6911 = vsyncpa [#allocation5], 1 }
 0x716   :  { %6913 = vsyncpa [#allocation5 + $0x1], 1 }

</bundles_post_ra>
